<compile_context>
chip_gen: v6e
topology: v6e:2x2x1
jax: 0.10.0
libtpu: 0.0.40
codegen_flags: <defaults>
</compile_context>

<pallas_src>
import jax
import jax.numpy as jnp
from jax import lax
from jax.experimental import pallas as pl
from jax.experimental.pallas import tpu as pltpu

# ---- small BERT config (scaled down from 768-hidden BERT-base) -------------
BATCH = 2
SEQ = 8
HIDDEN = 64
N_HEADS = 4
HEAD_DIM = HIDDEN // N_HEADS
FFN = 128
N_LAYERS = 2
VOCAB = 100
MAX_POS = 16
NUM_LABELS = 2
LN_EPS = 1e-12
TOKENS = BATCH * SEQ


# ---------------------------------------------------------------------------
# Fused forward kernel (single pallas_call, everything VMEM-resident)
# ---------------------------------------------------------------------------
def _layernorm(x, g, b):
    mu = jnp.mean(x, axis=-1, keepdims=True)
    var = jnp.mean(jnp.square(x - mu), axis=-1, keepdims=True)
    inv = lax.rsqrt(var + LN_EPS)
    return (x - mu) * inv * g + b


def _fused_forward_kernel(
    ids_ref, labels_ref,
    word_emb_ref, pos_emb_ref, type_emb_ref, emb_ln_g_ref, emb_ln_b_ref,
    wqkv_ref, bqkv_ref, wo_ref, bo_ref, ln1_g_ref, ln1_b_ref,
    w1_ref, b1_ref, w2_ref, b2_ref, ln2_g_ref, ln2_b_ref,
    pool_w_ref, pool_b_ref, cls_w_ref, cls_b_ref,
    loss_ref, logits_ref,
):
    f32 = jnp.float32

    # ---- embeddings: word (one-hot matmul gather) + position + token_type(=0)
    ids = ids_ref[...]                                               # (T, 1) int32
    vocab_iota = lax.broadcasted_iota(jnp.int32, (TOKENS, VOCAB), 1)
    onehot_ids = (vocab_iota == ids).astype(f32)                     # (T, VOCAB)
    word = jnp.dot(onehot_ids, word_emb_ref[...], preferred_element_type=f32)

    pos_pt = pos_emb_ref[...][:SEQ, :] + type_emb_ref[...][0:1, :]   # (S, H)
    other = jnp.concatenate([pos_pt] * BATCH, axis=0)                # (T, H)
    h = _layernorm(word + other, emb_ln_g_ref[...], emb_ln_b_ref[...])

    scale = 1.0 / float(HEAD_DIM) ** 0.5

    # ---- encoder layers (static Python loop, weights indexed by leading axis)
    for l in range(N_LAYERS):
        # fused QKV projection -> (T, 3H), lane-dense output (192 >= 128 lanes)
        qkv = jnp.dot(h, wqkv_ref[l], preferred_element_type=f32) + bqkv_ref[l]

        # per-(batch, head) attention via static row/lane slices, no HBM traffic
        ctx_rows = []
        for b in range(BATCH):
            r0 = b * SEQ
            head_outs = []
            for hd in range(N_HEADS):
                qo = hd * HEAD_DIM
                ko = HIDDEN + hd * HEAD_DIM
                vo = 2 * HIDDEN + hd * HEAD_DIM
                q = qkv[r0:r0 + SEQ, qo:qo + HEAD_DIM]               # (S, D)
                k = qkv[r0:r0 + SEQ, ko:ko + HEAD_DIM]               # (S, D)
                v = qkv[r0:r0 + SEQ, vo:vo + HEAD_DIM]               # (S, D)
                # QK^T without materializing a transpose of K
                s = lax.dot_general(q, k, (((1,), (1,)), ((), ())),
                                    preferred_element_type=f32) * scale
                m = jnp.max(s, axis=-1, keepdims=True)
                p = jnp.exp(s - m)
                p = p * pl.reciprocal(jnp.sum(p, axis=-1, keepdims=True),
                                      approx=True)
                head_outs.append(jnp.dot(p, v, preferred_element_type=f32))
            ctx_rows.append(jnp.concatenate(head_outs, axis=1))       # (S, H)
        ctx = jnp.concatenate(ctx_rows, axis=0)                       # (T, H)

        attn = jnp.dot(ctx, wo_ref[l], preferred_element_type=f32) + bo_ref[l]
        h = _layernorm(attn + h, ln1_g_ref[l], ln1_b_ref[l])

        inter = jnp.dot(h, w1_ref[l], preferred_element_type=f32) + b1_ref[l]
        # TODO(synk): HF BERT uses exact (erf) GELU; tanh approximation used
        # here for Mosaic-friendly lowering.
        inter = jax.nn.gelu(inter, approximate=True)
        ffn = jnp.dot(inter, w2_ref[l], preferred_element_type=f32) + b2_ref[l]
        h = _layernorm(ffn + h, ln2_g_ref[l], ln2_b_ref[l])

    # ---- pooler (tanh dense on [CLS]) + classifier + cross-entropy ----------
    cls_tok = jnp.concatenate([h[b * SEQ:b * SEQ + 1, :] for b in range(BATCH)],
                              axis=0)                                 # (B, H)
    pooled = jnp.tanh(jnp.dot(cls_tok, pool_w_ref[...],
                              preferred_element_type=f32) + pool_b_ref[...])
    logits = jnp.dot(pooled, cls_w_ref[...],
                     preferred_element_type=f32) + cls_b_ref[...]     # (B, 2)

    lbl = labels_ref[...]                                             # (B, 1) int32
    lbl_iota = lax.broadcasted_iota(jnp.int32, (BATCH, NUM_LABELS), 1)
    onehot_lbl = (lbl_iota == lbl).astype(f32)
    m = jnp.max(logits, axis=-1, keepdims=True)
    lse = jnp.log(jnp.sum(jnp.exp(logits - m), axis=-1, keepdims=True)) + m
    nll = lse - jnp.sum(logits * onehot_lbl, axis=-1, keepdims=True)  # (B, 1)

    loss_ref[...] = jnp.mean(nll, keepdims=True)                      # (1, 1)
    logits_ref[...] = logits.astype(logits_ref.dtype)


# ---------------------------------------------------------------------------
# Parameter init (deterministic synthetic weights, BERT-style N(0, 0.02))
# ---------------------------------------------------------------------------
def init_params(key):
    def nrm(k, shape):
        return jax.random.normal(k, shape, jnp.float32) * 0.02

    keys = iter(jax.random.split(key, 8 + N_LAYERS * 4))

    wqkv, wo, w1, w2 = [], [], [], []
    for _ in range(N_LAYERS):
        wqkv.append(nrm(next(keys), (HIDDEN, 3 * HIDDEN)))
        wo.append(nrm(next(keys), (HIDDEN, HIDDEN)))
        w1.append(nrm(next(keys), (HIDDEN, FFN)))
        w2.append(nrm(next(keys), (FFN, HIDDEN)))

    params = {
        "word_emb": nrm(next(keys), (VOCAB, HIDDEN)),
        "pos_emb": nrm(next(keys), (MAX_POS, HIDDEN)),
        "type_emb": nrm(next(keys), (2, HIDDEN)),
        "emb_ln_g": jnp.ones((1, HIDDEN), jnp.float32),
        "emb_ln_b": jnp.zeros((1, HIDDEN), jnp.float32),
        "wqkv": jnp.stack(wqkv),                                # (L, H, 3H)
        "bqkv": jnp.zeros((N_LAYERS, 1, 3 * HIDDEN), jnp.float32),
        "wo": jnp.stack(wo),                                    # (L, H, H)
        "bo": jnp.zeros((N_LAYERS, 1, HIDDEN), jnp.float32),
        "ln1_g": jnp.ones((N_LAYERS, 1, HIDDEN), jnp.float32),
        "ln1_b": jnp.zeros((N_LAYERS, 1, HIDDEN), jnp.float32),
        "w1": jnp.stack(w1),                                    # (L, H, FFN)
        "b1": jnp.zeros((N_LAYERS, 1, FFN), jnp.float32),
        "w2": jnp.stack(w2),                                    # (L, FFN, H)
        "b2": jnp.zeros((N_LAYERS, 1, HIDDEN), jnp.float32),
        "ln2_g": jnp.ones((N_LAYERS, 1, HIDDEN), jnp.float32),
        "ln2_b": jnp.zeros((N_LAYERS, 1, HIDDEN), jnp.float32),
        "pool_w": nrm(next(keys), (HIDDEN, HIDDEN)),
        "pool_b": jnp.zeros((1, HIDDEN), jnp.float32),
        "cls_w": nrm(next(keys), (HIDDEN, NUM_LABELS)),
        "cls_b": jnp.zeros((1, NUM_LABELS), jnp.float32),
    }
    return params


_PARAM_ORDER = (
    "word_emb", "pos_emb", "type_emb", "emb_ln_g", "emb_ln_b",
    "wqkv", "bqkv", "wo", "bo", "ln1_g", "ln1_b",
    "w1", "b1", "w2", "b2", "ln2_g", "ln2_b",
    "pool_w", "pool_b", "cls_w", "cls_b",
)


# ---------------------------------------------------------------------------
# Forward pass (QGgenerate.forward semantics) — ONE pallas_call
# ---------------------------------------------------------------------------
def qg_generate_forward(params, input_ids, labels, return_logits=None):
    B, S = input_ids.shape
    ids2 = input_ids.reshape(B * S, 1).astype(jnp.int32)
    lbl2 = labels.reshape(B, 1).astype(jnp.int32)
    inputs = [ids2, lbl2] + [params[k] for k in _PARAM_ORDER]

    def full_spec(a):
        nd = a.ndim
        return pl.BlockSpec(a.shape, lambda i, _nd=nd: (0,) * _nd)

    loss, logits = pl.pallas_call(
        _fused_forward_kernel,
        out_shape=(
            jax.ShapeDtypeStruct((1, 1), jnp.float32),
            jax.ShapeDtypeStruct((B, NUM_LABELS), jnp.float32),
        ),
        grid=(1,),
        in_specs=[full_spec(a) for a in inputs],
        out_specs=(
            pl.BlockSpec((1, 1), lambda i: (0, 0)),
            pl.BlockSpec((B, NUM_LABELS), lambda i: (0, 0)),
        ),
        compiler_params=pltpu.CompilerParams(
            dimension_semantics=("arbitrary",)),
    )(*inputs)

    if return_logits:
        return logits
    return loss[0, 0]


# ---------------------------------------------------------------------------
if __name__ == "__main__":
    key = jax.random.PRNGKey(0)
    k_params, k_ids, k_lbl = jax.random.split(key, 3)

    params = init_params(k_params)
    input_ids = jax.random.randint(k_ids, (BATCH, SEQ), 0, VOCAB, dtype=jnp.int32)
    labels = jax.random.randint(k_lbl, (BATCH,), 0, NUM_LABELS, dtype=jnp.int32)

    loss = qg_generate_forward(params, input_ids, labels)             # default: loss
    logits = qg_generate_forward(params, input_ids, labels, return_logits=True)
    jax.block_until_ready(loss)
    jax.block_until_ready(logits)

    assert loss.shape == () and logits.shape == (BATCH, NUM_LABELS)
    assert jnp.isfinite(loss) and bool(jnp.all(jnp.isfinite(logits)))
    print("KERNEL_OK")
</pallas_src>

<mosaic_0001>
module attributes {stable_mosaic.version = 11 : i64} {
  func.func @_fused_forward_kernel(%arg0: i32, %arg1: memref<16x1xi32, #tpu.memory_space<vmem>>, %arg2: memref<2x1xi32, #tpu.memory_space<vmem>>, %arg3: memref<100x64xf32, #tpu.memory_space<vmem>>, %arg4: memref<16x64xf32, #tpu.memory_space<vmem>>, %arg5: memref<2x64xf32, #tpu.memory_space<vmem>>, %arg6: memref<1x64xf32, #tpu.memory_space<vmem>>, %arg7: memref<1x64xf32, #tpu.memory_space<vmem>>, %arg8: memref<2x64x192xf32, #tpu.memory_space<vmem>>, %arg9: memref<2x1x192xf32, #tpu.memory_space<vmem>>, %arg10: memref<2x64x64xf32, #tpu.memory_space<vmem>>, %arg11: memref<2x1x64xf32, #tpu.memory_space<vmem>>, %arg12: memref<2x1x64xf32, #tpu.memory_space<vmem>>, %arg13: memref<2x1x64xf32, #tpu.memory_space<vmem>>, %arg14: memref<2x64x128xf32, #tpu.memory_space<vmem>>, %arg15: memref<2x1x128xf32, #tpu.memory_space<vmem>>, %arg16: memref<2x128x64xf32, #tpu.memory_space<vmem>>, %arg17: memref<2x1x64xf32, #tpu.memory_space<vmem>>, %arg18: memref<2x1x64xf32, #tpu.memory_space<vmem>>, %arg19: memref<2x1x64xf32, #tpu.memory_space<vmem>>, %arg20: memref<64x64xf32, #tpu.memory_space<vmem>>, %arg21: memref<1x64xf32, #tpu.memory_space<vmem>>, %arg22: memref<64x2xf32, #tpu.memory_space<vmem>>, %arg23: memref<1x2xf32, #tpu.memory_space<vmem>>, %arg24: memref<1x1xf32, #tpu.memory_space<vmem>>, %arg25: memref<2x2xf32, #tpu.memory_space<vmem>>) attributes {dimension_semantics = [#tpu.dimension_semantics<arbitrary>], iteration_bounds = array<i64: 1>, scalar_prefetch = 0 : i64, scratch_operands = 0 : i64, tpu.core_type = #tpu.core_type<tc>, window_params = [{pipeline_mode = #tpu.pipeline_mode<synchronous>, transform_indices = @transform_0, window_bounds = array<i64: 16, 1>}, {pipeline_mode = #tpu.pipeline_mode<synchronous>, transform_indices = @transform_1, window_bounds = array<i64: 2, 1>}, {pipeline_mode = #tpu.pipeline_mode<synchronous>, transform_indices = @transform_2, window_bounds = array<i64: 100, 64>}, {pipeline_mode = #tpu.pipeline_mode<synchronous>, transform_indices = @transform_3, window_bounds = array<i64: 16, 64>}, {pipeline_mode = #tpu.pipeline_mode<synchronous>, transform_indices = @transform_4, window_bounds = array<i64: 2, 64>}, {pipeline_mode = #tpu.pipeline_mode<synchronous>, transform_indices = @transform_5, window_bounds = array<i64: 1, 64>}, {pipeline_mode = #tpu.pipeline_mode<synchronous>, transform_indices = @transform_6, window_bounds = array<i64: 1, 64>}, {pipeline_mode = #tpu.pipeline_mode<synchronous>, transform_indices = @transform_7, window_bounds = array<i64: 2, 64, 192>}, {pipeline_mode = #tpu.pipeline_mode<synchronous>, transform_indices = @transform_8, window_bounds = array<i64: 2, 1, 192>}, {pipeline_mode = #tpu.pipeline_mode<synchronous>, transform_indices = @transform_9, window_bounds = array<i64: 2, 64, 64>}, {pipeline_mode = #tpu.pipeline_mode<synchronous>, transform_indices = @transform_10, window_bounds = array<i64: 2, 1, 64>}, {pipeline_mode = #tpu.pipeline_mode<synchronous>, transform_indices = @transform_11, window_bounds = array<i64: 2, 1, 64>}, {pipeline_mode = #tpu.pipeline_mode<synchronous>, transform_indices = @transform_12, window_bounds = array<i64: 2, 1, 64>}, {pipeline_mode = #tpu.pipeline_mode<synchronous>, transform_indices = @transform_13, window_bounds = array<i64: 2, 64, 128>}, {pipeline_mode = #tpu.pipeline_mode<synchronous>, transform_indices = @transform_14, window_bounds = array<i64: 2, 1, 128>}, {pipeline_mode = #tpu.pipeline_mode<synchronous>, transform_indices = @transform_15, window_bounds = array<i64: 2, 128, 64>}, {pipeline_mode = #tpu.pipeline_mode<synchronous>, transform_indices = @transform_16, window_bounds = array<i64: 2, 1, 64>}, {pipeline_mode = #tpu.pipeline_mode<synchronous>, transform_indices = @transform_17, window_bounds = array<i64: 2, 1, 64>}, {pipeline_mode = #tpu.pipeline_mode<synchronous>, transform_indices = @transform_18, window_bounds = array<i64: 2, 1, 64>}, {pipeline_mode = #tpu.pipeline_mode<synchronous>, transform_indices = @transform_19, window_bounds = array<i64: 64, 64>}, {pipeline_mode = #tpu.pipeline_mode<synchronous>, transform_indices = @transform_20, window_bounds = array<i64: 1, 64>}, {pipeline_mode = #tpu.pipeline_mode<synchronous>, transform_indices = @transform_21, window_bounds = array<i64: 64, 2>}, {pipeline_mode = #tpu.pipeline_mode<synchronous>, transform_indices = @transform_22, window_bounds = array<i64: 1, 2>}, {pipeline_mode = #tpu.pipeline_mode<synchronous>, transform_indices = @transform_23, window_bounds = array<i64: 1, 1>}, {pipeline_mode = #tpu.pipeline_mode<synchronous>, transform_indices = @transform_24, window_bounds = array<i64: 2, 2>}]} {
    %c0 = arith.constant 0 : index
    %c0_0 = arith.constant 0 : index
    %0 = vector.load %arg1[%c0, %c0_0] : memref<16x1xi32, #tpu.memory_space<vmem>>, vector<16x1xi32>
    %1 = tpu.iota {dimensions = array<i32: 1>} : vector<16x100xi32>
    %2 = vector.broadcast %0 : vector<16x1xi32> to vector<16x100xi32>
    %3 = arith.cmpi eq, %1, %2 : vector<16x100xi32>
    %4 = arith.extui %3 : vector<16x100xi1> to vector<16x100xi32>
    %5 = arith.sitofp %4 : vector<16x100xi32> to vector<16x100xf32>
    %c0_1 = arith.constant 0 : index
    %c0_2 = arith.constant 0 : index
    %6 = vector.load %arg3[%c0_1, %c0_2] : memref<100x64xf32, #tpu.memory_space<vmem>>, vector<100x64xf32>
    %cst = arith.constant dense<0.000000e+00> : vector<16x64xf32>
    %7 = tpu.matmul %5, %6, %cst {dimension_numbers = #tpu.dot_dimension_numbers<[1], [0], [0], [1], [0, 0, 1, 1], [], []>} : vector<16x100xf32>, vector<100x64xf32>, vector<16x64xf32> -> vector<16x64xf32>
    %c0_3 = arith.constant 0 : index
    %c0_4 = arith.constant 0 : index
    %8 = vector.load %arg4[%c0_3, %c0_4] : memref<16x64xf32, #tpu.memory_space<vmem>>, vector<16x64xf32>
    %9 = vector.extract_strided_slice %8 {offsets = [0, 0], sizes = [8, 64], strides = [1, 1]} : vector<16x64xf32> to vector<8x64xf32>
    %c0_5 = arith.constant 0 : index
    %c0_6 = arith.constant 0 : index
    %10 = vector.load %arg5[%c0_5, %c0_6] : memref<2x64xf32, #tpu.memory_space<vmem>>, vector<2x64xf32>
    %11 = vector.extract_strided_slice %10 {offsets = [0, 0], sizes = [1, 64], strides = [1, 1]} : vector<2x64xf32> to vector<1x64xf32>
    %12 = vector.broadcast %11 : vector<1x64xf32> to vector<8x64xf32>
    %13 = arith.addf %9, %12 : vector<8x64xf32>
    %14 = tpu.concatenate %13, %13 in 0 : vector<8x64xf32>, vector<8x64xf32> -> vector<16x64xf32>
    %15 = arith.addf %7, %14 : vector<16x64xf32>
    %c0_7 = arith.constant 0 : index
    %c0_8 = arith.constant 0 : index
    %16 = vector.load %arg6[%c0_7, %c0_8] : memref<1x64xf32, #tpu.memory_space<vmem>>, vector<1x64xf32>
    %c0_9 = arith.constant 0 : index
    %c0_10 = arith.constant 0 : index
    %17 = vector.load %arg7[%c0_9, %c0_10] : memref<1x64xf32, #tpu.memory_space<vmem>>, vector<1x64xf32>
    %cst_11 = arith.constant dense<0.000000e+00> : vector<16xf32>
    %18 = vector.multi_reduction <add>, %15, %cst_11 [1] : vector<16x64xf32> to vector<16xf32>
    %19 = vector.shape_cast %18 : vector<16xf32> to vector<16x1xf32>
    %cst_12 = arith.constant 6.400000e+01 : f32
    %20 = vector.broadcast %cst_12 : f32 to vector<16x1xf32>
    %21 = arith.divf %19, %20 : vector<16x1xf32>
    %22 = vector.broadcast %21 : vector<16x1xf32> to vector<16x64xf32>
    %23 = arith.subf %15, %22 : vector<16x64xf32>
    %24 = arith.mulf %23, %23 : vector<16x64xf32>
    %cst_13 = arith.constant dense<0.000000e+00> : vector<16xf32>
    %25 = vector.multi_reduction <add>, %24, %cst_13 [1] : vector<16x64xf32> to vector<16xf32>
    %26 = vector.shape_cast %25 : vector<16xf32> to vector<16x1xf32>
    %cst_14 = arith.constant 6.400000e+01 : f32
    %27 = vector.broadcast %cst_14 : f32 to vector<16x1xf32>
    %28 = arith.divf %26, %27 : vector<16x1xf32>
    %cst_15 = arith.constant 9.99999996E-13 : f32
    %29 = vector.broadcast %cst_15 : f32 to vector<16x1xf32>
    %30 = arith.addf %28, %29 : vector<16x1xf32>
    %31 = math.rsqrt %30 : vector<16x1xf32>
    %32 = vector.broadcast %21 : vector<16x1xf32> to vector<16x64xf32>
    %33 = arith.subf %15, %32 : vector<16x64xf32>
    %34 = vector.broadcast %31 : vector<16x1xf32> to vector<16x64xf32>
    %35 = arith.mulf %33, %34 : vector<16x64xf32>
    %36 = vector.broadcast %16 : vector<1x64xf32> to vector<16x64xf32>
    %37 = arith.mulf %35, %36 : vector<16x64xf32>
    %38 = vector.broadcast %17 : vector<1x64xf32> to vector<16x64xf32>
    %39 = arith.addf %37, %38 : vector<16x64xf32>
    %c0_16 = arith.constant 0 : index
    %c0_17 = arith.constant 0 : index
    %c0_18 = arith.constant 0 : index
    %40 = vector.load %arg8[%c0_16, %c0_17, %c0_18] : memref<2x64x192xf32, #tpu.memory_space<vmem>>, vector<1x64x192xf32>
    %41 = vector.shape_cast %40 : vector<1x64x192xf32> to vector<64x192xf32>
    %cst_19 = arith.constant dense<0.000000e+00> : vector<16x192xf32>
    %42 = tpu.matmul %39, %41, %cst_19 {dimension_numbers = #tpu.dot_dimension_numbers<[1], [0], [0], [1], [0, 0, 1, 1], [], []>} : vector<16x64xf32>, vector<64x192xf32>, vector<16x192xf32> -> vector<16x192xf32>
    %c0_20 = arith.constant 0 : index
    %c0_21 = arith.constant 0 : index
    %c0_22 = arith.constant 0 : index
    %43 = vector.load %arg9[%c0_20, %c0_21, %c0_22] : memref<2x1x192xf32, #tpu.memory_space<vmem>>, vector<1x1x192xf32>
    %44 = vector.shape_cast %43 : vector<1x1x192xf32> to vector<1x192xf32>
    %45 = vector.broadcast %44 : vector<1x192xf32> to vector<16x192xf32>
    %46 = arith.addf %42, %45 : vector<16x192xf32>
    %47 = vector.extract_strided_slice %46 {offsets = [0, 0], sizes = [8, 16], strides = [1, 1]} : vector<16x192xf32> to vector<8x16xf32>
    %48 = vector.extract_strided_slice %46 {offsets = [0, 64], sizes = [8, 16], strides = [1, 1]} : vector<16x192xf32> to vector<8x16xf32>
    %49 = vector.extract_strided_slice %46 {offsets = [0, 128], sizes = [8, 16], strides = [1, 1]} : vector<16x192xf32> to vector<8x16xf32>
    %cst_23 = arith.constant dense<0.000000e+00> : vector<8x8xf32>
    %50 = tpu.matmul %47, %48, %cst_23 {dimension_numbers = #tpu.dot_dimension_numbers<[1], [1], [0], [0], [0, 0, 1, 0], [], []>} : vector<8x16xf32>, vector<8x16xf32>, vector<8x8xf32> -> vector<8x8xf32>
    %cst_24 = arith.constant 2.500000e-01 : f32
    %51 = vector.broadcast %cst_24 : f32 to vector<8x8xf32>
    %52 = arith.mulf %50, %51 : vector<8x8xf32>
    %cst_25 = arith.constant dense<0xFF800000> : vector<8xf32>
    %53 = vector.multi_reduction <maximumf>, %52, %cst_25 [1] : vector<8x8xf32> to vector<8xf32>
    %54 = vector.shape_cast %53 : vector<8xf32> to vector<8x1xf32>
    %55 = vector.broadcast %54 : vector<8x1xf32> to vector<8x8xf32>
    %56 = arith.subf %52, %55 : vector<8x8xf32>
    %57 = math.exp %56 : vector<8x8xf32>
    %cst_26 = arith.constant dense<0.000000e+00> : vector<8xf32>
    %58 = vector.multi_reduction <add>, %57, %cst_26 [1] : vector<8x8xf32> to vector<8xf32>
    %59 = vector.shape_cast %58 : vector<8xf32> to vector<8x1xf32>
    %60 = tpu.reciprocal %59 {approx = true} : vector<8x1xf32> -> vector<8x1xf32>
    %61 = vector.broadcast %60 : vector<8x1xf32> to vector<8x8xf32>
    %62 = arith.mulf %57, %61 : vector<8x8xf32>
    %cst_27 = arith.constant dense<0.000000e+00> : vector<8x16xf32>
    %63 = tpu.matmul %62, %49, %cst_27 {dimension_numbers = #tpu.dot_dimension_numbers<[1], [0], [0], [1], [0, 0, 1, 1], [], []>} : vector<8x8xf32>, vector<8x16xf32>, vector<8x16xf32> -> vector<8x16xf32>
    %64 = vector.extract_strided_slice %46 {offsets = [0, 16], sizes = [8, 16], strides = [1, 1]} : vector<16x192xf32> to vector<8x16xf32>
    %65 = vector.extract_strided_slice %46 {offsets = [0, 80], sizes = [8, 16], strides = [1, 1]} : vector<16x192xf32> to vector<8x16xf32>
    %66 = vector.extract_strided_slice %46 {offsets = [0, 144], sizes = [8, 16], strides = [1, 1]} : vector<16x192xf32> to vector<8x16xf32>
    %cst_28 = arith.constant dense<0.000000e+00> : vector<8x8xf32>
    %67 = tpu.matmul %64, %65, %cst_28 {dimension_numbers = #tpu.dot_dimension_numbers<[1], [1], [0], [0], [0, 0, 1, 0], [], []>} : vector<8x16xf32>, vector<8x16xf32>, vector<8x8xf32> -> vector<8x8xf32>
    %cst_29 = arith.constant 2.500000e-01 : f32
    %68 = vector.broadcast %cst_29 : f32 to vector<8x8xf32>
    %69 = arith.mulf %67, %68 : vector<8x8xf32>
    %cst_30 = arith.constant dense<0xFF800000> : vector<8xf32>
    %70 = vector.multi_reduction <maximumf>, %69, %cst_30 [1] : vector<8x8xf32> to vector<8xf32>
    %71 = vector.shape_cast %70 : vector<8xf32> to vector<8x1xf32>
    %72 = vector.broadcast %71 : vector<8x1xf32> to vector<8x8xf32>
    %73 = arith.subf %69, %72 : vector<8x8xf32>
    %74 = math.exp %73 : vector<8x8xf32>
    %cst_31 = arith.constant dense<0.000000e+00> : vector<8xf32>
    %75 = vector.multi_reduction <add>, %74, %cst_31 [1] : vector<8x8xf32> to vector<8xf32>
    %76 = vector.shape_cast %75 : vector<8xf32> to vector<8x1xf32>
    %77 = tpu.reciprocal %76 {approx = true} : vector<8x1xf32> -> vector<8x1xf32>
    %78 = vector.broadcast %77 : vector<8x1xf32> to vector<8x8xf32>
    %79 = arith.mulf %74, %78 : vector<8x8xf32>
    %cst_32 = arith.constant dense<0.000000e+00> : vector<8x16xf32>
    %80 = tpu.matmul %79, %66, %cst_32 {dimension_numbers = #tpu.dot_dimension_numbers<[1], [0], [0], [1], [0, 0, 1, 1], [], []>} : vector<8x8xf32>, vector<8x16xf32>, vector<8x16xf32> -> vector<8x16xf32>
    %81 = vector.extract_strided_slice %46 {offsets = [0, 32], sizes = [8, 16], strides = [1, 1]} : vector<16x192xf32> to vector<8x16xf32>
    %82 = vector.extract_strided_slice %46 {offsets = [0, 96], sizes = [8, 16], strides = [1, 1]} : vector<16x192xf32> to vector<8x16xf32>
    %83 = vector.extract_strided_slice %46 {offsets = [0, 160], sizes = [8, 16], strides = [1, 1]} : vector<16x192xf32> to vector<8x16xf32>
    %cst_33 = arith.constant dense<0.000000e+00> : vector<8x8xf32>
    %84 = tpu.matmul %81, %82, %cst_33 {dimension_numbers = #tpu.dot_dimension_numbers<[1], [1], [0], [0], [0, 0, 1, 0], [], []>} : vector<8x16xf32>, vector<8x16xf32>, vector<8x8xf32> -> vector<8x8xf32>
    %cst_34 = arith.constant 2.500000e-01 : f32
    %85 = vector.broadcast %cst_34 : f32 to vector<8x8xf32>
    %86 = arith.mulf %84, %85 : vector<8x8xf32>
    %cst_35 = arith.constant dense<0xFF800000> : vector<8xf32>
    %87 = vector.multi_reduction <maximumf>, %86, %cst_35 [1] : vector<8x8xf32> to vector<8xf32>
    %88 = vector.shape_cast %87 : vector<8xf32> to vector<8x1xf32>
    %89 = vector.broadcast %88 : vector<8x1xf32> to vector<8x8xf32>
    %90 = arith.subf %86, %89 : vector<8x8xf32>
    %91 = math.exp %90 : vector<8x8xf32>
    %cst_36 = arith.constant dense<0.000000e+00> : vector<8xf32>
    %92 = vector.multi_reduction <add>, %91, %cst_36 [1] : vector<8x8xf32> to vector<8xf32>
    %93 = vector.shape_cast %92 : vector<8xf32> to vector<8x1xf32>
    %94 = tpu.reciprocal %93 {approx = true} : vector<8x1xf32> -> vector<8x1xf32>
    %95 = vector.broadcast %94 : vector<8x1xf32> to vector<8x8xf32>
    %96 = arith.mulf %91, %95 : vector<8x8xf32>
    %cst_37 = arith.constant dense<0.000000e+00> : vector<8x16xf32>
    %97 = tpu.matmul %96, %83, %cst_37 {dimension_numbers = #tpu.dot_dimension_numbers<[1], [0], [0], [1], [0, 0, 1, 1], [], []>} : vector<8x8xf32>, vector<8x16xf32>, vector<8x16xf32> -> vector<8x16xf32>
    %98 = vector.extract_strided_slice %46 {offsets = [0, 48], sizes = [8, 16], strides = [1, 1]} : vector<16x192xf32> to vector<8x16xf32>
    %99 = vector.extract_strided_slice %46 {offsets = [0, 112], sizes = [8, 16], strides = [1, 1]} : vector<16x192xf32> to vector<8x16xf32>
    %100 = vector.extract_strided_slice %46 {offsets = [0, 176], sizes = [8, 16], strides = [1, 1]} : vector<16x192xf32> to vector<8x16xf32>
    %cst_38 = arith.constant dense<0.000000e+00> : vector<8x8xf32>
    %101 = tpu.matmul %98, %99, %cst_38 {dimension_numbers = #tpu.dot_dimension_numbers<[1], [1], [0], [0], [0, 0, 1, 0], [], []>} : vector<8x16xf32>, vector<8x16xf32>, vector<8x8xf32> -> vector<8x8xf32>
    %cst_39 = arith.constant 2.500000e-01 : f32
    %102 = vector.broadcast %cst_39 : f32 to vector<8x8xf32>
    %103 = arith.mulf %101, %102 : vector<8x8xf32>
    %cst_40 = arith.constant dense<0xFF800000> : vector<8xf32>
    %104 = vector.multi_reduction <maximumf>, %103, %cst_40 [1] : vector<8x8xf32> to vector<8xf32>
    %105 = vector.shape_cast %104 : vector<8xf32> to vector<8x1xf32>
    %106 = vector.broadcast %105 : vector<8x1xf32> to vector<8x8xf32>
    %107 = arith.subf %103, %106 : vector<8x8xf32>
    %108 = math.exp %107 : vector<8x8xf32>
    %cst_41 = arith.constant dense<0.000000e+00> : vector<8xf32>
    %109 = vector.multi_reduction <add>, %108, %cst_41 [1] : vector<8x8xf32> to vector<8xf32>
    %110 = vector.shape_cast %109 : vector<8xf32> to vector<8x1xf32>
    %111 = tpu.reciprocal %110 {approx = true} : vector<8x1xf32> -> vector<8x1xf32>
    %112 = vector.broadcast %111 : vector<8x1xf32> to vector<8x8xf32>
    %113 = arith.mulf %108, %112 : vector<8x8xf32>
    %cst_42 = arith.constant dense<0.000000e+00> : vector<8x16xf32>
    %114 = tpu.matmul %113, %100, %cst_42 {dimension_numbers = #tpu.dot_dimension_numbers<[1], [0], [0], [1], [0, 0, 1, 1], [], []>} : vector<8x8xf32>, vector<8x16xf32>, vector<8x16xf32> -> vector<8x16xf32>
    %115 = tpu.concatenate %63, %80, %97, %114 in 1 : vector<8x16xf32>, vector<8x16xf32>, vector<8x16xf32>, vector<8x16xf32> -> vector<8x64xf32>
    %116 = vector.extract_strided_slice %46 {offsets = [8, 0], sizes = [8, 16], strides = [1, 1]} : vector<16x192xf32> to vector<8x16xf32>
    %117 = vector.extract_strided_slice %46 {offsets = [8, 64], sizes = [8, 16], strides = [1, 1]} : vector<16x192xf32> to vector<8x16xf32>
    %118 = vector.extract_strided_slice %46 {offsets = [8, 128], sizes = [8, 16], strides = [1, 1]} : vector<16x192xf32> to vector<8x16xf32>
    %cst_43 = arith.constant dense<0.000000e+00> : vector<8x8xf32>
    %119 = tpu.matmul %116, %117, %cst_43 {dimension_numbers = #tpu.dot_dimension_numbers<[1], [1], [0], [0], [0, 0, 1, 0], [], []>} : vector<8x16xf32>, vector<8x16xf32>, vector<8x8xf32> -> vector<8x8xf32>
    %cst_44 = arith.constant 2.500000e-01 : f32
    %120 = vector.broadcast %cst_44 : f32 to vector<8x8xf32>
    %121 = arith.mulf %119, %120 : vector<8x8xf32>
    %cst_45 = arith.constant dense<0xFF800000> : vector<8xf32>
    %122 = vector.multi_reduction <maximumf>, %121, %cst_45 [1] : vector<8x8xf32> to vector<8xf32>
    %123 = vector.shape_cast %122 : vector<8xf32> to vector<8x1xf32>
    %124 = vector.broadcast %123 : vector<8x1xf32> to vector<8x8xf32>
    %125 = arith.subf %121, %124 : vector<8x8xf32>
    %126 = math.exp %125 : vector<8x8xf32>
    %cst_46 = arith.constant dense<0.000000e+00> : vector<8xf32>
    %127 = vector.multi_reduction <add>, %126, %cst_46 [1] : vector<8x8xf32> to vector<8xf32>
    %128 = vector.shape_cast %127 : vector<8xf32> to vector<8x1xf32>
    %129 = tpu.reciprocal %128 {approx = true} : vector<8x1xf32> -> vector<8x1xf32>
    %130 = vector.broadcast %129 : vector<8x1xf32> to vector<8x8xf32>
    %131 = arith.mulf %126, %130 : vector<8x8xf32>
    %cst_47 = arith.constant dense<0.000000e+00> : vector<8x16xf32>
    %132 = tpu.matmul %131, %118, %cst_47 {dimension_numbers = #tpu.dot_dimension_numbers<[1], [0], [0], [1], [0, 0, 1, 1], [], []>} : vector<8x8xf32>, vector<8x16xf32>, vector<8x16xf32> -> vector<8x16xf32>
    %133 = vector.extract_strided_slice %46 {offsets = [8, 16], sizes = [8, 16], strides = [1, 1]} : vector<16x192xf32> to vector<8x16xf32>
    %134 = vector.extract_strided_slice %46 {offsets = [8, 80], sizes = [8, 16], strides = [1, 1]} : vector<16x192xf32> to vector<8x16xf32>
    %135 = vector.extract_strided_slice %46 {offsets = [8, 144], sizes = [8, 16], strides = [1, 1]} : vector<16x192xf32> to vector<8x16xf32>
    %cst_48 = arith.constant dense<0.000000e+00> : vector<8x8xf32>
    %136 = tpu.matmul %133, %134, %cst_48 {dimension_numbers = #tpu.dot_dimension_numbers<[1], [1], [0], [0], [0, 0, 1, 0], [], []>} : vector<8x16xf32>, vector<8x16xf32>, vector<8x8xf32> -> vector<8x8xf32>
    %cst_49 = arith.constant 2.500000e-01 : f32
    %137 = vector.broadcast %cst_49 : f32 to vector<8x8xf32>
    %138 = arith.mulf %136, %137 : vector<8x8xf32>
    %cst_50 = arith.constant dense<0xFF800000> : vector<8xf32>
    %139 = vector.multi_reduction <maximumf>, %138, %cst_50 [1] : vector<8x8xf32> to vector<8xf32>
    %140 = vector.shape_cast %139 : vector<8xf32> to vector<8x1xf32>
    %141 = vector.broadcast %140 : vector<8x1xf32> to vector<8x8xf32>
    %142 = arith.subf %138, %141 : vector<8x8xf32>
    %143 = math.exp %142 : vector<8x8xf32>
    %cst_51 = arith.constant dense<0.000000e+00> : vector<8xf32>
    %144 = vector.multi_reduction <add>, %143, %cst_51 [1] : vector<8x8xf32> to vector<8xf32>
    %145 = vector.shape_cast %144 : vector<8xf32> to vector<8x1xf32>
    %146 = tpu.reciprocal %145 {approx = true} : vector<8x1xf32> -> vector<8x1xf32>
    %147 = vector.broadcast %146 : vector<8x1xf32> to vector<8x8xf32>
    %148 = arith.mulf %143, %147 : vector<8x8xf32>
    %cst_52 = arith.constant dense<0.000000e+00> : vector<8x16xf32>
    %149 = tpu.matmul %148, %135, %cst_52 {dimension_numbers = #tpu.dot_dimension_numbers<[1], [0], [0], [1], [0, 0, 1, 1], [], []>} : vector<8x8xf32>, vector<8x16xf32>, vector<8x16xf32> -> vector<8x16xf32>
    %150 = vector.extract_strided_slice %46 {offsets = [8, 32], sizes = [8, 16], strides = [1, 1]} : vector<16x192xf32> to vector<8x16xf32>
    %151 = vector.extract_strided_slice %46 {offsets = [8, 96], sizes = [8, 16], strides = [1, 1]} : vector<16x192xf32> to vector<8x16xf32>
    %152 = vector.extract_strided_slice %46 {offsets = [8, 160], sizes = [8, 16], strides = [1, 1]} : vector<16x192xf32> to vector<8x16xf32>
    %cst_53 = arith.constant dense<0.000000e+00> : vector<8x8xf32>
    %153 = tpu.matmul %150, %151, %cst_53 {dimension_numbers = #tpu.dot_dimension_numbers<[1], [1], [0], [0], [0, 0, 1, 0], [], []>} : vector<8x16xf32>, vector<8x16xf32>, vector<8x8xf32> -> vector<8x8xf32>
    %cst_54 = arith.constant 2.500000e-01 : f32
    %154 = vector.broadcast %cst_54 : f32 to vector<8x8xf32>
    %155 = arith.mulf %153, %154 : vector<8x8xf32>
    %cst_55 = arith.constant dense<0xFF800000> : vector<8xf32>
    %156 = vector.multi_reduction <maximumf>, %155, %cst_55 [1] : vector<8x8xf32> to vector<8xf32>
    %157 = vector.shape_cast %156 : vector<8xf32> to vector<8x1xf32>
    %158 = vector.broadcast %157 : vector<8x1xf32> to vector<8x8xf32>
    %159 = arith.subf %155, %158 : vector<8x8xf32>
    %160 = math.exp %159 : vector<8x8xf32>
    %cst_56 = arith.constant dense<0.000000e+00> : vector<8xf32>
    %161 = vector.multi_reduction <add>, %160, %cst_56 [1] : vector<8x8xf32> to vector<8xf32>
    %162 = vector.shape_cast %161 : vector<8xf32> to vector<8x1xf32>
    %163 = tpu.reciprocal %162 {approx = true} : vector<8x1xf32> -> vector<8x1xf32>
    %164 = vector.broadcast %163 : vector<8x1xf32> to vector<8x8xf32>
    %165 = arith.mulf %160, %164 : vector<8x8xf32>
    %cst_57 = arith.constant dense<0.000000e+00> : vector<8x16xf32>
    %166 = tpu.matmul %165, %152, %cst_57 {dimension_numbers = #tpu.dot_dimension_numbers<[1], [0], [0], [1], [0, 0, 1, 1], [], []>} : vector<8x8xf32>, vector<8x16xf32>, vector<8x16xf32> -> vector<8x16xf32>
    %167 = vector.extract_strided_slice %46 {offsets = [8, 48], sizes = [8, 16], strides = [1, 1]} : vector<16x192xf32> to vector<8x16xf32>
    %168 = vector.extract_strided_slice %46 {offsets = [8, 112], sizes = [8, 16], strides = [1, 1]} : vector<16x192xf32> to vector<8x16xf32>
    %169 = vector.extract_strided_slice %46 {offsets = [8, 176], sizes = [8, 16], strides = [1, 1]} : vector<16x192xf32> to vector<8x16xf32>
    %cst_58 = arith.constant dense<0.000000e+00> : vector<8x8xf32>
    %170 = tpu.matmul %167, %168, %cst_58 {dimension_numbers = #tpu.dot_dimension_numbers<[1], [1], [0], [0], [0, 0, 1, 0], [], []>} : vector<8x16xf32>, vector<8x16xf32>, vector<8x8xf32> -> vector<8x8xf32>
    %cst_59 = arith.constant 2.500000e-01 : f32
    %171 = vector.broadcast %cst_59 : f32 to vector<8x8xf32>
    %172 = arith.mulf %170, %171 : vector<8x8xf32>
    %cst_60 = arith.constant dense<0xFF800000> : vector<8xf32>
    %173 = vector.multi_reduction <maximumf>, %172, %cst_60 [1] : vector<8x8xf32> to vector<8xf32>
    %174 = vector.shape_cast %173 : vector<8xf32> to vector<8x1xf32>
    %175 = vector.broadcast %174 : vector<8x1xf32> to vector<8x8xf32>
    %176 = arith.subf %172, %175 : vector<8x8xf32>
    %177 = math.exp %176 : vector<8x8xf32>
    %cst_61 = arith.constant dense<0.000000e+00> : vector<8xf32>
    %178 = vector.multi_reduction <add>, %177, %cst_61 [1] : vector<8x8xf32> to vector<8xf32>
    %179 = vector.shape_cast %178 : vector<8xf32> to vector<8x1xf32>
    %180 = tpu.reciprocal %179 {approx = true} : vector<8x1xf32> -> vector<8x1xf32>
    %181 = vector.broadcast %180 : vector<8x1xf32> to vector<8x8xf32>
    %182 = arith.mulf %177, %181 : vector<8x8xf32>
    %cst_62 = arith.constant dense<0.000000e+00> : vector<8x16xf32>
    %183 = tpu.matmul %182, %169, %cst_62 {dimension_numbers = #tpu.dot_dimension_numbers<[1], [0], [0], [1], [0, 0, 1, 1], [], []>} : vector<8x8xf32>, vector<8x16xf32>, vector<8x16xf32> -> vector<8x16xf32>
    %184 = tpu.concatenate %132, %149, %166, %183 in 1 : vector<8x16xf32>, vector<8x16xf32>, vector<8x16xf32>, vector<8x16xf32> -> vector<8x64xf32>
    %185 = tpu.concatenate %115, %184 in 0 : vector<8x64xf32>, vector<8x64xf32> -> vector<16x64xf32>
    %c0_63 = arith.constant 0 : index
    %c0_64 = arith.constant 0 : index
    %c0_65 = arith.constant 0 : index
    %186 = vector.load %arg10[%c0_63, %c0_64, %c0_65] : memref<2x64x64xf32, #tpu.memory_space<vmem>>, vector<1x64x64xf32>
    %187 = vector.shape_cast %186 : vector<1x64x64xf32> to vector<64x64xf32>
    %cst_66 = arith.constant dense<0.000000e+00> : vector<16x64xf32>
    %188 = tpu.matmul %185, %187, %cst_66 {dimension_numbers = #tpu.dot_dimension_numbers<[1], [0], [0], [1], [0, 0, 1, 1], [], []>} : vector<16x64xf32>, vector<64x64xf32>, vector<16x64xf32> -> vector<16x64xf32>
    %c0_67 = arith.constant 0 : index
    %c0_68 = arith.constant 0 : index
    %c0_69 = arith.constant 0 : index
    %189 = vector.load %arg11[%c0_67, %c0_68, %c0_69] : memref<2x1x64xf32, #tpu.memory_space<vmem>>, vector<1x1x64xf32>
    %190 = vector.shape_cast %189 : vector<1x1x64xf32> to vector<1x64xf32>
    %191 = vector.broadcast %190 : vector<1x64xf32> to vector<16x64xf32>
    %192 = arith.addf %188, %191 : vector<16x64xf32>
    %193 = arith.addf %192, %39 : vector<16x64xf32>
    %c0_70 = arith.constant 0 : index
    %c0_71 = arith.constant 0 : index
    %c0_72 = arith.constant 0 : index
    %194 = vector.load %arg12[%c0_70, %c0_71, %c0_72] : memref<2x1x64xf32, #tpu.memory_space<vmem>>, vector<1x1x64xf32>
    %195 = vector.shape_cast %194 : vector<1x1x64xf32> to vector<1x64xf32>
    %c0_73 = arith.constant 0 : index
    %c0_74 = arith.constant 0 : index
    %c0_75 = arith.constant 0 : index
    %196 = vector.load %arg13[%c0_73, %c0_74, %c0_75] : memref<2x1x64xf32, #tpu.memory_space<vmem>>, vector<1x1x64xf32>
    %197 = vector.shape_cast %196 : vector<1x1x64xf32> to vector<1x64xf32>
    %cst_76 = arith.constant dense<0.000000e+00> : vector<16xf32>
    %198 = vector.multi_reduction <add>, %193, %cst_76 [1] : vector<16x64xf32> to vector<16xf32>
    %199 = vector.shape_cast %198 : vector<16xf32> to vector<16x1xf32>
    %cst_77 = arith.constant 6.400000e+01 : f32
    %200 = vector.broadcast %cst_77 : f32 to vector<16x1xf32>
    %201 = arith.divf %199, %200 : vector<16x1xf32>
    %202 = vector.broadcast %201 : vector<16x1xf32> to vector<16x64xf32>
    %203 = arith.subf %193, %202 : vector<16x64xf32>
    %204 = arith.mulf %203, %203 : vector<16x64xf32>
    %cst_78 = arith.constant dense<0.000000e+00> : vector<16xf32>
    %205 = vector.multi_reduction <add>, %204, %cst_78 [1] : vector<16x64xf32> to vector<16xf32>
    %206 = vector.shape_cast %205 : vector<16xf32> to vector<16x1xf32>
    %cst_79 = arith.constant 6.400000e+01 : f32
    %207 = vector.broadcast %cst_79 : f32 to vector<16x1xf32>
    %208 = arith.divf %206, %207 : vector<16x1xf32>
    %cst_80 = arith.constant 9.99999996E-13 : f32
    %209 = vector.broadcast %cst_80 : f32 to vector<16x1xf32>
    %210 = arith.addf %208, %209 : vector<16x1xf32>
    %211 = math.rsqrt %210 : vector<16x1xf32>
    %212 = vector.broadcast %201 : vector<16x1xf32> to vector<16x64xf32>
    %213 = arith.subf %193, %212 : vector<16x64xf32>
    %214 = vector.broadcast %211 : vector<16x1xf32> to vector<16x64xf32>
    %215 = arith.mulf %213, %214 : vector<16x64xf32>
    %216 = vector.broadcast %195 : vector<1x64xf32> to vector<16x64xf32>
    %217 = arith.mulf %215, %216 : vector<16x64xf32>
    %218 = vector.broadcast %197 : vector<1x64xf32> to vector<16x64xf32>
    %219 = arith.addf %217, %218 : vector<16x64xf32>
    %c0_81 = arith.constant 0 : index
    %c0_82 = arith.constant 0 : index
    %c0_83 = arith.constant 0 : index
    %220 = vector.load %arg14[%c0_81, %c0_82, %c0_83] : memref<2x64x128xf32, #tpu.memory_space<vmem>>, vector<1x64x128xf32>
    %221 = vector.shape_cast %220 : vector<1x64x128xf32> to vector<64x128xf32>
    %cst_84 = arith.constant dense<0.000000e+00> : vector<16x128xf32>
    %222 = tpu.matmul %219, %221, %cst_84 {dimension_numbers = #tpu.dot_dimension_numbers<[1], [0], [0], [1], [0, 0, 1, 1], [], []>} : vector<16x64xf32>, vector<64x128xf32>, vector<16x128xf32> -> vector<16x128xf32>
    %c0_85 = arith.constant 0 : index
    %c0_86 = arith.constant 0 : index
    %c0_87 = arith.constant 0 : index
    %223 = vector.load %arg15[%c0_85, %c0_86, %c0_87] : memref<2x1x128xf32, #tpu.memory_space<vmem>>, vector<1x1x128xf32>
    %224 = vector.shape_cast %223 : vector<1x1x128xf32> to vector<1x128xf32>
    %225 = vector.broadcast %224 : vector<1x128xf32> to vector<16x128xf32>
    %226 = arith.addf %222, %225 : vector<16x128xf32>
    %227 = arith.mulf %226, %226 : vector<16x128xf32>
    %228 = arith.mulf %226, %227 : vector<16x128xf32>
    %cst_88 = arith.constant 4.471500e-02 : f32
    %229 = vector.broadcast %cst_88 : f32 to vector<16x128xf32>
    %230 = arith.mulf %229, %228 : vector<16x128xf32>
    %231 = arith.addf %226, %230 : vector<16x128xf32>
    %cst_89 = arith.constant 0.797884583 : f32
    %232 = vector.broadcast %cst_89 : f32 to vector<16x128xf32>
    %233 = arith.mulf %232, %231 : vector<16x128xf32>
    %234 = math.tanh %233 : vector<16x128xf32>
    %cst_90 = arith.constant 1.000000e+00 : f32
    %235 = vector.broadcast %cst_90 : f32 to vector<16x128xf32>
    %236 = arith.addf %235, %234 : vector<16x128xf32>
    %cst_91 = arith.constant 5.000000e-01 : f32
    %237 = vector.broadcast %cst_91 : f32 to vector<16x128xf32>
    %238 = arith.mulf %237, %236 : vector<16x128xf32>
    %239 = arith.mulf %226, %238 : vector<16x128xf32>
    %c0_92 = arith.constant 0 : index
    %c0_93 = arith.constant 0 : index
    %c0_94 = arith.constant 0 : index
    %240 = vector.load %arg16[%c0_92, %c0_93, %c0_94] : memref<2x128x64xf32, #tpu.memory_space<vmem>>, vector<1x128x64xf32>
    %241 = vector.shape_cast %240 : vector<1x128x64xf32> to vector<128x64xf32>
    %cst_95 = arith.constant dense<0.000000e+00> : vector<16x64xf32>
    %242 = tpu.matmul %239, %241, %cst_95 {dimension_numbers = #tpu.dot_dimension_numbers<[1], [0], [0], [1], [0, 0, 1, 1], [], []>} : vector<16x128xf32>, vector<128x64xf32>, vector<16x64xf32> -> vector<16x64xf32>
    %c0_96 = arith.constant 0 : index
    %c0_97 = arith.constant 0 : index
    %c0_98 = arith.constant 0 : index
    %243 = vector.load %arg17[%c0_96, %c0_97, %c0_98] : memref<2x1x64xf32, #tpu.memory_space<vmem>>, vector<1x1x64xf32>
    %244 = vector.shape_cast %243 : vector<1x1x64xf32> to vector<1x64xf32>
    %245 = vector.broadcast %244 : vector<1x64xf32> to vector<16x64xf32>
    %246 = arith.addf %242, %245 : vector<16x64xf32>
    %247 = arith.addf %246, %219 : vector<16x64xf32>
    %c0_99 = arith.constant 0 : index
    %c0_100 = arith.constant 0 : index
    %c0_101 = arith.constant 0 : index
    %248 = vector.load %arg18[%c0_99, %c0_100, %c0_101] : memref<2x1x64xf32, #tpu.memory_space<vmem>>, vector<1x1x64xf32>
    %249 = vector.shape_cast %248 : vector<1x1x64xf32> to vector<1x64xf32>
    %c0_102 = arith.constant 0 : index
    %c0_103 = arith.constant 0 : index
    %c0_104 = arith.constant 0 : index
    %250 = vector.load %arg19[%c0_102, %c0_103, %c0_104] : memref<2x1x64xf32, #tpu.memory_space<vmem>>, vector<1x1x64xf32>
    %251 = vector.shape_cast %250 : vector<1x1x64xf32> to vector<1x64xf32>
    %cst_105 = arith.constant dense<0.000000e+00> : vector<16xf32>
    %252 = vector.multi_reduction <add>, %247, %cst_105 [1] : vector<16x64xf32> to vector<16xf32>
    %253 = vector.shape_cast %252 : vector<16xf32> to vector<16x1xf32>
    %cst_106 = arith.constant 6.400000e+01 : f32
    %254 = vector.broadcast %cst_106 : f32 to vector<16x1xf32>
    %255 = arith.divf %253, %254 : vector<16x1xf32>
    %256 = vector.broadcast %255 : vector<16x1xf32> to vector<16x64xf32>
    %257 = arith.subf %247, %256 : vector<16x64xf32>
    %258 = arith.mulf %257, %257 : vector<16x64xf32>
    %cst_107 = arith.constant dense<0.000000e+00> : vector<16xf32>
    %259 = vector.multi_reduction <add>, %258, %cst_107 [1] : vector<16x64xf32> to vector<16xf32>
    %260 = vector.shape_cast %259 : vector<16xf32> to vector<16x1xf32>
    %cst_108 = arith.constant 6.400000e+01 : f32
    %261 = vector.broadcast %cst_108 : f32 to vector<16x1xf32>
    %262 = arith.divf %260, %261 : vector<16x1xf32>
    %cst_109 = arith.constant 9.99999996E-13 : f32
    %263 = vector.broadcast %cst_109 : f32 to vector<16x1xf32>
    %264 = arith.addf %262, %263 : vector<16x1xf32>
    %265 = math.rsqrt %264 : vector<16x1xf32>
    %266 = vector.broadcast %255 : vector<16x1xf32> to vector<16x64xf32>
    %267 = arith.subf %247, %266 : vector<16x64xf32>
    %268 = vector.broadcast %265 : vector<16x1xf32> to vector<16x64xf32>
    %269 = arith.mulf %267, %268 : vector<16x64xf32>
    %270 = vector.broadcast %249 : vector<1x64xf32> to vector<16x64xf32>
    %271 = arith.mulf %269, %270 : vector<16x64xf32>
    %272 = vector.broadcast %251 : vector<1x64xf32> to vector<16x64xf32>
    %273 = arith.addf %271, %272 : vector<16x64xf32>
    %c1 = arith.constant 1 : index
    %c0_110 = arith.constant 0 : index
    %c0_111 = arith.constant 0 : index
    %274 = vector.load %arg8[%c1, %c0_110, %c0_111] : memref<2x64x192xf32, #tpu.memory_space<vmem>>, vector<1x64x192xf32>
    %275 = vector.shape_cast %274 : vector<1x64x192xf32> to vector<64x192xf32>
    %cst_112 = arith.constant dense<0.000000e+00> : vector<16x192xf32>
    %276 = tpu.matmul %273, %275, %cst_112 {dimension_numbers = #tpu.dot_dimension_numbers<[1], [0], [0], [1], [0, 0, 1, 1], [], []>} : vector<16x64xf32>, vector<64x192xf32>, vector<16x192xf32> -> vector<16x192xf32>
    %c1_113 = arith.constant 1 : index
    %c0_114 = arith.constant 0 : index
    %c0_115 = arith.constant 0 : index
    %277 = vector.load %arg9[%c1_113, %c0_114, %c0_115] : memref<2x1x192xf32, #tpu.memory_space<vmem>>, vector<1x1x192xf32>
    %278 = vector.shape_cast %277 : vector<1x1x192xf32> to vector<1x192xf32>
    %279 = vector.broadcast %278 : vector<1x192xf32> to vector<16x192xf32>
    %280 = arith.addf %276, %279 : vector<16x192xf32>
    %281 = vector.extract_strided_slice %280 {offsets = [0, 0], sizes = [8, 16], strides = [1, 1]} : vector<16x192xf32> to vector<8x16xf32>
    %282 = vector.extract_strided_slice %280 {offsets = [0, 64], sizes = [8, 16], strides = [1, 1]} : vector<16x192xf32> to vector<8x16xf32>
    %283 = vector.extract_strided_slice %280 {offsets = [0, 128], sizes = [8, 16], strides = [1, 1]} : vector<16x192xf32> to vector<8x16xf32>
    %cst_116 = arith.constant dense<0.000000e+00> : vector<8x8xf32>
    %284 = tpu.matmul %281, %282, %cst_116 {dimension_numbers = #tpu.dot_dimension_numbers<[1], [1], [0], [0], [0, 0, 1, 0], [], []>} : vector<8x16xf32>, vector<8x16xf32>, vector<8x8xf32> -> vector<8x8xf32>
    %cst_117 = arith.constant 2.500000e-01 : f32
    %285 = vector.broadcast %cst_117 : f32 to vector<8x8xf32>
    %286 = arith.mulf %284, %285 : vector<8x8xf32>
    %cst_118 = arith.constant dense<0xFF800000> : vector<8xf32>
    %287 = vector.multi_reduction <maximumf>, %286, %cst_118 [1] : vector<8x8xf32> to vector<8xf32>
    %288 = vector.shape_cast %287 : vector<8xf32> to vector<8x1xf32>
    %289 = vector.broadcast %288 : vector<8x1xf32> to vector<8x8xf32>
    %290 = arith.subf %286, %289 : vector<8x8xf32>
    %291 = math.exp %290 : vector<8x8xf32>
    %cst_119 = arith.constant dense<0.000000e+00> : vector<8xf32>
    %292 = vector.multi_reduction <add>, %291, %cst_119 [1] : vector<8x8xf32> to vector<8xf32>
    %293 = vector.shape_cast %292 : vector<8xf32> to vector<8x1xf32>
    %294 = tpu.reciprocal %293 {approx = true} : vector<8x1xf32> -> vector<8x1xf32>
    %295 = vector.broadcast %294 : vector<8x1xf32> to vector<8x8xf32>
    %296 = arith.mulf %291, %295 : vector<8x8xf32>
    %cst_120 = arith.constant dense<0.000000e+00> : vector<8x16xf32>
    %297 = tpu.matmul %296, %283, %cst_120 {dimension_numbers = #tpu.dot_dimension_numbers<[1], [0], [0], [1], [0, 0, 1, 1], [], []>} : vector<8x8xf32>, vector<8x16xf32>, vector<8x16xf32> -> vector<8x16xf32>
    %298 = vector.extract_strided_slice %280 {offsets = [0, 16], sizes = [8, 16], strides = [1, 1]} : vector<16x192xf32> to vector<8x16xf32>
    %299 = vector.extract_strided_slice %280 {offsets = [0, 80], sizes = [8, 16], strides = [1, 1]} : vector<16x192xf32> to vector<8x16xf32>
    %300 = vector.extract_strided_slice %280 {offsets = [0, 144], sizes = [8, 16], strides = [1, 1]} : vector<16x192xf32> to vector<8x16xf32>
    %cst_121 = arith.constant dense<0.000000e+00> : vector<8x8xf32>
    %301 = tpu.matmul %298, %299, %cst_121 {dimension_numbers = #tpu.dot_dimension_numbers<[1], [1], [0], [0], [0, 0, 1, 0], [], []>} : vector<8x16xf32>, vector<8x16xf32>, vector<8x8xf32> -> vector<8x8xf32>
    %cst_122 = arith.constant 2.500000e-01 : f32
    %302 = vector.broadcast %cst_122 : f32 to vector<8x8xf32>
    %303 = arith.mulf %301, %302 : vector<8x8xf32>
    %cst_123 = arith.constant dense<0xFF800000> : vector<8xf32>
    %304 = vector.multi_reduction <maximumf>, %303, %cst_123 [1] : vector<8x8xf32> to vector<8xf32>
    %305 = vector.shape_cast %304 : vector<8xf32> to vector<8x1xf32>
    %306 = vector.broadcast %305 : vector<8x1xf32> to vector<8x8xf32>
    %307 = arith.subf %303, %306 : vector<8x8xf32>
    %308 = math.exp %307 : vector<8x8xf32>
    %cst_124 = arith.constant dense<0.000000e+00> : vector<8xf32>
    %309 = vector.multi_reduction <add>, %308, %cst_124 [1] : vector<8x8xf32> to vector<8xf32>
    %310 = vector.shape_cast %309 : vector<8xf32> to vector<8x1xf32>
    %311 = tpu.reciprocal %310 {approx = true} : vector<8x1xf32> -> vector<8x1xf32>
    %312 = vector.broadcast %311 : vector<8x1xf32> to vector<8x8xf32>
    %313 = arith.mulf %308, %312 : vector<8x8xf32>
    %cst_125 = arith.constant dense<0.000000e+00> : vector<8x16xf32>
    %314 = tpu.matmul %313, %300, %cst_125 {dimension_numbers = #tpu.dot_dimension_numbers<[1], [0], [0], [1], [0, 0, 1, 1], [], []>} : vector<8x8xf32>, vector<8x16xf32>, vector<8x16xf32> -> vector<8x16xf32>
    %315 = vector.extract_strided_slice %280 {offsets = [0, 32], sizes = [8, 16], strides = [1, 1]} : vector<16x192xf32> to vector<8x16xf32>
    %316 = vector.extract_strided_slice %280 {offsets = [0, 96], sizes = [8, 16], strides = [1, 1]} : vector<16x192xf32> to vector<8x16xf32>
    %317 = vector.extract_strided_slice %280 {offsets = [0, 160], sizes = [8, 16], strides = [1, 1]} : vector<16x192xf32> to vector<8x16xf32>
    %cst_126 = arith.constant dense<0.000000e+00> : vector<8x8xf32>
    %318 = tpu.matmul %315, %316, %cst_126 {dimension_numbers = #tpu.dot_dimension_numbers<[1], [1], [0], [0], [0, 0, 1, 0], [], []>} : vector<8x16xf32>, vector<8x16xf32>, vector<8x8xf32> -> vector<8x8xf32>
    %cst_127 = arith.constant 2.500000e-01 : f32
    %319 = vector.broadcast %cst_127 : f32 to vector<8x8xf32>
    %320 = arith.mulf %318, %319 : vector<8x8xf32>
    %cst_128 = arith.constant dense<0xFF800000> : vector<8xf32>
    %321 = vector.multi_reduction <maximumf>, %320, %cst_128 [1] : vector<8x8xf32> to vector<8xf32>
    %322 = vector.shape_cast %321 : vector<8xf32> to vector<8x1xf32>
    %323 = vector.broadcast %322 : vector<8x1xf32> to vector<8x8xf32>
    %324 = arith.subf %320, %323 : vector<8x8xf32>
    %325 = math.exp %324 : vector<8x8xf32>
    %cst_129 = arith.constant dense<0.000000e+00> : vector<8xf32>
    %326 = vector.multi_reduction <add>, %325, %cst_129 [1] : vector<8x8xf32> to vector<8xf32>
    %327 = vector.shape_cast %326 : vector<8xf32> to vector<8x1xf32>
    %328 = tpu.reciprocal %327 {approx = true} : vector<8x1xf32> -> vector<8x1xf32>
    %329 = vector.broadcast %328 : vector<8x1xf32> to vector<8x8xf32>
    %330 = arith.mulf %325, %329 : vector<8x8xf32>
    %cst_130 = arith.constant dense<0.000000e+00> : vector<8x16xf32>
    %331 = tpu.matmul %330, %317, %cst_130 {dimension_numbers = #tpu.dot_dimension_numbers<[1], [0], [0], [1], [0, 0, 1, 1], [], []>} : vector<8x8xf32>, vector<8x16xf32>, vector<8x16xf32> -> vector<8x16xf32>
    %332 = vector.extract_strided_slice %280 {offsets = [0, 48], sizes = [8, 16], strides = [1, 1]} : vector<16x192xf32> to vector<8x16xf32>
    %333 = vector.extract_strided_slice %280 {offsets = [0, 112], sizes = [8, 16], strides = [1, 1]} : vector<16x192xf32> to vector<8x16xf32>
    %334 = vector.extract_strided_slice %280 {offsets = [0, 176], sizes = [8, 16], strides = [1, 1]} : vector<16x192xf32> to vector<8x16xf32>
    %cst_131 = arith.constant dense<0.000000e+00> : vector<8x8xf32>
    %335 = tpu.matmul %332, %333, %cst_131 {dimension_numbers = #tpu.dot_dimension_numbers<[1], [1], [0], [0], [0, 0, 1, 0], [], []>} : vector<8x16xf32>, vector<8x16xf32>, vector<8x8xf32> -> vector<8x8xf32>
    %cst_132 = arith.constant 2.500000e-01 : f32
    %336 = vector.broadcast %cst_132 : f32 to vector<8x8xf32>
    %337 = arith.mulf %335, %336 : vector<8x8xf32>
    %cst_133 = arith.constant dense<0xFF800000> : vector<8xf32>
    %338 = vector.multi_reduction <maximumf>, %337, %cst_133 [1] : vector<8x8xf32> to vector<8xf32>
    %339 = vector.shape_cast %338 : vector<8xf32> to vector<8x1xf32>
    %340 = vector.broadcast %339 : vector<8x1xf32> to vector<8x8xf32>
    %341 = arith.subf %337, %340 : vector<8x8xf32>
    %342 = math.exp %341 : vector<8x8xf32>
    %cst_134 = arith.constant dense<0.000000e+00> : vector<8xf32>
    %343 = vector.multi_reduction <add>, %342, %cst_134 [1] : vector<8x8xf32> to vector<8xf32>
    %344 = vector.shape_cast %343 : vector<8xf32> to vector<8x1xf32>
    %345 = tpu.reciprocal %344 {approx = true} : vector<8x1xf32> -> vector<8x1xf32>
    %346 = vector.broadcast %345 : vector<8x1xf32> to vector<8x8xf32>
    %347 = arith.mulf %342, %346 : vector<8x8xf32>
    %cst_135 = arith.constant dense<0.000000e+00> : vector<8x16xf32>
    %348 = tpu.matmul %347, %334, %cst_135 {dimension_numbers = #tpu.dot_dimension_numbers<[1], [0], [0], [1], [0, 0, 1, 1], [], []>} : vector<8x8xf32>, vector<8x16xf32>, vector<8x16xf32> -> vector<8x16xf32>
    %349 = tpu.concatenate %297, %314, %331, %348 in 1 : vector<8x16xf32>, vector<8x16xf32>, vector<8x16xf32>, vector<8x16xf32> -> vector<8x64xf32>
    %350 = vector.extract_strided_slice %280 {offsets = [8, 0], sizes = [8, 16], strides = [1, 1]} : vector<16x192xf32> to vector<8x16xf32>
    %351 = vector.extract_strided_slice %280 {offsets = [8, 64], sizes = [8, 16], strides = [1, 1]} : vector<16x192xf32> to vector<8x16xf32>
    %352 = vector.extract_strided_slice %280 {offsets = [8, 128], sizes = [8, 16], strides = [1, 1]} : vector<16x192xf32> to vector<8x16xf32>
    %cst_136 = arith.constant dense<0.000000e+00> : vector<8x8xf32>
    %353 = tpu.matmul %350, %351, %cst_136 {dimension_numbers = #tpu.dot_dimension_numbers<[1], [1], [0], [0], [0, 0, 1, 0], [], []>} : vector<8x16xf32>, vector<8x16xf32>, vector<8x8xf32> -> vector<8x8xf32>
    %cst_137 = arith.constant 2.500000e-01 : f32
    %354 = vector.broadcast %cst_137 : f32 to vector<8x8xf32>
    %355 = arith.mulf %353, %354 : vector<8x8xf32>
    %cst_138 = arith.constant dense<0xFF800000> : vector<8xf32>
    %356 = vector.multi_reduction <maximumf>, %355, %cst_138 [1] : vector<8x8xf32> to vector<8xf32>
    %357 = vector.shape_cast %356 : vector<8xf32> to vector<8x1xf32>
    %358 = vector.broadcast %357 : vector<8x1xf32> to vector<8x8xf32>
    %359 = arith.subf %355, %358 : vector<8x8xf32>
    %360 = math.exp %359 : vector<8x8xf32>
    %cst_139 = arith.constant dense<0.000000e+00> : vector<8xf32>
    %361 = vector.multi_reduction <add>, %360, %cst_139 [1] : vector<8x8xf32> to vector<8xf32>
    %362 = vector.shape_cast %361 : vector<8xf32> to vector<8x1xf32>
    %363 = tpu.reciprocal %362 {approx = true} : vector<8x1xf32> -> vector<8x1xf32>
    %364 = vector.broadcast %363 : vector<8x1xf32> to vector<8x8xf32>
    %365 = arith.mulf %360, %364 : vector<8x8xf32>
    %cst_140 = arith.constant dense<0.000000e+00> : vector<8x16xf32>
    %366 = tpu.matmul %365, %352, %cst_140 {dimension_numbers = #tpu.dot_dimension_numbers<[1], [0], [0], [1], [0, 0, 1, 1], [], []>} : vector<8x8xf32>, vector<8x16xf32>, vector<8x16xf32> -> vector<8x16xf32>
    %367 = vector.extract_strided_slice %280 {offsets = [8, 16], sizes = [8, 16], strides = [1, 1]} : vector<16x192xf32> to vector<8x16xf32>
    %368 = vector.extract_strided_slice %280 {offsets = [8, 80], sizes = [8, 16], strides = [1, 1]} : vector<16x192xf32> to vector<8x16xf32>
    %369 = vector.extract_strided_slice %280 {offsets = [8, 144], sizes = [8, 16], strides = [1, 1]} : vector<16x192xf32> to vector<8x16xf32>
    %cst_141 = arith.constant dense<0.000000e+00> : vector<8x8xf32>
    %370 = tpu.matmul %367, %368, %cst_141 {dimension_numbers = #tpu.dot_dimension_numbers<[1], [1], [0], [0], [0, 0, 1, 0], [], []>} : vector<8x16xf32>, vector<8x16xf32>, vector<8x8xf32> -> vector<8x8xf32>
    %cst_142 = arith.constant 2.500000e-01 : f32
    %371 = vector.broadcast %cst_142 : f32 to vector<8x8xf32>
    %372 = arith.mulf %370, %371 : vector<8x8xf32>
    %cst_143 = arith.constant dense<0xFF800000> : vector<8xf32>
    %373 = vector.multi_reduction <maximumf>, %372, %cst_143 [1] : vector<8x8xf32> to vector<8xf32>
    %374 = vector.shape_cast %373 : vector<8xf32> to vector<8x1xf32>
    %375 = vector.broadcast %374 : vector<8x1xf32> to vector<8x8xf32>
    %376 = arith.subf %372, %375 : vector<8x8xf32>
    %377 = math.exp %376 : vector<8x8xf32>
    %cst_144 = arith.constant dense<0.000000e+00> : vector<8xf32>
    %378 = vector.multi_reduction <add>, %377, %cst_144 [1] : vector<8x8xf32> to vector<8xf32>
    %379 = vector.shape_cast %378 : vector<8xf32> to vector<8x1xf32>
    %380 = tpu.reciprocal %379 {approx = true} : vector<8x1xf32> -> vector<8x1xf32>
    %381 = vector.broadcast %380 : vector<8x1xf32> to vector<8x8xf32>
    %382 = arith.mulf %377, %381 : vector<8x8xf32>
    %cst_145 = arith.constant dense<0.000000e+00> : vector<8x16xf32>
    %383 = tpu.matmul %382, %369, %cst_145 {dimension_numbers = #tpu.dot_dimension_numbers<[1], [0], [0], [1], [0, 0, 1, 1], [], []>} : vector<8x8xf32>, vector<8x16xf32>, vector<8x16xf32> -> vector<8x16xf32>
    %384 = vector.extract_strided_slice %280 {offsets = [8, 32], sizes = [8, 16], strides = [1, 1]} : vector<16x192xf32> to vector<8x16xf32>
    %385 = vector.extract_strided_slice %280 {offsets = [8, 96], sizes = [8, 16], strides = [1, 1]} : vector<16x192xf32> to vector<8x16xf32>
    %386 = vector.extract_strided_slice %280 {offsets = [8, 160], sizes = [8, 16], strides = [1, 1]} : vector<16x192xf32> to vector<8x16xf32>
    %cst_146 = arith.constant dense<0.000000e+00> : vector<8x8xf32>
    %387 = tpu.matmul %384, %385, %cst_146 {dimension_numbers = #tpu.dot_dimension_numbers<[1], [1], [0], [0], [0, 0, 1, 0], [], []>} : vector<8x16xf32>, vector<8x16xf32>, vector<8x8xf32> -> vector<8x8xf32>
    %cst_147 = arith.constant 2.500000e-01 : f32
    %388 = vector.broadcast %cst_147 : f32 to vector<8x8xf32>
    %389 = arith.mulf %387, %388 : vector<8x8xf32>
    %cst_148 = arith.constant dense<0xFF800000> : vector<8xf32>
    %390 = vector.multi_reduction <maximumf>, %389, %cst_148 [1] : vector<8x8xf32> to vector<8xf32>
    %391 = vector.shape_cast %390 : vector<8xf32> to vector<8x1xf32>
    %392 = vector.broadcast %391 : vector<8x1xf32> to vector<8x8xf32>
    %393 = arith.subf %389, %392 : vector<8x8xf32>
    %394 = math.exp %393 : vector<8x8xf32>
    %cst_149 = arith.constant dense<0.000000e+00> : vector<8xf32>
    %395 = vector.multi_reduction <add>, %394, %cst_149 [1] : vector<8x8xf32> to vector<8xf32>
    %396 = vector.shape_cast %395 : vector<8xf32> to vector<8x1xf32>
    %397 = tpu.reciprocal %396 {approx = true} : vector<8x1xf32> -> vector<8x1xf32>
    %398 = vector.broadcast %397 : vector<8x1xf32> to vector<8x8xf32>
    %399 = arith.mulf %394, %398 : vector<8x8xf32>
    %cst_150 = arith.constant dense<0.000000e+00> : vector<8x16xf32>
    %400 = tpu.matmul %399, %386, %cst_150 {dimension_numbers = #tpu.dot_dimension_numbers<[1], [0], [0], [1], [0, 0, 1, 1], [], []>} : vector<8x8xf32>, vector<8x16xf32>, vector<8x16xf32> -> vector<8x16xf32>
    %401 = vector.extract_strided_slice %280 {offsets = [8, 48], sizes = [8, 16], strides = [1, 1]} : vector<16x192xf32> to vector<8x16xf32>
    %402 = vector.extract_strided_slice %280 {offsets = [8, 112], sizes = [8, 16], strides = [1, 1]} : vector<16x192xf32> to vector<8x16xf32>
    %403 = vector.extract_strided_slice %280 {offsets = [8, 176], sizes = [8, 16], strides = [1, 1]} : vector<16x192xf32> to vector<8x16xf32>
    %cst_151 = arith.constant dense<0.000000e+00> : vector<8x8xf32>
    %404 = tpu.matmul %401, %402, %cst_151 {dimension_numbers = #tpu.dot_dimension_numbers<[1], [1], [0], [0], [0, 0, 1, 0], [], []>} : vector<8x16xf32>, vector<8x16xf32>, vector<8x8xf32> -> vector<8x8xf32>
    %cst_152 = arith.constant 2.500000e-01 : f32
    %405 = vector.broadcast %cst_152 : f32 to vector<8x8xf32>
    %406 = arith.mulf %404, %405 : vector<8x8xf32>
    %cst_153 = arith.constant dense<0xFF800000> : vector<8xf32>
    %407 = vector.multi_reduction <maximumf>, %406, %cst_153 [1] : vector<8x8xf32> to vector<8xf32>
    %408 = vector.shape_cast %407 : vector<8xf32> to vector<8x1xf32>
    %409 = vector.broadcast %408 : vector<8x1xf32> to vector<8x8xf32>
    %410 = arith.subf %406, %409 : vector<8x8xf32>
    %411 = math.exp %410 : vector<8x8xf32>
    %cst_154 = arith.constant dense<0.000000e+00> : vector<8xf32>
    %412 = vector.multi_reduction <add>, %411, %cst_154 [1] : vector<8x8xf32> to vector<8xf32>
    %413 = vector.shape_cast %412 : vector<8xf32> to vector<8x1xf32>
    %414 = tpu.reciprocal %413 {approx = true} : vector<8x1xf32> -> vector<8x1xf32>
    %415 = vector.broadcast %414 : vector<8x1xf32> to vector<8x8xf32>
    %416 = arith.mulf %411, %415 : vector<8x8xf32>
    %cst_155 = arith.constant dense<0.000000e+00> : vector<8x16xf32>
    %417 = tpu.matmul %416, %403, %cst_155 {dimension_numbers = #tpu.dot_dimension_numbers<[1], [0], [0], [1], [0, 0, 1, 1], [], []>} : vector<8x8xf32>, vector<8x16xf32>, vector<8x16xf32> -> vector<8x16xf32>
    %418 = tpu.concatenate %366, %383, %400, %417 in 1 : vector<8x16xf32>, vector<8x16xf32>, vector<8x16xf32>, vector<8x16xf32> -> vector<8x64xf32>
    %419 = tpu.concatenate %349, %418 in 0 : vector<8x64xf32>, vector<8x64xf32> -> vector<16x64xf32>
    %c1_156 = arith.constant 1 : index
    %c0_157 = arith.constant 0 : index
    %c0_158 = arith.constant 0 : index
    %420 = vector.load %arg10[%c1_156, %c0_157, %c0_158] : memref<2x64x64xf32, #tpu.memory_space<vmem>>, vector<1x64x64xf32>
    %421 = vector.shape_cast %420 : vector<1x64x64xf32> to vector<64x64xf32>
    %cst_159 = arith.constant dense<0.000000e+00> : vector<16x64xf32>
    %422 = tpu.matmul %419, %421, %cst_159 {dimension_numbers = #tpu.dot_dimension_numbers<[1], [0], [0], [1], [0, 0, 1, 1], [], []>} : vector<16x64xf32>, vector<64x64xf32>, vector<16x64xf32> -> vector<16x64xf32>
    %c1_160 = arith.constant 1 : index
    %c0_161 = arith.constant 0 : index
    %c0_162 = arith.constant 0 : index
    %423 = vector.load %arg11[%c1_160, %c0_161, %c0_162] : memref<2x1x64xf32, #tpu.memory_space<vmem>>, vector<1x1x64xf32>
    %424 = vector.shape_cast %423 : vector<1x1x64xf32> to vector<1x64xf32>
    %425 = vector.broadcast %424 : vector<1x64xf32> to vector<16x64xf32>
    %426 = arith.addf %422, %425 : vector<16x64xf32>
    %427 = arith.addf %426, %273 : vector<16x64xf32>
    %c1_163 = arith.constant 1 : index
    %c0_164 = arith.constant 0 : index
    %c0_165 = arith.constant 0 : index
    %428 = vector.load %arg12[%c1_163, %c0_164, %c0_165] : memref<2x1x64xf32, #tpu.memory_space<vmem>>, vector<1x1x64xf32>
    %429 = vector.shape_cast %428 : vector<1x1x64xf32> to vector<1x64xf32>
    %c1_166 = arith.constant 1 : index
    %c0_167 = arith.constant 0 : index
    %c0_168 = arith.constant 0 : index
    %430 = vector.load %arg13[%c1_166, %c0_167, %c0_168] : memref<2x1x64xf32, #tpu.memory_space<vmem>>, vector<1x1x64xf32>
    %431 = vector.shape_cast %430 : vector<1x1x64xf32> to vector<1x64xf32>
    %cst_169 = arith.constant dense<0.000000e+00> : vector<16xf32>
    %432 = vector.multi_reduction <add>, %427, %cst_169 [1] : vector<16x64xf32> to vector<16xf32>
    %433 = vector.shape_cast %432 : vector<16xf32> to vector<16x1xf32>
    %cst_170 = arith.constant 6.400000e+01 : f32
    %434 = vector.broadcast %cst_170 : f32 to vector<16x1xf32>
    %435 = arith.divf %433, %434 : vector<16x1xf32>
    %436 = vector.broadcast %435 : vector<16x1xf32> to vector<16x64xf32>
    %437 = arith.subf %427, %436 : vector<16x64xf32>
    %438 = arith.mulf %437, %437 : vector<16x64xf32>
    %cst_171 = arith.constant dense<0.000000e+00> : vector<16xf32>
    %439 = vector.multi_reduction <add>, %438, %cst_171 [1] : vector<16x64xf32> to vector<16xf32>
    %440 = vector.shape_cast %439 : vector<16xf32> to vector<16x1xf32>
    %cst_172 = arith.constant 6.400000e+01 : f32
    %441 = vector.broadcast %cst_172 : f32 to vector<16x1xf32>
    %442 = arith.divf %440, %441 : vector<16x1xf32>
    %cst_173 = arith.constant 9.99999996E-13 : f32
    %443 = vector.broadcast %cst_173 : f32 to vector<16x1xf32>
    %444 = arith.addf %442, %443 : vector<16x1xf32>
    %445 = math.rsqrt %444 : vector<16x1xf32>
    %446 = vector.broadcast %435 : vector<16x1xf32> to vector<16x64xf32>
    %447 = arith.subf %427, %446 : vector<16x64xf32>
    %448 = vector.broadcast %445 : vector<16x1xf32> to vector<16x64xf32>
    %449 = arith.mulf %447, %448 : vector<16x64xf32>
    %450 = vector.broadcast %429 : vector<1x64xf32> to vector<16x64xf32>
    %451 = arith.mulf %449, %450 : vector<16x64xf32>
    %452 = vector.broadcast %431 : vector<1x64xf32> to vector<16x64xf32>
    %453 = arith.addf %451, %452 : vector<16x64xf32>
    %c1_174 = arith.constant 1 : index
    %c0_175 = arith.constant 0 : index
    %c0_176 = arith.constant 0 : index
    %454 = vector.load %arg14[%c1_174, %c0_175, %c0_176] : memref<2x64x128xf32, #tpu.memory_space<vmem>>, vector<1x64x128xf32>
    %455 = vector.shape_cast %454 : vector<1x64x128xf32> to vector<64x128xf32>
    %cst_177 = arith.constant dense<0.000000e+00> : vector<16x128xf32>
    %456 = tpu.matmul %453, %455, %cst_177 {dimension_numbers = #tpu.dot_dimension_numbers<[1], [0], [0], [1], [0, 0, 1, 1], [], []>} : vector<16x64xf32>, vector<64x128xf32>, vector<16x128xf32> -> vector<16x128xf32>
    %c1_178 = arith.constant 1 : index
    %c0_179 = arith.constant 0 : index
    %c0_180 = arith.constant 0 : index
    %457 = vector.load %arg15[%c1_178, %c0_179, %c0_180] : memref<2x1x128xf32, #tpu.memory_space<vmem>>, vector<1x1x128xf32>
    %458 = vector.shape_cast %457 : vector<1x1x128xf32> to vector<1x128xf32>
    %459 = vector.broadcast %458 : vector<1x128xf32> to vector<16x128xf32>
    %460 = arith.addf %456, %459 : vector<16x128xf32>
    %461 = arith.mulf %460, %460 : vector<16x128xf32>
    %462 = arith.mulf %460, %461 : vector<16x128xf32>
    %cst_181 = arith.constant 4.471500e-02 : f32
    %463 = vector.broadcast %cst_181 : f32 to vector<16x128xf32>
    %464 = arith.mulf %463, %462 : vector<16x128xf32>
    %465 = arith.addf %460, %464 : vector<16x128xf32>
    %cst_182 = arith.constant 0.797884583 : f32
    %466 = vector.broadcast %cst_182 : f32 to vector<16x128xf32>
    %467 = arith.mulf %466, %465 : vector<16x128xf32>
    %468 = math.tanh %467 : vector<16x128xf32>
    %cst_183 = arith.constant 1.000000e+00 : f32
    %469 = vector.broadcast %cst_183 : f32 to vector<16x128xf32>
    %470 = arith.addf %469, %468 : vector<16x128xf32>
    %cst_184 = arith.constant 5.000000e-01 : f32
    %471 = vector.broadcast %cst_184 : f32 to vector<16x128xf32>
    %472 = arith.mulf %471, %470 : vector<16x128xf32>
    %473 = arith.mulf %460, %472 : vector<16x128xf32>
    %c1_185 = arith.constant 1 : index
    %c0_186 = arith.constant 0 : index
    %c0_187 = arith.constant 0 : index
    %474 = vector.load %arg16[%c1_185, %c0_186, %c0_187] : memref<2x128x64xf32, #tpu.memory_space<vmem>>, vector<1x128x64xf32>
    %475 = vector.shape_cast %474 : vector<1x128x64xf32> to vector<128x64xf32>
    %cst_188 = arith.constant dense<0.000000e+00> : vector<16x64xf32>
    %476 = tpu.matmul %473, %475, %cst_188 {dimension_numbers = #tpu.dot_dimension_numbers<[1], [0], [0], [1], [0, 0, 1, 1], [], []>} : vector<16x128xf32>, vector<128x64xf32>, vector<16x64xf32> -> vector<16x64xf32>
    %c1_189 = arith.constant 1 : index
    %c0_190 = arith.constant 0 : index
    %c0_191 = arith.constant 0 : index
    %477 = vector.load %arg17[%c1_189, %c0_190, %c0_191] : memref<2x1x64xf32, #tpu.memory_space<vmem>>, vector<1x1x64xf32>
    %478 = vector.shape_cast %477 : vector<1x1x64xf32> to vector<1x64xf32>
    %479 = vector.broadcast %478 : vector<1x64xf32> to vector<16x64xf32>
    %480 = arith.addf %476, %479 : vector<16x64xf32>
    %481 = arith.addf %480, %453 : vector<16x64xf32>
    %c1_192 = arith.constant 1 : index
    %c0_193 = arith.constant 0 : index
    %c0_194 = arith.constant 0 : index
    %482 = vector.load %arg18[%c1_192, %c0_193, %c0_194] : memref<2x1x64xf32, #tpu.memory_space<vmem>>, vector<1x1x64xf32>
    %483 = vector.shape_cast %482 : vector<1x1x64xf32> to vector<1x64xf32>
    %c1_195 = arith.constant 1 : index
    %c0_196 = arith.constant 0 : index
    %c0_197 = arith.constant 0 : index
    %484 = vector.load %arg19[%c1_195, %c0_196, %c0_197] : memref<2x1x64xf32, #tpu.memory_space<vmem>>, vector<1x1x64xf32>
    %485 = vector.shape_cast %484 : vector<1x1x64xf32> to vector<1x64xf32>
    %cst_198 = arith.constant dense<0.000000e+00> : vector<16xf32>
    %486 = vector.multi_reduction <add>, %481, %cst_198 [1] : vector<16x64xf32> to vector<16xf32>
    %487 = vector.shape_cast %486 : vector<16xf32> to vector<16x1xf32>
    %cst_199 = arith.constant 6.400000e+01 : f32
    %488 = vector.broadcast %cst_199 : f32 to vector<16x1xf32>
    %489 = arith.divf %487, %488 : vector<16x1xf32>
    %490 = vector.broadcast %489 : vector<16x1xf32> to vector<16x64xf32>
    %491 = arith.subf %481, %490 : vector<16x64xf32>
    %492 = arith.mulf %491, %491 : vector<16x64xf32>
    %cst_200 = arith.constant dense<0.000000e+00> : vector<16xf32>
    %493 = vector.multi_reduction <add>, %492, %cst_200 [1] : vector<16x64xf32> to vector<16xf32>
    %494 = vector.shape_cast %493 : vector<16xf32> to vector<16x1xf32>
    %cst_201 = arith.constant 6.400000e+01 : f32
    %495 = vector.broadcast %cst_201 : f32 to vector<16x1xf32>
    %496 = arith.divf %494, %495 : vector<16x1xf32>
    %cst_202 = arith.constant 9.99999996E-13 : f32
    %497 = vector.broadcast %cst_202 : f32 to vector<16x1xf32>
    %498 = arith.addf %496, %497 : vector<16x1xf32>
    %499 = math.rsqrt %498 : vector<16x1xf32>
    %500 = vector.broadcast %489 : vector<16x1xf32> to vector<16x64xf32>
    %501 = arith.subf %481, %500 : vector<16x64xf32>
    %502 = vector.broadcast %499 : vector<16x1xf32> to vector<16x64xf32>
    %503 = arith.mulf %501, %502 : vector<16x64xf32>
    %504 = vector.broadcast %483 : vector<1x64xf32> to vector<16x64xf32>
    %505 = arith.mulf %503, %504 : vector<16x64xf32>
    %506 = vector.broadcast %485 : vector<1x64xf32> to vector<16x64xf32>
    %507 = arith.addf %505, %506 : vector<16x64xf32>
    %508 = vector.extract_strided_slice %507 {offsets = [0, 0], sizes = [1, 64], strides = [1, 1]} : vector<16x64xf32> to vector<1x64xf32>
    %509 = vector.extract_strided_slice %507 {offsets = [8, 0], sizes = [1, 64], strides = [1, 1]} : vector<16x64xf32> to vector<1x64xf32>
    %510 = tpu.concatenate %508, %509 in 0 : vector<1x64xf32>, vector<1x64xf32> -> vector<2x64xf32>
    %c0_203 = arith.constant 0 : index
    %c0_204 = arith.constant 0 : index
    %511 = vector.load %arg20[%c0_203, %c0_204] : memref<64x64xf32, #tpu.memory_space<vmem>>, vector<64x64xf32>
    %cst_205 = arith.constant dense<0.000000e+00> : vector<2x64xf32>
    %512 = tpu.matmul %510, %511, %cst_205 {dimension_numbers = #tpu.dot_dimension_numbers<[1], [0], [0], [1], [0, 0, 1, 1], [], []>} : vector<2x64xf32>, vector<64x64xf32>, vector<2x64xf32> -> vector<2x64xf32>
    %c0_206 = arith.constant 0 : index
    %c0_207 = arith.constant 0 : index
    %513 = vector.load %arg21[%c0_206, %c0_207] : memref<1x64xf32, #tpu.memory_space<vmem>>, vector<1x64xf32>
    %514 = vector.broadcast %513 : vector<1x64xf32> to vector<2x64xf32>
    %515 = arith.addf %512, %514 : vector<2x64xf32>
    %516 = math.tanh %515 : vector<2x64xf32>
    %c0_208 = arith.constant 0 : index
    %c0_209 = arith.constant 0 : index
    %517 = vector.load %arg22[%c0_208, %c0_209] : memref<64x2xf32, #tpu.memory_space<vmem>>, vector<64x2xf32>
    %cst_210 = arith.constant dense<0.000000e+00> : vector<2x2xf32>
    %518 = tpu.matmul %516, %517, %cst_210 {dimension_numbers = #tpu.dot_dimension_numbers<[1], [0], [0], [1], [0, 0, 1, 1], [], []>} : vector<2x64xf32>, vector<64x2xf32>, vector<2x2xf32> -> vector<2x2xf32>
    %c0_211 = arith.constant 0 : index
    %c0_212 = arith.constant 0 : index
    %519 = vector.load %arg23[%c0_211, %c0_212] : memref<1x2xf32, #tpu.memory_space<vmem>>, vector<1x2xf32>
    %520 = vector.broadcast %519 : vector<1x2xf32> to vector<2x2xf32>
    %521 = arith.addf %518, %520 : vector<2x2xf32>
    %c0_213 = arith.constant 0 : index
    %c0_214 = arith.constant 0 : index
    %522 = vector.load %arg2[%c0_213, %c0_214] : memref<2x1xi32, #tpu.memory_space<vmem>>, vector<2x1xi32>
    %523 = tpu.iota {dimensions = array<i32: 1>} : vector<2x2xi32>
    %524 = vector.broadcast %522 : vector<2x1xi32> to vector<2x2xi32>
    %525 = arith.cmpi eq, %523, %524 : vector<2x2xi32>
    %526 = arith.extui %525 : vector<2x2xi1> to vector<2x2xi32>
    %527 = arith.sitofp %526 : vector<2x2xi32> to vector<2x2xf32>
    %cst_215 = arith.constant dense<0xFF800000> : vector<2xf32>
    %528 = vector.multi_reduction <maximumf>, %521, %cst_215 [1] : vector<2x2xf32> to vector<2xf32>
    %529 = vector.shape_cast %528 : vector<2xf32> to vector<2x1xf32>
    %530 = vector.broadcast %529 : vector<2x1xf32> to vector<2x2xf32>
    %531 = arith.subf %521, %530 : vector<2x2xf32>
    %532 = math.exp %531 : vector<2x2xf32>
    %cst_216 = arith.constant dense<0.000000e+00> : vector<2xf32>
    %533 = vector.multi_reduction <add>, %532, %cst_216 [1] : vector<2x2xf32> to vector<2xf32>
    %534 = vector.shape_cast %533 : vector<2xf32> to vector<2x1xf32>
    %535 = math.log %534 : vector<2x1xf32>
    %536 = arith.addf %535, %529 : vector<2x1xf32>
    %537 = arith.mulf %521, %527 : vector<2x2xf32>
    %cst_217 = arith.constant dense<0.000000e+00> : vector<2xf32>
    %538 = vector.multi_reduction <add>, %537, %cst_217 [1] : vector<2x2xf32> to vector<2xf32>
    %539 = vector.shape_cast %538 : vector<2xf32> to vector<2x1xf32>
    %540 = arith.subf %536, %539 : vector<2x1xf32>
    %541 = vector.shape_cast %540 : vector<2x1xf32> to vector<1x2x1xf32>
    %cst_218 = arith.constant dense<0.000000e+00> : vector<1xf32>
    %542 = vector.multi_reduction <add>, %541, %cst_218 [1, 2] : vector<1x2x1xf32> to vector<1xf32>
    %543 = vector.shape_cast %542 : vector<1xf32> to vector<1x1x1xf32>
    %544 = vector.extract %543[0, 0, 0] : f32 from vector<1x1x1xf32>
    %545 = vector.broadcast %544 : f32 to vector<1x1xf32>
    %cst_219 = arith.constant 2.000000e+00 : f32
    %546 = vector.broadcast %cst_219 : f32 to vector<1x1xf32>
    %547 = arith.divf %545, %546 : vector<1x1xf32>
    %c0_220 = arith.constant 0 : index
    %c0_221 = arith.constant 0 : index
    %548 = vector.load %arg24[%c0_220, %c0_221] : memref<1x1xf32, #tpu.memory_space<vmem>>, vector<1x1xf32>
    tpu.vector_store %arg24[%c0_220, %c0_221], %547 {strides = array<i32>} : memref<1x1xf32, #tpu.memory_space<vmem>>, vector<1x1xf32>,
    %c0_222 = arith.constant 0 : index
    %c0_223 = arith.constant 0 : index
    %549 = vector.load %arg25[%c0_222, %c0_223] : memref<2x2xf32, #tpu.memory_space<vmem>>, vector<2x2xf32>
    tpu.vector_store %arg25[%c0_222, %c0_223], %521 {strides = array<i32>} : memref<2x2xf32, #tpu.memory_space<vmem>>, vector<2x2xf32>,
    return
  }
  func.func @transform_0(%arg0: i32) -> (i32, i32) {
    %c0_i32 = arith.constant 0 : i32
    %c0_i32_0 = arith.constant 0 : i32
    %c0_i32_1 = arith.constant 0 : i32
    return %c0_i32, %c0_i32_0 : i32, i32
  }
  func.func @transform_1(%arg0: i32) -> (i32, i32) {
    %c0_i32 = arith.constant 0 : i32
    %c0_i32_0 = arith.constant 0 : i32
    %c0_i32_1 = arith.constant 0 : i32
    return %c0_i32, %c0_i32_0 : i32, i32
  }
  func.func @transform_2(%arg0: i32) -> (i32, i32) {
    %c0_i32 = arith.constant 0 : i32
    %c0_i32_0 = arith.constant 0 : i32
    %c0_i32_1 = arith.constant 0 : i32
    return %c0_i32, %c0_i32_0 : i32, i32
  }
  func.func @transform_3(%arg0: i32) -> (i32, i32) {
    %c0_i32 = arith.constant 0 : i32
    %c0_i32_0 = arith.constant 0 : i32
    %c0_i32_1 = arith.constant 0 : i32
    return %c0_i32, %c0_i32_0 : i32, i32
  }
  func.func @transform_4(%arg0: i32) -> (i32, i32) {
    %c0_i32 = arith.constant 0 : i32
    %c0_i32_0 = arith.constant 0 : i32
    %c0_i32_1 = arith.constant 0 : i32
    return %c0_i32, %c0_i32_0 : i32, i32
  }
  func.func @transform_5(%arg0: i32) -> (i32, i32) {
    %c0_i32 = arith.constant 0 : i32
    %c0_i32_0 = arith.constant 0 : i32
    %c0_i32_1 = arith.constant 0 : i32
    return %c0_i32, %c0_i32_0 : i32, i32
  }
  func.func @transform_6(%arg0: i32) -> (i32, i32) {
    %c0_i32 = arith.constant 0 : i32
    %c0_i32_0 = arith.constant 0 : i32
    %c0_i32_1 = arith.constant 0 : i32
    return %c0_i32, %c0_i32_0 : i32, i32
  }
  func.func @transform_7(%arg0: i32) -> (i32, i32, i32) {
    %c0_i32 = arith.constant 0 : i32
    %c0_i32_0 = arith.constant 0 : i32
    %c0_i32_1 = arith.constant 0 : i32
    %c0_i32_2 = arith.constant 0 : i32
    return %c0_i32, %c0_i32_0, %c0_i32_1 : i32, i32, i32
  }
  func.func @transform_8(%arg0: i32) -> (i32, i32, i32) {
    %c0_i32 = arith.constant 0 : i32
    %c0_i32_0 = arith.constant 0 : i32
    %c0_i32_1 = arith.constant 0 : i32
    %c0_i32_2 = arith.constant 0 : i32
    return %c0_i32, %c0_i32_0, %c0_i32_1 : i32, i32, i32
  }
  func.func @transform_9(%arg0: i32) -> (i32, i32, i32) {
    %c0_i32 = arith.constant 0 : i32
    %c0_i32_0 = arith.constant 0 : i32
    %c0_i32_1 = arith.constant 0 : i32
    %c0_i32_2 = arith.constant 0 : i32
    return %c0_i32, %c0_i32_0, %c0_i32_1 : i32, i32, i32
  }
  func.func @transform_10(%arg0: i32) -> (i32, i32, i32) {
    %c0_i32 = arith.constant 0 : i32
    %c0_i32_0 = arith.constant 0 : i32
    %c0_i32_1 = arith.constant 0 : i32
    %c0_i32_2 = arith.constant 0 : i32
    return %c0_i32, %c0_i32_0, %c0_i32_1 : i32, i32, i32
  }
  func.func @transform_11(%arg0: i32) -> (i32, i32, i32) {
    %c0_i32 = arith.constant 0 : i32
    %c0_i32_0 = arith.constant 0 : i32
    %c0_i32_1 = arith.constant 0 : i32
    %c0_i32_2 = arith.constant 0 : i32
    return %c0_i32, %c0_i32_0, %c0_i32_1 : i32, i32, i32
  }
  func.func @transform_12(%arg0: i32) -> (i32, i32, i32) {
    %c0_i32 = arith.constant 0 : i32
    %c0_i32_0 = arith.constant 0 : i32
    %c0_i32_1 = arith.constant 0 : i32
    %c0_i32_2 = arith.constant 0 : i32
    return %c0_i32, %c0_i32_0, %c0_i32_1 : i32, i32, i32
  }
  func.func @transform_13(%arg0: i32) -> (i32, i32, i32) {
    %c0_i32 = arith.constant 0 : i32
    %c0_i32_0 = arith.constant 0 : i32
    %c0_i32_1 = arith.constant 0 : i32
    %c0_i32_2 = arith.constant 0 : i32
    return %c0_i32, %c0_i32_0, %c0_i32_1 : i32, i32, i32
  }
  func.func @transform_14(%arg0: i32) -> (i32, i32, i32) {
    %c0_i32 = arith.constant 0 : i32
    %c0_i32_0 = arith.constant 0 : i32
    %c0_i32_1 = arith.constant 0 : i32
    %c0_i32_2 = arith.constant 0 : i32
    return %c0_i32, %c0_i32_0, %c0_i32_1 : i32, i32, i32
  }
  func.func @transform_15(%arg0: i32) -> (i32, i32, i32) {
    %c0_i32 = arith.constant 0 : i32
    %c0_i32_0 = arith.constant 0 : i32
    %c0_i32_1 = arith.constant 0 : i32
    %c0_i32_2 = arith.constant 0 : i32
    return %c0_i32, %c0_i32_0, %c0_i32_1 : i32, i32, i32
  }
  func.func @transform_16(%arg0: i32) -> (i32, i32, i32) {
    %c0_i32 = arith.constant 0 : i32
    %c0_i32_0 = arith.constant 0 : i32
    %c0_i32_1 = arith.constant 0 : i32
    %c0_i32_2 = arith.constant 0 : i32
    return %c0_i32, %c0_i32_0, %c0_i32_1 : i32, i32, i32
  }
  func.func @transform_17(%arg0: i32) -> (i32, i32, i32) {
    %c0_i32 = arith.constant 0 : i32
    %c0_i32_0 = arith.constant 0 : i32
    %c0_i32_1 = arith.constant 0 : i32
    %c0_i32_2 = arith.constant 0 : i32
    return %c0_i32, %c0_i32_0, %c0_i32_1 : i32, i32, i32
  }
  func.func @transform_18(%arg0: i32) -> (i32, i32, i32) {
    %c0_i32 = arith.constant 0 : i32
    %c0_i32_0 = arith.constant 0 : i32
    %c0_i32_1 = arith.constant 0 : i32
    %c0_i32_2 = arith.constant 0 : i32
    return %c0_i32, %c0_i32_0, %c0_i32_1 : i32, i32, i32
  }
  func.func @transform_19(%arg0: i32) -> (i32, i32) {
    %c0_i32 = arith.constant 0 : i32
    %c0_i32_0 = arith.constant 0 : i32
    %c0_i32_1 = arith.constant 0 : i32
    return %c0_i32, %c0_i32_0 : i32, i32
  }
  func.func @transform_20(%arg0: i32) -> (i32, i32) {
    %c0_i32 = arith.constant 0 : i32
    %c0_i32_0 = arith.constant 0 : i32
    %c0_i32_1 = arith.constant 0 : i32
    return %c0_i32, %c0_i32_0 : i32, i32
  }
  func.func @transform_21(%arg0: i32) -> (i32, i32) {
    %c0_i32 = arith.constant 0 : i32
    %c0_i32_0 = arith.constant 0 : i32
    %c0_i32_1 = arith.constant 0 : i32
    return %c0_i32, %c0_i32_0 : i32, i32
  }
  func.func @transform_22(%arg0: i32) -> (i32, i32) {
    %c0_i32 = arith.constant 0 : i32
    %c0_i32_0 = arith.constant 0 : i32
    %c0_i32_1 = arith.constant 0 : i32
    return %c0_i32, %c0_i32_0 : i32, i32
  }
  func.func @transform_23(%arg0: i32) -> (i32, i32) {
    %c0_i32 = arith.constant 0 : i32
    %c0_i32_0 = arith.constant 0 : i32
    %c0_i32_1 = arith.constant 0 : i32
    return %c0_i32, %c0_i32_0 : i32, i32
  }
  func.func @transform_24(%arg0: i32) -> (i32, i32) {
    %c0_i32 = arith.constant 0 : i32
    %c0_i32_0 = arith.constant 0 : i32
    %c0_i32_1 = arith.constant 0 : i32
    return %c0_i32, %c0_i32_0 : i32, i32
  }
}

</mosaic_0001>

<bundles_post_ra>
// kernel: tpu_custom_call.1
= control target key start
LH: loop header
LB: loop body
LE: loop exit
PB: predicated region body
PF: predicated region fallthrough
CT: control target
= control target key end

     0   :  { %s6257_s0 = inlined_call_operand.vmem [shape: s32[16,1], index: 0, kind: input, shape index: {}]   ;;  %s6258_s1 = inlined_call_operand.vmem [shape: s32[2,1], index: 1, kind: input, shape index: {}]   ;;  %s6259_s2 = inlined_call_operand.vmem [shape: f32[100,64], index: 2, kind: input, shape index: {}]   ;;  %s6260_s3 = inlined_call_operand.hbm [shape: f32[16,64], index: 3, kind: input, shape index: {}]   ;;  %s6261_s4 = inlined_call_operand.hbm [shape: f32[2,64], index: 4, kind: input, shape index: {}]   ;;  %s6262_s5 = inlined_call_operand.hbm [shape: f32[1,64], index: 5, kind: input, shape index: {}]   ;;  %s6263_s6 = inlined_call_operand.hbm [shape: f32[1,64], index: 6, kind: input, shape index: {}]   ;;  %s6264_s7 = inlined_call_operand.vmem [shape: f32[2,64,192], index: 7, kind: input, shape index: {}]   ;;  %s6265_s8 = inlined_call_operand.vmem [shape: f32[2,1,192], index: 8, kind: input, shape index: {}]   ;;  %s6266_s9 = inlined_call_operand.vmem [shape: f32[2,64,64], index: 9, kind: input, shape index: {}]   ;;  %s6267_s10 = inlined_call_operand.vmem [shape: f32[2,1,64], index: 10, kind: input, shape index: {}]   ;;  %s6268_s11 = inlined_call_operand.vmem [shape: f32[2,1,64], index: 11, kind: input, shape index: {}]   ;;  %s6269_s12 = inlined_call_operand.vmem [shape: f32[2,1,64], index: 12, kind: input, shape index: {}]   ;;  %s6270_s13 = inlined_call_operand.vmem [shape: f32[2,64,128], index: 13, kind: input, shape index: {}]   ;;  %s6271_s14 = inlined_call_operand.vmem [shape: f32[2,1,128], index: 14, kind: input, shape index: {}]   ;;  %s6272_s15 = inlined_call_operand.vmem [shape: f32[2,128,64], index: 15, kind: input, shape index: {}]   ;;  %s6273_s16 = inlined_call_operand.vmem [shape: f32[2,1,64], index: 16, kind: input, shape index: {}]   ;;  %s6274_s17 = inlined_call_operand.vmem [shape: f32[2,1,64], index: 17, kind: input, shape index: {}]   ;;  %s6275_s18 = inlined_call_operand.vmem [shape: f32[2,1,64], index: 18, kind: input, shape index: {}]   ;;  %s6276_s19 = inlined_call_operand.hbm [shape: f32[64,64], index: 19, kind: input, shape index: {}]   ;;  %s6277_s20 = inlined_call_operand.vmem [shape: f32[1,64], index: 20, kind: input, shape index: {}]   ;;  %s6278_s21 = inlined_call_operand.vmem [shape: f32[64,2], index: 21, kind: input, shape index: {}]   ;;  %s6279_s22 = inlined_call_operand.vmem [shape: f32[1,2], index: 22, kind: input, shape index: {}]   ;;  %s6280_s23 = inlined_call_operand.hbm [shape: f32[1,1], index: 23, kind: output, shape index: {0}]   ;;  %s6281_s24 = inlined_call_operand.hbm [shape: f32[2,2], index: 24, kind: output, shape index: {1}]  }
   0x1   :  { %6292 = sst [smem:[#allocation19_spill]] %s6257_s0 }
   0x2   :  { %6293 = sst [smem:[#allocation20_spill]] %s6258_s1 }
   0x3   :  { %6294 = sst [smem:[#allocation21_spill]] %s6259_s2 }
   0x4   :  { %6295 = sst [smem:[#allocation22_spill]] %s6260_s3 }
   0x5   :  { %6296 = sst [smem:[#allocation23_spill]] %s6261_s4 }
   0x6   :  { %6297 = sst [smem:[#allocation24_spill]] %s6262_s5 }
   0x7   :  { %6298 = sst [smem:[#allocation25_spill]] %s6263_s6 }
   0x8   :  { %6299 = sst [smem:[#allocation26_spill]] %s6264_s7 }
   0x9   :  { %6300 = sst [smem:[#allocation27_spill]] %s6265_s8 }
   0xa   :  { %30 = vsyncpa [#allocation3], 0 }
   0xb   :  { %31 = vsyncpa [#allocation6], 0 }
   0xc   :  { %32 = vsyncpa [#allocation9], 0 }
   0xd   :  { %33 = vsyncpa [#allocation4], 0 }
   0xe   :  { %34 = vsyncpa [#allocation13], 0  ;;  %s5264_s5 = smov [#allocation5]   ;;  %s5265_s27 = smov [#allocation8]  }
   0xf   :  { %s59_s26 = sshll.u32 %s5264_s5, 4  ;;  %s79_s28 = sshll.u32 %s5265_s27, 4  ;;  %s60_s26 = int_to_ptr.vmem [resolvable:$true] %s59_s26  ;;  %s80_s28 = int_to_ptr.vmem [resolvable:$true] %s79_s28 }
  0x10   :  { %s5122_s6 = scalar_lea.vmem %s60_s26, 32  ;;  %p5127_p1 = scmp.lt.s32.totalorder %s60_s26, %s60_s26 }
  0x11   :  { %p5123_p0 = scmp.ne.s32.totalorder %s60_s26, %s5122_s6  ;;  %p5128_p2 = scmp.lt.s32.totalorder %s5122_s6, %s5122_s6 }
  0x13   :  { %p5129_p3 = por %p5128_p2, %p5127_p1 }
  0x15   :  { %p5130_p4 = pnand %p5129_p3, %p5123_p0 }
  0x17   :  { %5133 = shalt.err (!%p5130_p4)
}
  0x18   :  { %s6301_s0 = sld [smem:[#allocation23_spill]]  ;;  %s5142_s7 = scalar_lea.vmem %s80_s28, 16 }
  0x19   :  { %p5143_p5 = scmp.ne.s32.totalorder %s80_s28, %s5142_s7  ;;  %s5146_s30 = scalar_lea.vmem %s80_s28, 32 }
  0x1a   :  { %p5147_p6 = scmp.lt.s32.totalorder %s80_s28, %s80_s28  ;;  %p5148_p7 = scmp.lt.s32.totalorder %s5146_s30, %s5142_s7 }
  0x1c   :  { %p5149_p8 = por %p5148_p7, %p5147_p6 }
  0x1e   :  { %62 = dma.hbm_to_vmem [thread:$0]  %s6301_s0, 32, %s60_s26, [#allocation6]  }
  0x1f   :  { %p5150_p9 = pnand %p5149_p8, %p5143_p5 }
  0x21   :  { %5153 = shalt.err (!%p5150_p9)
}
  0x22   :  { %s6302_s8 = sld [smem:[#allocation25_spill]]  ;;  %s5266_s4 = smov [#allocation2]  }
  0x23   :  { %s46_s1 = sshll.u32 %s5266_s4, 4  ;;  %s47_s1 = int_to_ptr.vmem [resolvable:$true] %s46_s1 }
  0x24   :  { %s5162_s5 = scalar_lea.vmem %s47_s1, 256  ;;  %p5167_p11 = scmp.lt.s32.totalorder %s47_s1, %s47_s1 }
  0x25   :  { %p5163_p10 = scmp.ne.s32.totalorder %s47_s1, %s5162_s5  ;;  %p5168_p12 = scmp.lt.s32.totalorder %s5162_s5, %s5162_s5 }
  0x27   :  { %p5169_p13 = por %p5168_p12, %p5167_p11 }
  0x28   :  { %82 = dma.hbm_to_vmem [thread:$0]  %s6302_s8, 16, %s80_s28, [#allocation9]  }
  0x29   :  { %p5170_p0 = pnand %p5169_p13, %p5163_p10 }
  0x2b   :  { %5173 = shalt.err (!%p5170_p0)
}
  0x2c   :  { %s5267_s26 = smov 128   ;;  %s5268_s27 = smov 8  }
  0x2d   :  { %s6303_s29 = sld [smem:[#allocation22_spill]]  ;;  %s5269_s0 = smov [#allocation7]  }
  0x2e   :  { %s69_s7 = sshll.u32 %s5269_s0, 4  ;;  %s5270_s28 = smov [#allocation10]   ;;  %s70_s7 = int_to_ptr.vmem [resolvable:$true] %s69_s7 }
  0x2f   :  { %s112_s30 = sshll.u32 %s5270_s28, 4  ;;  %s5182_s3 = scalar_lea.vmem %s70_s7, 16  ;;  %s113_s30 = int_to_ptr.vmem [resolvable:$true] %s112_s30 }
  0x30   :  { %p5183_p1 = scmp.ne.s32.totalorder %s70_s7, %s5182_s3  ;;  %s5186_s25 = scalar_lea.vmem %s70_s7, 32 }
  0x31   :  { %p5187_p2 = scmp.lt.s32.totalorder %s70_s7, %s70_s7  ;;  %p5188_p3 = scmp.lt.s32.totalorder %s5186_s25, %s5182_s3 }
  0x33   :  { %52 = dma.hbm_to_vmem [thread:$0]  %s6303_s29, 256, %s47_s1, [#allocation3], %s5267_s26, %s5267_s26, %s5268_s27  }
  0x34   :  { %p5189_p4 = por %p5188_p3, %p5187_p2 }
  0x36   :  { %p5190_p5 = pnand %p5189_p4, %p5183_p1 }
  0x38   :  { %5193 = shalt.err (!%p5190_p5)
}
  0x39   :  { %s6304_s5 = sld [smem:[#allocation24_spill]]  ;;  %s5202_s6 = scalar_lea.vmem %s113_s30, 1024 }
  0x3a   :  { %p5203_p6 = scmp.ne.s32.totalorder %s113_s30, %s5202_s6  ;;  %p5207_p7 = scmp.lt.s32.totalorder %s113_s30, %s113_s30 }
  0x3b   :  { %p5208_p8 = scmp.lt.s32.totalorder %s5202_s6, %s5202_s6 }
  0x3d   :  { %p5209_p9 = por %p5208_p8, %p5207_p7 }
  0x3f   :  { %72 = dma.hbm_to_vmem [thread:$0]  %s6304_s5, 16, %s70_s7, [#allocation6]  }
  0x40   :  { %p5210_p10 = pnand %p5209_p9, %p5203_p6 }
  0x42   :  { %5213 = shalt.err (!%p5210_p10)
}
  0x43   :  { %118 = dma.hbm_to_vmem [thread:$0]  %s6276_s19, 1024, %s113_s30, [#allocation9], %s5267_s26, %s5267_s26, %s5268_s27  }
  0x44   :  { %5254 = dma.done.wait [#allocation3], 256  }
  0x45   :  { %5255 = vsyncadd [#allocation3], 4294967040 }
  0x46   :  { %5256 = dma.done.wait [#allocation6], 48  }
  0x47   :  { %5257 = vsyncadd [#allocation6], 4294967248 }
  0x48   :  { %5258 = dma.done.wait [#allocation9], 1040  }
  0x49   :  { %5259 = vsyncadd [#allocation9], 4294966256  ;;  %v5271_v0 = vmov 0   ;;  %vm183_vm0 = vcmask 1043456   ;;  %v5272_v1 = vmov 0.0   ;;  %s6305_s7 = sld [smem:[#allocation19_spill]]  ;;  %v142_v17 = vlaneseq }
  0x4a   :  { %5014 = vset.pattern.permute.xlu0 %v5271_v0  ;;  %5015 = vset.pattern.permute.xlu1 %v5271_v0  ;;  %s6306_s19 = sld [smem:[#allocation21_spill]]  ;;  %vm176_vm1 = vcmask 818176   ;;  %v170_v25 = vld [vmem:[#allocation5] sm:$0x3]  ;;  %v169_v27 = vld [vmem:[#allocation2] sm:$0xff]  ;;  %vm264_vm4 = vcmask 523264  }
  0x4b   :  { %406 = vmatprep.mubr.f32.mxu1 %v5272_v1  ;;  %v5470_v18 = vand.u32 127, %v142_v17  ;;  %v5476_v23 = vshrl.u32 %v142_v17, 7  ;;  %vm5273_vm5 = vmmov 0   ;;  %s6308_s26 = sld [smem:[#allocation27_spill]]  ;;  %s5274_s27 = smov 96   ;;  %vm422_vm6 = vcmask 130048  }
  0x4c   :  { %s5275_s30 = smov 64   ;;  %s6288_s25 = smov 48   ;;  %vm498_vm7 = vcmask 64512   ;;  %vm1095_vm8 = vcmask 261120   ;;  %vm1097_vm9 = vcmask 392192   ;;  %vm4053_vm10 = vcmask 1040384  }
  0x4d   :  { %v5479_v24 = vsub.s32 0, %v5476_v23  ;;  %s5277_s8 = smov 32   ;;  %s5278_s4 = smov 112   ;;  %vm4239_vm11 = vcmask 9216   ;;  %vm4257_vm13 = vcmask 1024  }
  0x4e   :  { %s6290_s5 = smov 16   ;;  %s6286_s6 = smov 80  }
  0x4f   :  { %v140_v2 = vld [vmem:[%s6305_s7] sm:$0xff]  ;;  %v141_v5 = vld [vmem:[%s6305_s7 + $0x8] sm:$0xff]  ;;  %v174_v26 = vrot.slane %v170_v25, %v5479_v24  ;;  %s6307_s7 = sld [smem:[#allocation26_spill]]  ;;  %s6309_s2 = smov 16  }
  0x50   :  { %v168_v3 = vld [vmem:[%s6306_s19 + $0x60] sm:$0xf]  ;;  %145 = vperm.xlu0 %5014, %v140_v2   ;;  %v167_v4 = vld [vmem:[%s6306_s19 + $0x58] sm:$0xff]  ;;  %v166_v6 = vld [vmem:[%s6306_s19 + $0x50] sm:$0xff]  ;;  %s6312_s3 = sld [smem:[#allocation20_spill]] }
  0x51   :  { %4620 = vmatprep.subr.msk.mxu0 %vm183_vm0, %v168_v3  ;;  %v165_v7 = vld [vmem:[%s6306_s19 + $0x48] sm:$0xff]  ;;  %v164_v8 = vld [vmem:[%s6306_s19 + $0x40] sm:$0xff]  ;;  %v163_v9 = vld [vmem:[%s6306_s19 + $0x38] sm:$0xff]  ;;  %v175_v29 = vadd.f32 %v174_v26, %v169_v27 }
  0x52   :  { %4621 = vmatpush3.msk.msra.mxu0 %vm183_vm0, %v168_v3  ;;  %v162_v10 = vld [vmem:[%s6306_s19 + $0x30] sm:$0xff]  ;;  %v161_v11 = vld [vmem:[%s6306_s19 + $0x28] sm:$0xff]  ;;  %v160_v12 = vld [vmem:[%s6306_s19 + $0x20] sm:$0xff] }
  0x53   :  { %4622 = vmatprep.subr.mxu0 %v167_v4  ;;  %v159_v13 = vld [vmem:[%s6306_s19 + $0x18] sm:$0xff]  ;;  %v158_v14 = vld [vmem:[%s6306_s19 + $0x10] sm:$0xff]  ;;  %v157_v15 = vld [vmem:[%s6306_s19 + $0x8] sm:$0xff] }
  0x54   :  { %4623 = vmatpush3.msra.mxu0 %v167_v4  ;;  %148 = vperm.xlu0 %5014, %v141_v5   ;;  %v156_v16 = vld [vmem:[%s6306_s19] sm:$0xff]  ;;  %v4310_v5 = vld [vmem:[#allocation7] ss:$0 sm:$0xff] }
  0x55   :  { %4624 = vmatprep.subr.mxu0 %v166_v6  ;;  %v323_v45 = vld [vmem:[%s6307_s7 + $0x78] sm:$0xff]  ;;  %v322_v46 = vld [vmem:[%s6307_s7 + $0x70] sm:$0xff]  ;;  %v321_v47 = vld [vmem:[%s6307_s7 + $0x68] sm:$0xff] }
  0x56   :  { %4625 = vmatpush3.msra.mxu0 %v166_v6  ;;  %358 = vmatprep.subr.mxu1 %v323_v45  ;;  %v320_v48 = vld [vmem:[%s6307_s7 + $0x60] sm:$0xff]  ;;  %v319_v49 = vld [vmem:[%s6307_s7 + $0x58] sm:$0xff]  ;;  %v318_v50 = vld [vmem:[%s6307_s7 + $0x50] sm:$0xff] }
  0x57   :  { %4626 = vmatprep.subr.mxu0 %v165_v7  ;;  %359 = vmatpush1.msra.mxu1 %v322_v46  ;;  %v317_v51 = vld [vmem:[%s6307_s7 + $0x48] sm:$0xff]  ;;  %v316_v52 = vld [vmem:[%s6307_s7 + $0x40] sm:$0xff]  ;;  %v315_v53 = vld [vmem:[%s6307_s7 + $0x38] sm:$0xff] }
  0x58   :  { %4627 = vmatpush3.msra.mxu0 %v165_v7  ;;  %360 = vmatprep.subr.mxu1 %v321_v47  ;;  %v314_v54 = vld [vmem:[%s6307_s7 + $0x30] sm:$0xff]  ;;  %v313_v55 = vld [vmem:[%s6307_s7 + $0x28] sm:$0xff]  ;;  %v312_v56 = vld [vmem:[%s6307_s7 + $0x20] sm:$0xff] }
  0x59   :  { %4628 = vmatprep.subr.mxu0 %v164_v8  ;;  %361 = vmatpush1.msra.mxu1 %v320_v48  ;;  %v311_v57 = vld [vmem:[%s6307_s7 + $0x18] sm:$0xff]  ;;  %v310_v58 = vld [vmem:[%s6307_s7 + $0x10] sm:$0xff]  ;;  %v309_v59 = vld [vmem:[%s6307_s7 + $0x8] sm:$0xff] }
  0x5a   :  { %4629 = vmatpush3.msra.mxu0 %v164_v8  ;;  %362 = vmatprep.subr.mxu1 %v319_v49  ;;  %v308_v60 = vld [vmem:[%s6307_s7] sm:$0xff]  ;;  %v4311_v7 = vld [vmem:[#allocation8] ss:$0 sm:$0xff] }
  0x5b   :  { %4630 = vmatprep.subr.mxu0 %v163_v9  ;;  %363 = vmatpush1.msra.mxu1 %v318_v50 }
  0x5c   :  { %4631 = vmatpush3.msra.mxu0 %v163_v9  ;;  %364 = vmatprep.subr.mxu1 %v317_v51 }
  0x5d   :  { %4632 = vmatprep.subr.mxu0 %v162_v10  ;;  %365 = vmatpush1.msra.mxu1 %v316_v52 }
  0x5e   :  { %4633 = vmatpush3.msra.mxu0 %v162_v10  ;;  %366 = vmatprep.subr.mxu1 %v315_v53 }
  0x5f   :  { %4634 = vmatprep.subr.mxu0 %v161_v11  ;;  %367 = vmatpush1.msra.mxu1 %v314_v54 }
  0x60   :  { %4635 = vmatpush3.msra.mxu0 %v161_v11  ;;  %368 = vmatprep.subr.mxu1 %v313_v55 }
  0x61   :  { %4636 = vmatprep.subr.mxu0 %v160_v12  ;;  %369 = vmatpush1.msra.mxu1 %v312_v56 }
  0x62   :  { %4637 = vmatpush3.msra.mxu0 %v160_v12  ;;  %370 = vmatprep.subr.mxu1 %v311_v57 }
  0x63   :  { %4638 = vmatprep.subr.mxu0 %v159_v13  ;;  %371 = vmatpush1.msra.mxu1 %v310_v58 }
  0x64   :  { %4639 = vmatpush3.msra.mxu0 %v159_v13  ;;  %372 = vmatprep.subr.mxu1 %v309_v59 }
  0x65   :  { %4640 = vmatprep.subr.mxu0 %v158_v14  ;;  %373 = vmatpush1.msra.mxu1 %v308_v60 }
  0x66   :  { %4641 = vmatpush3.msra.mxu0 %v158_v14  ;;  %4649 = vmatprep.subr.mxu1 %v5272_v1  ;;  %v324_v14 = vld [vmem:[%s6308_s26] sm:$0x3] }
  0x67   :  { %4642 = vmatprep.subr.mxu0 %v157_v15 }
  0x68   :  { %4643 = vmatpush3.msra.mxu0 %v157_v15  ;;  %v329_v15 = vrot.slane %v324_v14, %v5479_v24 }
  0x69   :  { %4644 = vmatprep.subr.mxu0 %v156_v16 }
  0x6a   :  { %4645 = vmatpush3.msra.mxu0 %v156_v16 }
  0x6b   :  { %4659 = vmatprep.subr.mxu0 %v5272_v1 }
  0xcb   :  { %v146_v19 = vpop.permute.xlu0 %145 }
  0xcc   :  { %vm150_vm2 = vcmp.eq.s32.totalorder %v5470_v18, %v146_v19 }
  0xcd   :  { %v4305_v20 = vsel %vm150_vm2, 1.0, %v5272_v1 }
  0xce   :  { %4646 = vmatprep.mubr.msk.f32.mxu0 %vm176_vm1, %v4305_v20 }
  0xcf   :  { %v149_v21 = vpop.permute.xlu0 %148 }
  0xd0   :  { %vm151_vm3 = vcmp.eq.s32.totalorder %v5470_v18, %v149_v21 }
  0xd1   :  { %v4306_v22 = vsel %vm151_vm3, 1.0, %v5272_v1 }
  0xd2   :  { %4647 = vmatmul.mubr.msk.f32.vlgmr.msra.gmra.mxu0 %vm176_vm1, %v4306_v22  ;;  %v332_v22 = vsub.s32 1, %v5476_v23 }
  0xd3   :  { %4661 = vmatprep.mubr.msk.f32.mxu0 %vm5273_vm5, %v5272_v1 }
  0xd4   :  { %v5569_v25 = vrot.slane %v324_v14, %v332_v22 }
 0x192   :  { %v4648_v28 = vpop.f32.mrf.mxu0 }
 0x193   :  { %v259_v32 = vadd.f32 %v4648_v28, %v175_v29 }
 0x194   :  { %v253_v30 = vpop.f32.mrf.mxu0 }
 0x195   :  { %v254_v31 = vadd.f32 %v253_v30, %v175_v29  ;;  %v268_v34 = vsel %vm264_vm4, %v259_v32, 0.0 }
 0x197   :  { %v265_v33 = vsel %vm264_vm4, %v254_v31, 0.0 }
 0x198   :  { %266 = vadd.xlane.f32.xlu1 %v265_v33 }
 0x19c   :  { %269 = vadd.xlane.f32.xlu1 %v268_v34 }
 0x221   :  { %v267_v35 = vpop.xlane.xlu1 %266 }
 0x222   :  { %v272_v36 = vmul.f32 0.015625, %v267_v35 }
 0x224   :  { %v274_v37 = vsub.f32 %v254_v31, %v272_v36 }
 0x225   :  { %v270_v38 = vpop.xlane.xlu1 %269 }
 0x226   :  { %v273_v39 = vmul.f32 0.015625, %v270_v38  ;;  %v276_v40 = vmul.f32 %v274_v37, %v274_v37 }
 0x228   :  { %v275_v41 = vsub.f32 %v259_v32, %v273_v39  ;;  %v278_v42 = vsel %vm264_vm4, %v276_v40, 0.0 }
 0x229   :  { %279 = vadd.xlane.f32.xlu0 %v278_v42 }
 0x22a   :  { %v277_v43 = vmul.f32 %v275_v41, %v275_v41 }
 0x22c   :  { %v281_v44 = vsel %vm264_vm4, %v277_v43, 0.0 }
 0x22d   :  { %282 = vadd.xlane.f32.xlu1 %v281_v44 }
 0x2b2   :  { %v280_v61 = vpop.xlane.xlu0 %279 }
 0x2b3   :  { %v284_v62 = vmul.f32 0.015625, %v280_v61 }
 0x2b5   :  { %v286_v63 = vadd.f32 1e-12, %v284_v62 }
 0x2b6   :  { %v283_v0 = vpop.xlane.xlu1 %282 }
 0x2b7   :  { %5016 = vrsqrt.f32 %v286_v63  ;;  %v285_v2 = vmul.f32 0.015625, %v283_v0 }
 0x2b9   :  { %v287_v3 = vadd.f32 1e-12, %v285_v2 }
 0x2bb   :  { %5018 = vrsqrt.f32 %v287_v3 }
 0x2c4   :  { %v5017_v4 = vpop.eup %5016 }
 0x2c5   :  { %v290_v6 = vmul.f32 %v5017_v4, %v274_v37 }
 0x2c7   :  { %v298_v8 = vmul.f32 %v4310_v5, %v290_v6 }
 0x2c8   :  { %v5019_v9 = vpop.eup %5018 }
 0x2c9   :  { %v5535_v10 = vadd.f32 %v4311_v7, %v298_v8  ;;  %v291_v11 = vmul.f32 %v5019_v9, %v275_v41 }
 0x2cb   :  { %4312 = vmatmul.mubr.msk.f32.vlgmr.msra.gmra.mxu1 %vm264_vm4, %v5535_v10  ;;  %v299_v12 = vmul.f32 %v4310_v5, %v291_v11 }
 0x2cc   :  { %412 = vmatprep.mubr.f32.mxu1 %v5272_v1 }
 0x2cd   :  { %v5540_v13 = vadd.f32 %v4311_v7, %v299_v12 }
 0x2cf   :  { %4313 = vmatmul.mubr.msk.f32.gmra.mxu1 %vm264_vm4, %v5540_v13 }
 0x2d0   :  { %4651 = vmatprep.mubr.msk.f32.mxu1 %vm5273_vm5, %v5272_v1 }
 0x38b   :  { %v408_v16 = vpop.f32.mrf.mxu1 }
 0x38c   :  { %v409_v17 = vadd.f32 %v408_v16, %v329_v15 }
 0x38d   :  { %v410_v19 = vpop.f32.mrf.mxu1 }
 0x38e   :  { %750 = vrot.lane.b32.xlu0 %v409_v17, %s5274_s27  ;;  %420 = vrot.lane.b32.xlu1 %v409_v17, %s5275_s30  ;;  %v5574_v27 = vadd.f32 %v410_v19, %v5569_v25 }
 0x38f   :  { %v414_v20 = vpop.f32.mrf.mxu1 }
 0x390   :  { %v415_v21 = vadd.f32 %v414_v20, %v329_v15 }
 0x391   :  { %v5613_v41 = vpop.f32.mrf.mxu1 }
 0x392   :  { %585 = vrot.lane.b32.xlu1 %v409_v17, %s6288_s25  ;;  %1430 = vrot.lane.b32.xlu0 %v415_v21, %s5277_s8 }
 0x396   :  { %583 = vrot.lane.b32.xlu1 %v409_v17, %s5278_s4  ;;  %1596 = vrot.lane.b32.xlu0 %v415_v21, %s6290_s5 }
 0x39a   :  { %752 = vrot.lane.b32.xlu1 %v409_v17, %s5277_s8 }
 0x39e   :  { %918 = vrot.lane.b32.xlu1 %v409_v17, %s6290_s5 }
 0x3a2   :  { %916 = vrot.lane.b32.xlu1 %v409_v17, %s6286_s6 }
 0x3a6   :  { %1100 = vrot.lane.b32.xlu1 %v415_v21, %s5275_s30 }
 0x3aa   :  { %1263 = vrot.lane.b32.xlu1 %v415_v21, %s6288_s25 }
 0x3ae   :  { %1261 = vrot.lane.b32.xlu1 %v415_v21, %s5278_s4 }
 0x3b2   :  { %1428 = vrot.lane.b32.xlu1 %v415_v21, %s5274_s27 }
 0x3b6   :  { %1594 = vrot.lane.b32.xlu1 %v415_v21, %s6286_s6 }
 0x400   :  { %v421_v26 = vpop.permute.xlu1 %420  ;;  %v751_v31 = vpop.permute.xlu0 %750 }
 0x401   :  { %4650 = vmatpush3.xpose.msk.msra.mxu1 %vm422_vm6, %v421_v26 }
 0x402   :  { %4654 = vmatprep.subr.mxu1 %v5272_v1 }
 0x404   :  { %4652 = vmatmul.mubr.msk.f32.vlgmr.msra.gmra.mxu1 %vm422_vm6, %v409_v17  ;;  %v586_v28 = vpop.permute.xlu1 %585  ;;  %v1431_v36 = vpop.permute.xlu0 %1430 }
 0x405   :  { %4655 = vmatpush3.msra.mxu1 %v5574_v27  ;;  %4660 = vmatpush3.xpose.msk.msra.mxu0 %vm422_vm6, %v586_v28 }
 0x406   :  { %4669 = vmatprep.subr.mxu0 %v5272_v1  ;;  %4656 = vmatprep.mubr.msk.f32.mxu1 %vm5273_vm5, %v5272_v1 }
 0x407   :  { %4664 = vmatprep.subr.mxu1 %v5272_v1 }
 0x408   :  { %v584_v29 = vpop.permute.xlu1 %583  ;;  %v1597_v39 = vpop.permute.xlu0 %1596 }
 0x409   :  { %4662 = vmatmul.mubr.msk.f32.vlgmr.msra.gmra.mxu0 %vm422_vm6, %v584_v29 }
 0x40a   :  { %4671 = vmatprep.mubr.msk.f32.mxu0 %vm5273_vm5, %v5272_v1 }
 0x40c   :  { %v753_v30 = vpop.permute.xlu1 %752 }
 0x40d   :  { %4670 = vmatpush3.xpose.msk.msra.mxu0 %vm422_vm6, %v753_v30 }
 0x40e   :  { %4679 = vmatprep.subr.mxu0 %v5272_v1 }
 0x410   :  { %4672 = vmatmul.mubr.msk.f32.vlgmr.msra.gmra.mxu0 %vm422_vm6, %v751_v31  ;;  %v919_v32 = vpop.permute.xlu1 %918 }
 0x411   :  { %4680 = vmatpush3.xpose.msk.msra.mxu0 %vm422_vm6, %v919_v32  ;;  %4681 = vmatprep.mubr.msk.f32.mxu0 %vm5273_vm5, %v5272_v1 }
 0x412   :  { %4689 = vmatprep.subr.mxu0 %v5272_v1 }
 0x414   :  { %v917_v33 = vpop.permute.xlu1 %916 }
 0x415   :  { %4682 = vmatmul.mubr.msk.f32.vlgmr.msra.gmra.mxu0 %vm422_vm6, %v917_v33 }
 0x416   :  { %4691 = vmatprep.mubr.msk.f32.mxu0 %vm5273_vm5, %v5272_v1 }
 0x418   :  { %v1101_v34 = vpop.permute.xlu1 %1100 }
 0x419   :  { %4690 = vmatpush3.xpose.msk.msra.mxu0 %vm422_vm6, %v1101_v34 }
 0x41a   :  { %4699 = vmatprep.subr.mxu0 %v5272_v1 }
 0x41c   :  { %4692 = vmatmul.mubr.msk.f32.vlgmr.msra.gmra.mxu0 %vm422_vm6, %v415_v21  ;;  %v1264_v35 = vpop.permute.xlu1 %1263 }
 0x41d   :  { %4700 = vmatpush3.xpose.msk.msra.mxu0 %vm422_vm6, %v1264_v35  ;;  %4701 = vmatprep.mubr.msk.f32.mxu0 %vm5273_vm5, %v5272_v1 }
 0x41e   :  { %4709 = vmatprep.subr.mxu0 %v5272_v1 }
 0x420   :  { %v1262_v37 = vpop.permute.xlu1 %1261 }
 0x421   :  { %4702 = vmatmul.mubr.msk.f32.vlgmr.msra.gmra.mxu0 %vm422_vm6, %v1262_v37 }
 0x422   :  { %4710 = vmatpush3.xpose.msk.msra.mxu0 %vm422_vm6, %v1431_v36  ;;  %4711 = vmatprep.mubr.msk.f32.mxu0 %vm5273_vm5, %v5272_v1 }
 0x423   :  { %4719 = vmatprep.subr.mxu0 %v5272_v1 }
 0x424   :  { %v1429_v38 = vpop.permute.xlu1 %1428 }
 0x425   :  { %4712 = vmatmul.mubr.msk.f32.vlgmr.msra.gmra.mxu0 %vm422_vm6, %v1429_v38 }
 0x426   :  { %4720 = vmatpush3.xpose.msk.msra.mxu0 %vm422_vm6, %v1597_v39  ;;  %4721 = vmatprep.mubr.msk.f32.mxu0 %vm5273_vm5, %v5272_v1 }
 0x428   :  { %v1595_v40 = vpop.permute.xlu1 %1594 }
 0x429   :  { %4722 = vmatmul.mubr.msk.f32.vlgmr.msra.gmra.mxu0 %vm422_vm6, %v1595_v40 }
 0x4c4   :  { %v493_v42 = vpop.f32.mrf.mxu1 }
 0x4c5   :  { %v497_v43 = vmul.f32 0.25, %v493_v42 }
 0x4c6   :  { %v4653_v44 = vpop.f32.mrf.mxu1 }
 0x4c7   :  { %v499_v45 = vsel %vm498_vm7, %v497_v43, -inf }
 0x4c8   :  { %500 = vmax.xlane.f32.xlu0 %v499_v45 }
 0x4c9   :  { %v657_v46 = vpop.f32.mrf.mxu0 }
 0x4ca   :  { %v661_v47 = vmul.f32 0.25, %v657_v46 }
 0x4cb   :  { %v4663_v48 = vpop.f32.mrf.mxu0 }
 0x4cc   :  { %v662_v49 = vsel %vm498_vm7, %v661_v47, -inf }
 0x4cd   :  { %663 = vmax.xlane.f32.xlu1 %v662_v49  ;;  %v417_v49 = vadd.f32 %v5613_v41, %v5569_v25 }
 0x4d0   :  { %v824_v50 = vpop.f32.mrf.mxu0 }
 0x4d1   :  { %v828_v51 = vmul.f32 0.25, %v824_v50 }
 0x4d2   :  { %v4673_v52 = vpop.f32.mrf.mxu0 }
 0x4d3   :  { %v829_v53 = vsel %vm498_vm7, %v828_v51, -inf }
 0x4d4   :  { %830 = vmax.xlane.f32.xlu0 %v829_v53 }
 0x4d5   :  { %v990_v54 = vpop.f32.mrf.mxu0 }
 0x4d6   :  { %v994_v55 = vmul.f32 0.25, %v990_v54 }
 0x4d7   :  { %v4683_v56 = vpop.f32.mrf.mxu0 }
 0x4d8   :  { %v995_v57 = vsel %vm498_vm7, %v994_v55, -inf }
 0x4d9   :  { %996 = vmax.xlane.f32.xlu0 %v995_v57 }
 0x4dc   :  { %v1172_v58 = vpop.f32.mrf.mxu0 }
 0x4dd   :  { %v5619_v59 = vmul.f32 0.25, %v1172_v58 }
 0x4de   :  { %v4693_v60 = vpop.f32.mrf.mxu0 }
 0x4df   :  { %v1177_v61 = vsel %vm498_vm7, %v5619_v59, -inf }
 0x4e0   :  { %1178 = vmax.xlane.f32.xlu1 %v1177_v61 }
 0x4e1   :  { %v1335_v62 = vpop.f32.mrf.mxu0 }
 0x4e2   :  { %v1339_v63 = vmul.f32 0.25, %v1335_v62 }
 0x4e3   :  { %v4703_v0 = vpop.f32.mrf.mxu0 }
 0x4e4   :  { %v1340_v2 = vsel %vm498_vm7, %v1339_v63, -inf }
 0x4e5   :  { %1341 = vmax.xlane.f32.xlu0 %v1340_v2  ;;  %v1502_v3 = vpop.f32.mrf.mxu0 }
 0x4e6   :  { %v5624_v4 = vmul.f32 0.25, %v1502_v3 }
 0x4e7   :  { %v4713_v5 = vpop.f32.mrf.mxu0 }
 0x4e8   :  { %v1507_v6 = vsel %vm498_vm7, %v5624_v4, -inf }
 0x4e9   :  { %1508 = vmax.xlane.f32.xlu1 %v1507_v6  ;;  %v1668_v7 = vpop.f32.mrf.mxu0 }
 0x4ea   :  { %v1672_v8 = vmul.f32 0.25, %v1668_v7 }
 0x4eb   :  { %v4723_v9 = vpop.f32.mrf.mxu0 }
 0x4ec   :  { %v1673_v11 = vsel %vm498_vm7, %v1672_v8, -inf }
 0x4ed   :  { %1674 = vmax.xlane.f32.xlu0 %v1673_v11 }
 0x4fa   :  { %674 = vrot.lane.b32.xlu1 %v5574_v27, %s5278_s4 }
 0x551   :  { %v501_v12 = vpop.xlane.xlu0 %500 }
 0x552   :  { %v502_v14 = vsub.f32 %v497_v43, %v501_v12 }
 0x554   :  { %v503_v15 = vmul.f32 1.442695, %v502_v14 }
 0x556   :  { %5020 = vpow2.f32 %v503_v15  ;;  %v664_v16 = vpop.xlane.xlu1 %663 }
 0x557   :  { %v665_v17 = vsub.f32 %v661_v47, %v664_v16 }
 0x559   :  { %v666_v19 = vmul.f32 1.442695, %v665_v17 }
 0x55b   :  { %5022 = vpow2.f32 %v666_v19 }
 0x55d   :  { %v831_v29 = vpop.xlane.xlu0 %830 }
 0x55e   :  { %v832_v30 = vsub.f32 %v828_v51, %v831_v29 }
 0x560   :  { %v833_v32 = vmul.f32 1.442695, %v832_v30 }
 0x562   :  { %v997_v31 = vpop.xlane.xlu0 %996  ;;  %5024 = vpow2.f32 %v833_v32 }
 0x563   :  { %v5021_v20 = vpop.eup %5020  ;;  %v998_v33 = vsub.f32 %v994_v55, %v997_v31 }
 0x564   :  { %v505_v21 = vsel %vm498_vm7, %v5021_v20, 0.0 }
 0x565   :  { %506 = vadd.xlane.f32.xlu1 %v505_v21  ;;  %v999_v35 = vmul.f32 1.442695, %v998_v33 }
 0x567   :  { %5026 = vpow2.f32 %v999_v35 }
 0x568   :  { %v5632_v26 = vpop.eup %5022 }
 0x569   :  { %v668_v28 = vsel %vm498_vm7, %v5632_v26, 0.0  ;;  %v1179_v50 = vpop.xlane.xlu1 %1178 }
 0x56a   :  { %669 = vadd.xlane.f32.xlu0 %v668_v28  ;;  %v1180_v51 = vsub.f32 %v5619_v59, %v1179_v50 }
 0x56c   :  { %v1181_v53 = vmul.f32 1.442695, %v1180_v51 }
 0x56e   :  { %v1342_v34 = vpop.xlane.xlu0 %1341 }
 0x56f   :  { %v1343_v36 = vsub.f32 %v1339_v63, %v1342_v34  ;;  %v5025_v42 = vpop.eup %5024 }
 0x570   :  { %v835_v43 = vsel %vm498_vm7, %v5025_v42, 0.0 }
 0x571   :  { %v1344_v38 = vmul.f32 1.442695, %v1343_v36 }
 0x572   :  { %v1509_v52 = vpop.xlane.xlu1 %1508 }
 0x573   :  { %5028 = vpow2.f32 %v1344_v38  ;;  %v1510_v54 = vsub.f32 %v5624_v4, %v1509_v52  ;;  %v1781_v38 = vld [vmem:[%s6266_s9 + $0x30] sm:$0xff] }
 0x575   :  { %v1511_v55 = vmul.f32 1.442695, %v1510_v54 }
 0x576   :  { %1006 = vrot.lane.b32.xlu1 %v5574_v27, %s6286_s6  ;;  %v1675_v37 = vpop.xlane.xlu0 %1674  ;;  %v675_v41 = vpop.permute.xlu1 %674 }
 0x577   :  { %v1676_v39 = vsub.f32 %v1672_v8, %v1675_v37  ;;  %v1782_v37 = vld [vmem:[%s6266_s9 + $0x38] sm:$0xff] }
 0x578   :  { %4729 = vmatprep.subr.mxu0 %v1782_v37 }
 0x579   :  { %v1677_v40 = vmul.f32 1.442695, %v1676_v39  ;;  %4730 = vmatpush3.msra.mxu0 %v1782_v37  ;;  %v1780_v39 = vld [vmem:[%s6266_s9 + $0x28] sm:$0xff] }
 0x57a   :  { %4731 = vmatprep.subr.mxu0 %v1781_v38 }
 0x57b   :  { %5030 = vpow2.f32 %v1677_v40  ;;  %4732 = vmatpush3.msra.mxu0 %v1781_v38  ;;  %v1779_v40 = vld [vmem:[%s6266_s9 + $0x20] sm:$0xff] }
 0x57c   :  { %5032 = vpow2.f32 %v1181_v53  ;;  %4733 = vmatprep.subr.mxu0 %v1780_v39 }
 0x57d   :  { %5034 = vpow2.f32 %v1511_v55  ;;  %4734 = vmatpush3.msra.mxu0 %v1780_v39 }
 0x57e   :  { %4735 = vmatprep.subr.mxu0 %v1779_v40 }
 0x57f   :  { %4736 = vmatpush3.msra.mxu0 %v1779_v40 }
 0x580   :  { %840 = vrot.lane.b32.xlu0 %v5574_v27, %s5274_s27  ;;  %v5027_v27 = vpop.eup %5026 }
 0x581   :  { %v1001_v44 = vsel %vm498_vm7, %v5027_v27, 0.0  ;;  %v5642_v45 = vpop.eup %5028 }
 0x582   :  { %v1346_v46 = vsel %vm498_vm7, %v5642_v45, 0.0 }
 0x588   :  { %v5646_v47 = vpop.eup %5030 }
 0x589   :  { %v1679_v48 = vsel %vm498_vm7, %v5646_v47, 0.0  ;;  %v5033_v56 = vpop.eup %5032 }
 0x58a   :  { %v1183_v57 = vsel %vm498_vm7, %v5033_v56, 0.0  ;;  %v5657_v58 = vpop.eup %5034 }
 0x58b   :  { %v1513_v25 = vsel %vm498_vm7, %v5657_v58, 0.0 }
 0x59a   :  { %836 = vadd.xlane.f32.xlu1 %v835_v43 }
 0x59f   :  { %1002 = vadd.xlane.f32.xlu0 %v1001_v44 }
 0x5a3   :  { %1347 = vadd.xlane.f32.xlu0 %v1346_v46  ;;  %v1777_v46 = vld [vmem:[%s6266_s9 + $0x10] sm:$0xff] }
 0x5a7   :  { %1680 = vadd.xlane.f32.xlu0 %v1679_v48  ;;  %v1775_v48 = vld [vmem:[%s6266_s9] sm:$0xff] }
 0x5ab   :  { %1352 = vrot.lane.b32.xlu1 %v417_v49, %s5278_s4 }
 0x5bd   :  { %1518 = vrot.lane.b32.xlu0 %v417_v49, %s5274_s27 }
 0x5cf   :  { %1184 = vadd.xlane.f32.xlu1 %v1183_v57 }
 0x5d3   :  { %1514 = vadd.xlane.f32.xlu1 %v1513_v25 }
 0x5e4   :  { %1684 = vrot.lane.b32.xlu1 %v417_v49, %s6286_s6 }
 0x5ee   :  { %v507_v59 = vpop.xlane.xlu1 %506 }
 0x5ef   :  { %5036 = vrcp.f32 %v507_v59 }
 0x5f2   :  { %v1007_v3 = vpop.permute.xlu1 %1006 }
 0x5f3   :  { %v670_v60 = vpop.xlane.xlu0 %669 }
 0x5f4   :  { %5038 = vrcp.f32 %v670_v60 }
 0x5f7   :  { %v841_v2 = vpop.permute.xlu0 %840 }
 0x5fc   :  { %v5037_v61 = vpop.eup %5036 }
 0x5fd   :  { %v509_v62 = vmul.f32 %v5037_v61, %v5021_v20 }
 0x5ff   :  { %4657 = vmatmul.mubr.msk.f32.vlgmr.msra.gmra.mxu1 %vm498_vm7, %v509_v62 }
 0x600   :  { %4665 = vmatpush3.msra.mxu1 %v675_v41  ;;  %4666 = vmatprep.mubr.msk.f32.mxu1 %vm5273_vm5, %v5272_v1 }
 0x601   :  { %v5039_v63 = vpop.eup %5038  ;;  %4674 = vmatprep.subr.mxu1 %v5272_v1 }
 0x602   :  { %v672_v0 = vmul.f32 %v5039_v63, %v5632_v26 }
 0x604   :  { %4667 = vmatmul.mubr.msk.f32.vlgmr.msra.gmra.mxu1 %vm498_vm7, %v672_v0 }
 0x605   :  { %4675 = vmatpush3.msra.mxu1 %v841_v2  ;;  %4676 = vmatprep.mubr.msk.f32.mxu1 %vm5273_vm5, %v5272_v1 }
 0x606   :  { %4684 = vmatprep.subr.mxu1 %v5272_v1 }
 0x623   :  { %v837_v4 = vpop.xlane.xlu1 %836 }
 0x624   :  { %5040 = vrcp.f32 %v837_v4  ;;  %v4338_v4 = vld [vmem:[%s6267_s10] ss:$0 sm:$0xff] }
 0x627   :  { %v1353_v11 = vpop.permute.xlu1 %1352 }
 0x628   :  { %v1003_v5 = vpop.xlane.xlu0 %1002 }
 0x629   :  { %5042 = vrcp.f32 %v1003_v5 }
 0x62c   :  { %v1348_v12 = vpop.xlane.xlu0 %1347 }
 0x630   :  { %v1681_v16 = vpop.xlane.xlu0 %1680 }
 0x631   :  { %v5041_v6 = vpop.eup %5040 }
 0x632   :  { %v839_v7 = vmul.f32 %v5041_v6, %v5025_v42 }
 0x634   :  { %4677 = vmatmul.mubr.msk.f32.vlgmr.msra.gmra.mxu1 %vm498_vm7, %v839_v7  ;;  %v1519_v28 = vpop.permute.xlu0 %1518 }
 0x635   :  { %4685 = vmatpush3.msra.mxu1 %v1007_v3  ;;  %4686 = vmatprep.mubr.msk.f32.mxu1 %vm5273_vm5, %v5272_v1 }
 0x636   :  { %v5043_v8 = vpop.eup %5042  ;;  %4694 = vmatprep.subr.mxu1 %v5272_v1 }
 0x637   :  { %v1005_v9 = vmul.f32 %v5043_v8, %v5027_v27 }
 0x639   :  { %4687 = vmatmul.mubr.msk.f32.vlgmr.msra.gmra.mxu1 %vm498_vm7, %v1005_v9 }
 0x63a   :  { %4695 = vmatpush3.msra.mxu1 %v417_v49  ;;  %4696 = vmatprep.mubr.msk.f32.mxu1 %vm5273_vm5, %v5272_v1 }
 0x63b   :  { %4704 = vmatprep.subr.mxu1 %v5272_v1 }
 0x658   :  { %v1185_v14 = vpop.xlane.xlu1 %1184 }
 0x659   :  { %5044 = vrcp.f32 %v1185_v14 }
 0x65a   :  { %5046 = vrcp.f32 %v1348_v12 }
 0x65c   :  { %v1515_v15 = vpop.xlane.xlu1 %1514 }
 0x65d   :  { %5048 = vrcp.f32 %v1515_v15 }
 0x65e   :  { %5050 = vrcp.f32 %v1681_v16 }
 0x660   :  { %v1685_v31 = vpop.permute.xlu1 %1684 }
 0x666   :  { %v5045_v17 = vpop.eup %5044 }
 0x667   :  { %v1187_v19 = vmul.f32 %v5045_v17, %v5033_v56  ;;  %v5047_v20 = vpop.eup %5046 }
 0x668   :  { %v1350_v21 = vmul.f32 %v5047_v20, %v5642_v45  ;;  %v1778_v45 = vld [vmem:[%s6266_s9 + $0x18] sm:$0xff] }
 0x669   :  { %4697 = vmatmul.mubr.msk.f32.vlgmr.msra.gmra.mxu1 %vm498_vm7, %v1187_v19  ;;  %4737 = vmatprep.subr.mxu0 %v1778_v45 }
 0x66a   :  { %4705 = vmatpush3.msra.mxu1 %v1353_v11  ;;  %4706 = vmatprep.mubr.msk.f32.mxu1 %vm5273_vm5, %v5272_v1  ;;  %v5049_v26 = vpop.eup %5048 }
 0x66b   :  { %4714 = vmatprep.subr.mxu1 %v5272_v1  ;;  %v1517_v29 = vmul.f32 %v5049_v26, %v5657_v58  ;;  %v5051_v30 = vpop.eup %5050  ;;  %4738 = vmatpush3.msra.mxu0 %v1778_v45 }
 0x66c   :  { %v1683_v32 = vmul.f32 %v5051_v30, %v5646_v47  ;;  %4739 = vmatprep.subr.mxu0 %v1777_v46  ;;  %v1776_v47 = vld [vmem:[%s6266_s9 + $0x8] sm:$0xff]  ;;  %v1923_v30 = vld [vmem:[%s6270_s13 + $0x30] sm:$0xff] }
 0x66d   :  { %4707 = vmatmul.mubr.msk.f32.vlgmr.msra.gmra.mxu1 %vm498_vm7, %v1350_v21  ;;  %4740 = vmatpush3.msra.mxu0 %v1777_v46  ;;  %v4342_v46 = vld [vmem:[%s6269_s12] ss:$0 sm:$0xff] }
 0x66e   :  { %4715 = vmatpush3.msra.mxu1 %v1519_v28  ;;  %4716 = vmatprep.mubr.msk.f32.mxu1 %vm5273_vm5, %v5272_v1 }
 0x66f   :  { %4724 = vmatprep.subr.mxu1 %v5272_v1  ;;  %4741 = vmatprep.subr.mxu0 %v1776_v47 }
 0x670   :  { %4742 = vmatpush3.msra.mxu0 %v1776_v47 }
 0x671   :  { %4717 = vmatmul.mubr.msk.f32.vlgmr.msra.gmra.mxu1 %vm498_vm7, %v1517_v29  ;;  %4743 = vmatprep.subr.mxu0 %v1775_v48 }
 0x672   :  { %4725 = vmatpush3.msra.mxu1 %v1685_v31  ;;  %4726 = vmatprep.mubr.msk.f32.mxu1 %vm5273_vm5, %v5272_v1  ;;  %v1922_v31 = vld [vmem:[%s6270_s13 + $0x28] sm:$0xff] }
 0x673   :  { %4744 = vmatpush3.msra.mxu0 %v1775_v48 }
 0x675   :  { %4727 = vmatmul.mubr.msk.f32.vlgmr.msra.gmra.mxu1 %vm498_vm7, %v1683_v32  ;;  %v1921_v32 = vld [vmem:[%s6270_s13 + $0x20] sm:$0xff] }
 0x6bf   :  { %v579_v33 = vpop.f32.mrf.mxu1 }
 0x6c1   :  { %v4658_v34 = vpop.f32.mrf.mxu1 }
 0x6c2   :  { %v1919_v34 = vld [vmem:[%s6270_s13 + $0x10] sm:$0xff] }
 0x6c4   :  { %v746_v35 = vpop.f32.mrf.mxu1 }
 0x6c5   :  { %1083 = vrot.lane.b32.xlu0 %v746_v35, %s6290_s5  ;;  %v1918_v35 = vld [vmem:[%s6270_s13 + $0x8] sm:$0xff] }
 0x6c6   :  { %v4668_v36 = vpop.f32.mrf.mxu1 }
 0x6c7   :  { %v1917_v36 = vld [vmem:[%s6270_s13] sm:$0xff] }
 0x6f4   :  { %v912_v42 = vpop.f32.mrf.mxu1 }
 0x6f5   :  { %1087 = vrot.lane.b32.xlu1 %v912_v42, %s5277_s8 }
 0x6f6   :  { %v4678_v43 = vpop.f32.mrf.mxu1 }
 0x6f9   :  { %v1078_v27 = vpop.f32.mrf.mxu1 }
 0x6fa   :  { %1091 = vrot.lane.b32.xlu1 %v1078_v27, %s6288_s25 }
 0x6fb   :  { %v4688_v44 = vpop.f32.mrf.mxu1 }
 0x6fc   :  { %v4341_v44 = vld [vmem:[%s6268_s11] ss:$0 sm:$0xff] }
 0x729   :  { %v1257_v49 = vpop.f32.mrf.mxu1 }
 0x72b   :  { %v4698_v50 = vpop.f32.mrf.mxu1 }
 0x72d   :  { %v1424_v51 = vpop.f32.mrf.mxu1 }
 0x72e   :  { %1761 = vrot.lane.b32.xlu0 %v1424_v51, %s6290_s5 }
 0x72f   :  { %v4708_v52 = vpop.f32.mrf.mxu1 }
 0x731   :  { %v1590_v53 = vpop.f32.mrf.mxu1 }
 0x732   :  { %1765 = vrot.lane.b32.xlu0 %v1590_v53, %s5277_s8  ;;  %v2046_v53 = vld [vmem:[%s6272_s15 + $0x78] sm:$0xff] }
 0x733   :  { %v4718_v54 = vpop.f32.mrf.mxu1  ;;  %4767 = vmatprep.subr.mxu0 %v2046_v53 }
 0x734   :  { %v2045_v54 = vld [vmem:[%s6272_s15 + $0x70] sm:$0xff] }
 0x735   :  { %v1756_v55 = vpop.f32.mrf.mxu1 }
 0x736   :  { %1769 = vrot.lane.b32.xlu1 %v1756_v55, %s6288_s25  ;;  %v2044_v55 = vld [vmem:[%s6272_s15 + $0x68] sm:$0xff] }
 0x737   :  { %v4728_v56 = vpop.f32.mrf.mxu1  ;;  %v1084_v58 = vpop.permute.xlu0 %1083 }
 0x738   :  { %v1094_v25 = vsel %vm422_vm6, %v579_v33, %v1084_v58  ;;  %v1920_v33 = vld [vmem:[%s6270_s13 + $0x18] sm:$0xff]  ;;  %v2043_v56 = vld [vmem:[%s6272_s15 + $0x60] sm:$0xff]  ;;  %v2041_v58 = vld [vmem:[%s6272_s15 + $0x50] sm:$0xff] }
 0x767   :  { %v1088_v57 = vpop.permute.xlu1 %1087 }
 0x768   :  { %v1096_v41 = vsel %vm1095_vm8, %v1094_v25, %v1088_v57  ;;  %v2042_v57 = vld [vmem:[%s6272_s15 + $0x58] sm:$0xff]  ;;  %v2040_v25 = vld [vmem:[%s6272_s15 + $0x48] sm:$0xff] }
 0x76c   :  { %v1092_v59 = vpop.permute.xlu1 %1091 }
 0x76d   :  { %v1098_v60 = vsel %vm1097_vm9, %v1096_v41, %v1092_v59  ;;  %v2039_v41 = vld [vmem:[%s6272_s15 + $0x40] sm:$0xff]  ;;  %v2038_v59 = vld [vmem:[%s6272_s15 + $0x38] sm:$0xff] }
 0x76e   :  { %4745 = vmatprep.mubr.msk.f32.mxu0 %vm264_vm4, %v1098_v60  ;;  %v2037_v60 = vld [vmem:[%s6272_s15 + $0x30] sm:$0xff] }
 0x7a0   :  { %v1762_v61 = vpop.permute.xlu0 %1761 }
 0x7a1   :  { %v1772_v63 = vsel %vm422_vm6, %v1257_v49, %v1762_v61  ;;  %v2036_v61 = vld [vmem:[%s6272_s15 + $0x28] sm:$0xff] }
 0x7a4   :  { %v1766_v62 = vpop.permute.xlu0 %1765 }
 0x7a5   :  { %v1773_v0 = vsel %vm1095_vm8, %v1772_v63, %v1766_v62  ;;  %v2035_v62 = vld [vmem:[%s6272_s15 + $0x20] sm:$0xff]  ;;  %v2034_v63 = vld [vmem:[%s6272_s15 + $0x18] sm:$0xff] }
 0x7a8   :  { %v1770_v2 = vpop.permute.xlu1 %1769 }
 0x7a9   :  { %v1774_v3 = vsel %vm1097_vm9, %v1773_v0, %v1770_v2  ;;  %v2033_v0 = vld [vmem:[%s6272_s15 + $0x10] sm:$0xff]  ;;  %v2032_v2 = vld [vmem:[%s6272_s15 + $0x8] sm:$0xff] }
 0x7aa   :  { %4746 = vmatmul.mubr.msk.f32.vlgmr.msra.gmra.mxu0 %vm264_vm4, %v1774_v3  ;;  %v2031_v3 = vld [vmem:[%s6272_s15] sm:$0xff] }
 0x7ab   :  { %4768 = vmatpush3.msra.mxu0 %v2046_v53  ;;  %v4363_v53 = vld [vmem:[%s6307_s7 + $0xf0] sm:$0xff] }
 0x7ac   :  { %4769 = vmatprep.subr.mxu0 %v2045_v54 }
 0x7ad   :  { %4770 = vmatpush3.msra.mxu0 %v2045_v54  ;;  %v4362_v54 = vld [vmem:[%s6307_s7 + $0xe8] sm:$0xff] }
 0x7ae   :  { %4771 = vmatprep.subr.mxu0 %v2044_v55 }
 0x7af   :  { %4772 = vmatpush3.msra.mxu0 %v2044_v55  ;;  %v4361_v55 = vld [vmem:[%s6307_s7 + $0xe0] sm:$0xff] }
 0x7b0   :  { %4773 = vmatprep.subr.mxu0 %v2043_v56 }
 0x7b1   :  { %4774 = vmatpush3.msra.mxu0 %v2043_v56  ;;  %v4360_v56 = vld [vmem:[%s6307_s7 + $0xd8] sm:$0xff] }
 0x7b2   :  { %4775 = vmatprep.subr.mxu0 %v2042_v57 }
 0x7b3   :  { %4776 = vmatpush3.msra.mxu0 %v2042_v57  ;;  %v4359_v57 = vld [vmem:[%s6307_s7 + $0xd0] sm:$0xff] }
 0x7b4   :  { %4777 = vmatprep.subr.mxu0 %v2041_v58 }
 0x7b5   :  { %4778 = vmatpush3.msra.mxu0 %v2041_v58  ;;  %v4358_v58 = vld [vmem:[%s6307_s7 + $0xc8] sm:$0xff] }
 0x7b6   :  { %4779 = vmatprep.subr.mxu0 %v2040_v25 }
 0x7b7   :  { %4780 = vmatpush3.msra.mxu0 %v2040_v25  ;;  %v4357_v25 = vld [vmem:[%s6307_s7 + $0xc0] sm:$0xff] }
 0x7b8   :  { %4781 = vmatprep.subr.mxu0 %v2039_v41 }
 0x7b9   :  { %4782 = vmatpush3.msra.mxu0 %v2039_v41  ;;  %v4356_v41 = vld [vmem:[%s6307_s7 + $0xb8] sm:$0xff] }
 0x7ba   :  { %4783 = vmatprep.subr.mxu0 %v2038_v59 }
 0x7bb   :  { %4784 = vmatpush3.msra.mxu0 %v2038_v59  ;;  %v4355_v59 = vld [vmem:[%s6307_s7 + $0xb0] sm:$0xff] }
 0x7bc   :  { %4785 = vmatprep.subr.mxu0 %v2037_v60 }
 0x7bd   :  { %4786 = vmatpush3.msra.mxu0 %v2037_v60  ;;  %v4354_v60 = vld [vmem:[%s6307_s7 + $0xa8] sm:$0xff] }
 0x7be   :  { %4787 = vmatprep.subr.mxu0 %v2036_v61 }
 0x7bf   :  { %4788 = vmatpush3.msra.mxu0 %v2036_v61  ;;  %v4353_v61 = vld [vmem:[%s6307_s7 + $0xa0] sm:$0xff] }
 0x7c0   :  { %4789 = vmatprep.subr.mxu0 %v2035_v62 }
 0x7c1   :  { %4790 = vmatpush3.msra.mxu0 %v2035_v62  ;;  %v4352_v62 = vld [vmem:[%s6307_s7 + $0x98] sm:$0xff] }
 0x7c2   :  { %4791 = vmatprep.subr.mxu0 %v2034_v63 }
 0x7c3   :  { %4792 = vmatpush3.msra.mxu0 %v2034_v63  ;;  %v4351_v63 = vld [vmem:[%s6307_s7 + $0x90] sm:$0xff] }
 0x7c4   :  { %4793 = vmatprep.subr.mxu0 %v2033_v0 }
 0x7c5   :  { %4794 = vmatpush3.msra.mxu0 %v2033_v0  ;;  %v4350_v0 = vld [vmem:[%s6307_s7 + $0x88] sm:$0xff] }
 0x7c6   :  { %4795 = vmatprep.subr.mxu0 %v2032_v2 }
 0x7c7   :  { %4796 = vmatpush3.msra.mxu0 %v2032_v2  ;;  %v4349_v2 = vld [vmem:[%s6307_s7 + $0x80] sm:$0xff] }
 0x7c8   :  { %4797 = vmatprep.subr.mxu0 %v2031_v3 }
 0x7c9   :  { %4798 = vmatpush3.msra.mxu0 %v2031_v3 }
 0x7ca   :  { %4817 = vmatprep.subr.mxu0 %v5272_v1 }
 0x86a   :  { %v4747_v5 = vpop.f32.mrf.mxu0 }
 0x86b   :  { %v1868_v6 = vadd.f32 %v4747_v5, %v4338_v4 }
 0x86c   :  { %v1862_v7 = vpop.f32.mrf.mxu0 }
 0x86d   :  { %v1863_v8 = vadd.f32 %v4338_v4, %v1862_v7  ;;  %v1872_v9 = vadd.f32 %v1868_v6, %v5540_v13  ;;  %v4343_v4 = vld [vmem:[%s6271_s14] ss:$0 sm:$0xff] }
 0x86f   :  { %v1878_v11 = vsel %vm264_vm4, %v1872_v9, 0.0  ;;  %v1871_v12 = vadd.f32 %v1863_v8, %v5535_v10  ;;  %v1924_v10 = vld [vmem:[%s6270_s13 + $0x38] sm:$0xff] }
 0x870   :  { %1879 = vadd.xlane.f32.xlu1 %v1878_v11  ;;  %4748 = vmatprep.subr.mxu1 %v1924_v10 }
 0x871   :  { %v1875_v14 = vsel %vm264_vm4, %v1871_v12, 0.0  ;;  %4749 = vmatpush3.msra.mxu1 %v1924_v10 }
 0x872   :  { %1876 = vadd.xlane.f32.xlu0 %v1875_v14  ;;  %4750 = vmatprep.subr.mxu1 %v1923_v30 }
 0x873   :  { %4751 = vmatpush3.msra.mxu1 %v1923_v30 }
 0x874   :  { %4752 = vmatprep.subr.mxu1 %v1922_v31 }
 0x875   :  { %4753 = vmatpush3.msra.mxu1 %v1922_v31 }
 0x876   :  { %4754 = vmatprep.subr.mxu1 %v1921_v32 }
 0x877   :  { %4755 = vmatpush3.msra.mxu1 %v1921_v32 }
 0x878   :  { %4756 = vmatprep.subr.mxu1 %v1920_v33 }
 0x879   :  { %4757 = vmatpush3.msra.mxu1 %v1920_v33 }
 0x87a   :  { %4758 = vmatprep.subr.mxu1 %v1919_v34 }
 0x87b   :  { %4759 = vmatpush3.msra.mxu1 %v1919_v34  ;;  %v4346_v34 = vld [vmem:[%s6273_s16] ss:$0 sm:$0xff] }
 0x87c   :  { %4760 = vmatprep.subr.mxu1 %v1918_v35 }
 0x87d   :  { %4761 = vmatpush3.msra.mxu1 %v1918_v35 }
 0x87e   :  { %4762 = vmatprep.subr.mxu1 %v1917_v36 }
 0x87f   :  { %4763 = vmatpush3.msra.mxu1 %v1917_v36 }
 0x8f9   :  { %v1880_v15 = vpop.xlane.xlu1 %1879 }
 0x8fa   :  { %v1882_v16 = vmul.f32 0.015625, %v1880_v15 }
 0x8fb   :  { %v1877_v17 = vpop.xlane.xlu0 %1876 }
 0x8fc   :  { %v1881_v19 = vmul.f32 0.015625, %v1877_v17  ;;  %v1884_v20 = vsub.f32 %v1872_v9, %v1882_v16 }
 0x8fe   :  { %v1883_v21 = vsub.f32 %v1871_v12, %v1881_v19  ;;  %v1886_v29 = vmul.f32 %v1884_v20, %v1884_v20 }
 0x900   :  { %v1885_v26 = vmul.f32 %v1883_v21, %v1883_v21  ;;  %v1890_v13 = vsel %vm264_vm4, %v1886_v29, 0.0 }
 0x902   :  { %v1887_v28 = vsel %vm264_vm4, %v1885_v26, 0.0 }
 0x903   :  { %1888 = vadd.xlane.f32.xlu0 %v1887_v28 }
 0x907   :  { %1891 = vadd.xlane.f32.xlu0 %v1890_v13 }
 0x98c   :  { %v1889_v37 = vpop.xlane.xlu0 %1888 }
 0x98d   :  { %v1893_v38 = vmul.f32 0.015625, %v1889_v37 }
 0x98f   :  { %v1895_v39 = vadd.f32 1e-12, %v1893_v38 }
 0x990   :  { %v1892_v40 = vpop.xlane.xlu0 %1891 }
 0x991   :  { %5052 = vrsqrt.f32 %v1895_v39  ;;  %v1894_v42 = vmul.f32 0.015625, %v1892_v40 }
 0x993   :  { %v1896_v43 = vadd.f32 1e-12, %v1894_v42 }
 0x995   :  { %5054 = vrsqrt.f32 %v1896_v43 }
 0x99e   :  { %v5053_v27 = vpop.eup %5052 }
 0x99f   :  { %v1899_v45 = vmul.f32 %v5053_v27, %v1883_v21 }
 0x9a1   :  { %v1907_v47 = vmul.f32 %v4341_v44, %v1899_v45 }
 0x9a2   :  { %v5055_v48 = vpop.eup %5054 }
 0x9a3   :  { %v1900_v49 = vmul.f32 %v5055_v48, %v1884_v20  ;;  %v5771_v50 = vadd.f32 %v4342_v46, %v1907_v47 }
 0x9a5   :  { %v1908_v51 = vmul.f32 %v4341_v44, %v1900_v49  ;;  %4764 = vmatprep.mubr.msk.f32.mxu1 %vm264_vm4, %v5771_v50 }
 0x9a7   :  { %v5775_v52 = vadd.f32 %v4342_v46, %v1908_v51 }
 0x9a9   :  { %4765 = vmatmul.mubr.msk.f32.vlgmr.msra.gmra.mxu1 %vm264_vm4, %v5775_v52 }
 0x9aa   :  { %2275 = vmatprep.mubr.f32.mxu1 %v5272_v1 }
 0xa69   :  { %v4766_v5 = vpop.f32.mrf.mxu1 }
 0xa6a   :  { %v2010_v6 = vadd.f32 %v4766_v5, %v4343_v4 }
 0xa6b   :  { %v2004_v7 = vpop.f32.mrf.mxu1 }
 0xa6c   :  { %v2014_v8 = vmul.f32 %v2010_v6, %v2010_v6  ;;  %v2005_v9 = vadd.f32 %v4343_v4, %v2004_v7 }
 0xa6e   :  { %v2016_v11 = vmul.f32 %v2014_v8, %v2010_v6  ;;  %v2013_v12 = vmul.f32 %v2005_v9, %v2005_v9 }
 0xa70   :  { %v2018_v14 = vmul.f32 0.044715, %v2016_v11  ;;  %v2015_v15 = vmul.f32 %v2013_v12, %v2005_v9  ;;  %v4347_v11 = vld [vmem:[%s6274_s17] ss:$0 sm:$0xff] }
 0xa72   :  { %v2020_v16 = vadd.f32 %v2018_v14, %v2010_v6  ;;  %v2017_v17 = vmul.f32 0.044715, %v2015_v15  ;;  %v4348_v14 = vld [vmem:[%s6275_s18] ss:$0 sm:$0xff] }
 0xa74   :  { %v2022_v19 = vmul.f32 0.7978846, %v2020_v16  ;;  %v2019_v20 = vadd.f32 %v2017_v17, %v2005_v9 }
 0xa76   :  { %5056 = vtanh.f32 %v2022_v19  ;;  %v2021_v21 = vmul.f32 0.7978846, %v2019_v20 }
 0xa78   :  { %5058 = vtanh.f32 %v2021_v21 }
 0xa83   :  { %v5057_v26 = vpop.eup %5056 }
 0xa84   :  { %v2026_v28 = vadd.f32 1.0, %v5057_v26  ;;  %v4365_v26 = vld [vmem:[%s6308_s26 + $0x2] sm:$0x3]  ;;  %s6310_s26 = smov 80  }
 0xa85   :  { %v5059_v29 = vpop.eup %5058 }
 0xa86   :  { %v2025_v13 = vadd.f32 1.0, %v5059_v29  ;;  %v2028_v10 = vmul.f32 0.5, %v2026_v28  ;;  %v2198_v28 = vrot.slane %v4365_v26, %v5479_v24  ;;  %v5924_v24 = vrot.slane %v4365_v26, %v332_v22 }
 0xa88   :  { %v2027_v30 = vmul.f32 0.5, %v2025_v13  ;;  %v2030_v32 = vmul.f32 %v2028_v10, %v2010_v6 }
 0xa8a   :  { %v2029_v31 = vmul.f32 %v2027_v30, %v2005_v9 }
 0xa8c   :  { %4799 = vmatprep.mubr.f32.mxu0 %v2029_v31 }
 0xa8d   :  { %4800 = vmatmul.mubr.f32.vlgmr.msra.gmra.mxu0 %v2030_v32 }
 0xa8e   :  { %4819 = vmatprep.mubr.msk.f32.mxu0 %vm5273_vm5, %v5272_v1 }
 0xb4d   :  { %v4801_v33 = vpop.f32.mrf.mxu0 }
 0xb4e   :  { %v2126_v36 = vadd.f32 %v4801_v33, %v4346_v34 }
 0xb4f   :  { %v2120_v35 = vpop.f32.mrf.mxu0 }
 0xb50   :  { %v2121_v37 = vadd.f32 %v4346_v34, %v2120_v35  ;;  %v2130_v40 = vadd.f32 %v2126_v36, %v5775_v52  ;;  %v4364_v52 = vld [vmem:[%s6307_s7 + $0xf8] sm:$0xff] }
 0xb51   :  { %2227 = vmatprep.subr.mxu1 %v4364_v52 }
 0xb52   :  { %v2129_v38 = vadd.f32 %v2121_v37, %v5771_v50  ;;  %v2136_v42 = vsel %vm264_vm4, %v2130_v40, 0.0  ;;  %2228 = vmatpush1.msra.mxu1 %v4363_v53 }
 0xb53   :  { %2229 = vmatprep.subr.mxu1 %v4362_v54 }
 0xb54   :  { %v2133_v39 = vsel %vm264_vm4, %v2129_v38, 0.0  ;;  %2230 = vmatpush1.msra.mxu1 %v4361_v55 }
 0xb55   :  { %2134 = vadd.xlane.f32.xlu1 %v2133_v39  ;;  %2231 = vmatprep.subr.mxu1 %v4360_v56 }
 0xb56   :  { %2232 = vmatpush1.msra.mxu1 %v4359_v57 }
 0xb57   :  { %2233 = vmatprep.subr.mxu1 %v4358_v58 }
 0xb58   :  { %2234 = vmatpush1.msra.mxu1 %v4357_v25 }
 0xb59   :  { %2137 = vadd.xlane.f32.xlu1 %v2136_v42  ;;  %2235 = vmatprep.subr.mxu1 %v4356_v41 }
 0xb5a   :  { %2236 = vmatpush1.msra.mxu1 %v4355_v59 }
 0xb5b   :  { %2237 = vmatprep.subr.mxu1 %v4354_v60 }
 0xb5c   :  { %2238 = vmatpush1.msra.mxu1 %v4353_v61 }
 0xb5d   :  { %2239 = vmatprep.subr.mxu1 %v4352_v62 }
 0xb5e   :  { %2240 = vmatpush1.msra.mxu1 %v4351_v63 }
 0xb5f   :  { %2241 = vmatprep.subr.mxu1 %v4350_v0 }
 0xb60   :  { %2242 = vmatpush1.msra.mxu1 %v4349_v2 }
 0xb61   :  { %4802 = vmatprep.subr.mxu1 %v5272_v1 }
 0xbde   :  { %v2135_v43 = vpop.xlane.xlu1 %2134 }
 0xbdf   :  { %v2139_v27 = vmul.f32 0.015625, %v2135_v43 }
 0xbe1   :  { %v2141_v44 = vsub.f32 %v2129_v38, %v2139_v27 }
 0xbe2   :  { %v2138_v45 = vpop.xlane.xlu1 %2137 }
 0xbe3   :  { %v2140_v46 = vmul.f32 0.015625, %v2138_v45  ;;  %v2143_v47 = vmul.f32 %v2141_v44, %v2141_v44 }
 0xbe5   :  { %v2142_v48 = vsub.f32 %v2130_v40, %v2140_v46  ;;  %v2145_v49 = vsel %vm264_vm4, %v2143_v47, 0.0 }
 0xbe6   :  { %2146 = vadd.xlane.f32.xlu0 %v2145_v49 }
 0xbe7   :  { %v2144_v51 = vmul.f32 %v2142_v48, %v2142_v48 }
 0xbe9   :  { %v2148_v50 = vsel %vm264_vm4, %v2144_v51, 0.0 }
 0xbea   :  { %2149 = vadd.xlane.f32.xlu0 %v2148_v50 }
 0xc6f   :  { %v2147_v3 = vpop.xlane.xlu0 %2146 }
 0xc70   :  { %v2151_v4 = vmul.f32 0.015625, %v2147_v3 }
 0xc72   :  { %v2153_v5 = vadd.f32 1e-12, %v2151_v4 }
 0xc73   :  { %v2150_v6 = vpop.xlane.xlu0 %2149 }
 0xc74   :  { %5060 = vrsqrt.f32 %v2153_v5  ;;  %v2152_v7 = vmul.f32 0.015625, %v2150_v6 }
 0xc76   :  { %v2154_v8 = vadd.f32 1e-12, %v2152_v7 }
 0xc78   :  { %5062 = vrsqrt.f32 %v2154_v8 }
 0xc81   :  { %v5061_v9 = vpop.eup %5060 }
 0xc82   :  { %v2157_v12 = vmul.f32 %v5061_v9, %v2141_v44 }
 0xc84   :  { %v2165_v15 = vmul.f32 %v4347_v11, %v2157_v12 }
 0xc85   :  { %v5063_v16 = vpop.eup %5062 }
 0xc86   :  { %v5898_v17 = vadd.f32 %v4348_v14, %v2165_v15  ;;  %v2158_v19 = vmul.f32 %v5063_v16, %v2142_v48 }
 0xc88   :  { %4366 = vmatmul.mubr.msk.f32.vlgmr.msra.gmra.mxu1 %vm264_vm4, %v5898_v17  ;;  %v2166_v20 = vmul.f32 %v4347_v11, %v2158_v19 }
 0xc89   :  { %2281 = vmatprep.mubr.f32.mxu1 %v5272_v1 }
 0xc8a   :  { %v5903_v21 = vadd.f32 %v4348_v14, %v2166_v20 }
 0xc8c   :  { %4367 = vmatmul.mubr.msk.f32.gmra.mxu1 %vm264_vm4, %v5903_v21 }
 0xc8d   :  { %4804 = vmatprep.mubr.msk.f32.mxu1 %vm5273_vm5, %v5272_v1 }
 0xd48   :  { %v2277_v29 = vpop.f32.mrf.mxu1 }
 0xd49   :  { %v2278_v13 = vadd.f32 %v2277_v29, %v2198_v28 }
 0xd4a   :  { %v2279_v10 = vpop.f32.mrf.mxu1 }
 0xd4b   :  { %2289 = vrot.lane.b32.xlu1 %v2278_v13, %s5275_s30  ;;  %v5929_v33 = vadd.f32 %v2279_v10, %v5924_v24 }
 0xd4c   :  { %v2283_v30 = vpop.f32.mrf.mxu1 }
 0xd4d   :  { %v2284_v31 = vadd.f32 %v2283_v30, %v2198_v28 }
 0xd4e   :  { %v5936_v23 = vpop.f32.mrf.mxu1 }
 0xd4f   :  { %2450 = vrot.lane.b32.xlu1 %v2278_v13, %s5278_s4 }
 0xd53   :  { %2619 = vrot.lane.b32.xlu1 %v2278_v13, %s5277_s8 }
 0xd57   :  { %2617 = vrot.lane.b32.xlu1 %v2278_v13, %s5274_s27 }
 0xd5b   :  { %2785 = vrot.lane.b32.xlu1 %v2278_v13, %s6309_s2 }
 0xd5f   :  { %2965 = vrot.lane.b32.xlu1 %v2284_v31, %s5275_s30  ;;  %s6311_s30 = smov 48  }
 0xd63   :  { %3126 = vrot.lane.b32.xlu1 %v2284_v31, %s5278_s4 }
 0xd67   :  { %3293 = vrot.lane.b32.xlu1 %v2284_v31, %s5274_s27 }
 0xd6b   :  { %3459 = vrot.lane.b32.xlu1 %v2284_v31, %s6310_s26 }
 0xdbd   :  { %v2290_v32 = vpop.permute.xlu1 %2289 }
 0xdbe   :  { %4803 = vmatpush3.xpose.msk.msra.mxu1 %vm422_vm6, %v2290_v32 }
 0xdbf   :  { %4807 = vmatprep.subr.mxu1 %v5272_v1 }
 0xdc1   :  { %4805 = vmatmul.mubr.msk.f32.vlgmr.msra.gmra.mxu1 %vm422_vm6, %v2278_v13  ;;  %v2451_v27 = vpop.permute.xlu1 %2450 }
 0xdc2   :  { %4808 = vmatpush3.msra.mxu1 %v5929_v33  ;;  %4809 = vmatprep.mubr.msk.f32.mxu1 %vm5273_vm5, %v5272_v1 }
 0xdc3   :  { %4812 = vmatprep.subr.mxu1 %v5272_v1 }
 0xdc5   :  { %v2620_v44 = vpop.permute.xlu1 %2619 }
 0xdc9   :  { %v2618_v46 = vpop.permute.xlu1 %2617 }
 0xdcd   :  { %v2786_v49 = vpop.permute.xlu1 %2785 }
 0xdd1   :  { %v2966_v50 = vpop.permute.xlu1 %2965 }
 0xdd5   :  { %v3127_v53 = vpop.permute.xlu1 %3126 }
 0xdd9   :  { %v3294_v55 = vpop.permute.xlu1 %3293 }
 0xddd   :  { %v3460_v57 = vpop.permute.xlu1 %3459 }
 0xe81   :  { %v2361_v22 = vpop.f32.mrf.mxu1 }
 0xe82   :  { %v2365_v34 = vmul.f32 0.25, %v2361_v22 }
 0xe83   :  { %v4806_v35 = vpop.f32.mrf.mxu1 }
 0xe84   :  { %v2366_v36 = vsel %vm498_vm7, %v2365_v34, -inf }
 0xe85   :  { %2367 = vmax.xlane.f32.xlu0 %v2366_v36 }
 0xf0e   :  { %v2368_v37 = vpop.xlane.xlu0 %2367 }
 0xf0f   :  { %v2369_v38 = vsub.f32 %v2365_v34, %v2368_v37 }
 0xf11   :  { %v2370_v39 = vmul.f32 1.442695, %v2369_v38 }
 0xf13   :  { %5064 = vpow2.f32 %v2370_v39 }
 0xf20   :  { %v5065_v40 = vpop.eup %5064 }
 0xf21   :  { %v2372_v42 = vsel %vm498_vm7, %v5065_v40, 0.0 }
 0xf22   :  { %2373 = vadd.xlane.f32.xlu0 %v2372_v42 }
 0xf38   :  { %2452 = vrot.lane.b32.xlu0 %v2278_v13, %s6311_s30 }
 0xf3c   :  { %2783 = vrot.lane.b32.xlu0 %v2278_v13, %s6310_s26 }
 0xf40   :  { %3128 = vrot.lane.b32.xlu0 %v2284_v31, %s6311_s30 }
 0xf44   :  { %3295 = vrot.lane.b32.xlu0 %v2284_v31, %s5277_s8 }
 0xf48   :  { %3461 = vrot.lane.b32.xlu0 %v2284_v31, %s6309_s2 }
 0xfab   :  { %v2374_v43 = vpop.xlane.xlu0 %2373 }
 0xfac   :  { %5066 = vrcp.f32 %v2374_v43 }
 0xfaf   :  { %v2453_v48 = vpop.permute.xlu0 %2452 }
 0xfb3   :  { %v2784_v51 = vpop.permute.xlu0 %2783 }
 0xfb7   :  { %v3129_v52 = vpop.permute.xlu0 %3128 }
 0xfb9   :  { %v5067_v45 = vpop.eup %5066 }
 0xfba   :  { %v2376_v47 = vmul.f32 %v5067_v45, %v5065_v40 }
 0xfbb   :  { %v3296_v54 = vpop.permute.xlu0 %3295 }
 0xfbc   :  { %4810 = vmatmul.mubr.msk.f32.vlgmr.msra.gmra.mxu1 %vm498_vm7, %v2376_v47 }
 0xfbd   :  { %4813 = vmatpush3.xpose.msk.msra.mxu1 %vm422_vm6, %v2453_v48  ;;  %4814 = vmatprep.mubr.msk.f32.mxu1 %vm5273_vm5, %v5272_v1 }
 0xfbe   :  { %4822 = vmatprep.subr.mxu1 %v5272_v1 }
 0xfbf   :  { %v3462_v56 = vpop.permute.xlu0 %3461 }
 0xfc0   :  { %4815 = vmatmul.mubr.msk.f32.vlgmr.msra.gmra.mxu1 %vm422_vm6, %v2451_v27  ;;  %v5998_v27 = vadd.f32 %v5936_v23, %v5924_v24 }
 0xfc1   :  { %4823 = vmatpush3.xpose.msk.msra.mxu1 %vm422_vm6, %v2620_v44  ;;  %4824 = vmatprep.mubr.msk.f32.mxu1 %vm5273_vm5, %v5272_v1 }
 0xfc2   :  { %4832 = vmatprep.subr.mxu1 %v5272_v1 }
 0xfc4   :  { %4825 = vmatmul.mubr.msk.f32.vlgmr.msra.gmra.mxu1 %vm422_vm6, %v2618_v46 }
 0xfc5   :  { %4833 = vmatpush3.xpose.msk.msra.mxu1 %vm422_vm6, %v2786_v49  ;;  %4834 = vmatprep.mubr.msk.f32.mxu1 %vm5273_vm5, %v5272_v1 }
 0xfc6   :  { %4842 = vmatprep.subr.mxu1 %v5272_v1 }
 0xfc8   :  { %4835 = vmatmul.mubr.msk.f32.vlgmr.msra.gmra.mxu1 %vm422_vm6, %v2784_v51 }
 0xfc9   :  { %4843 = vmatpush3.xpose.msk.msra.mxu1 %vm422_vm6, %v2966_v50  ;;  %4844 = vmatprep.mubr.msk.f32.mxu1 %vm5273_vm5, %v5272_v1 }
 0xfca   :  { %4852 = vmatprep.subr.mxu1 %v5272_v1 }
 0xfcc   :  { %4845 = vmatmul.mubr.msk.f32.vlgmr.msra.gmra.mxu1 %vm422_vm6, %v2284_v31 }
 0xfcd   :  { %4853 = vmatpush3.xpose.msk.msra.mxu1 %vm422_vm6, %v3129_v52  ;;  %4854 = vmatprep.mubr.msk.f32.mxu1 %vm5273_vm5, %v5272_v1 }
 0xfce   :  { %4862 = vmatprep.subr.mxu1 %v5272_v1 }
 0xfd0   :  { %4855 = vmatmul.mubr.msk.f32.vlgmr.msra.gmra.mxu1 %vm422_vm6, %v3127_v53 }
 0xfd1   :  { %4863 = vmatpush3.xpose.msk.msra.mxu1 %vm422_vm6, %v3296_v54  ;;  %4864 = vmatprep.mubr.msk.f32.mxu1 %vm5273_vm5, %v5272_v1 }
 0xfd2   :  { %4872 = vmatprep.subr.mxu1 %v5272_v1 }
 0xfd4   :  { %4865 = vmatmul.mubr.msk.f32.vlgmr.msra.gmra.mxu1 %vm422_vm6, %v3294_v55 }
 0xfd5   :  { %4873 = vmatpush3.xpose.msk.msra.mxu1 %vm422_vm6, %v3462_v56  ;;  %4874 = vmatprep.mubr.msk.f32.mxu1 %vm5273_vm5, %v5272_v1 }
 0xfd8   :  { %4875 = vmatmul.mubr.msk.f32.vlgmr.msra.gmra.mxu1 %vm422_vm6, %v3460_v57 }
0x107c   :  { %v5980_v58 = vpop.f32.mrf.mxu1 }
0x107e   :  { %v4811_v25 = vpop.f32.mrf.mxu1 }
0x1080   :  { %v2524_v41 = vpop.f32.mrf.mxu1 }
0x1081   :  { %v2528_v59 = vmul.f32 0.25, %v2524_v41 }
0x1082   :  { %v4816_v60 = vpop.f32.mrf.mxu1 }
0x1083   :  { %v2529_v61 = vsel %vm498_vm7, %v2528_v59, -inf }
0x1084   :  { %2530 = vmax.xlane.f32.xlu0 %v2529_v61  ;;  %v2691_v62 = vpop.f32.mrf.mxu1 }
0x1085   :  { %v2695_v63 = vmul.f32 0.25, %v2691_v62 }
0x1086   :  { %v4826_v0 = vpop.f32.mrf.mxu1 }
0x1087   :  { %v2696_v2 = vsel %vm498_vm7, %v2695_v63, -inf }
0x1088   :  { %2697 = vmax.xlane.f32.xlu1 %v2696_v2  ;;  %v2857_v3 = vpop.f32.mrf.mxu1 }
0x1089   :  { %v2861_v4 = vmul.f32 0.25, %v2857_v3 }
0x108a   :  { %v4836_v5 = vpop.f32.mrf.mxu1 }
0x108b   :  { %v2862_v6 = vsel %vm498_vm7, %v2861_v4, -inf }
0x108c   :  { %2863 = vmax.xlane.f32.xlu0 %v2862_v6  ;;  %v3037_v7 = vpop.f32.mrf.mxu1 }
0x108d   :  { %v3041_v8 = vmul.f32 0.25, %v3037_v7 }
0x108e   :  { %v4846_v9 = vpop.f32.mrf.mxu1 }
0x108f   :  { %v3042_v11 = vsel %vm498_vm7, %v3041_v8, -inf }
0x1090   :  { %3043 = vmax.xlane.f32.xlu0 %v3042_v11  ;;  %v3200_v12 = vpop.f32.mrf.mxu1 }
0x1091   :  { %v3204_v14 = vmul.f32 0.25, %v3200_v12 }
0x1092   :  { %v4856_v15 = vpop.f32.mrf.mxu1 }
0x1093   :  { %v3205_v16 = vsel %vm498_vm7, %v3204_v14, -inf }
0x1094   :  { %3206 = vmax.xlane.f32.xlu1 %v3205_v16  ;;  %v3367_v19 = vpop.f32.mrf.mxu1 }
0x1095   :  { %v3371_v20 = vmul.f32 0.25, %v3367_v19 }
0x1096   :  { %v4866_v26 = vpop.f32.mrf.mxu1 }
0x1097   :  { %v3372_v28 = vsel %vm498_vm7, %v3371_v20, -inf }
0x1098   :  { %3373 = vmax.xlane.f32.xlu0 %v3372_v28  ;;  %v3533_v29 = vpop.f32.mrf.mxu1 }
0x1099   :  { %v3537_v10 = vmul.f32 0.25, %v3533_v29 }
0x109a   :  { %v4876_v13 = vpop.f32.mrf.mxu1 }
0x109b   :  { %v3538_v30 = vsel %vm498_vm7, %v3537_v10, -inf }
0x10a5   :  { %2541 = vrot.lane.b32.xlu1 %v5929_v33, %s5278_s4 }
0x10c9   :  { %3539 = vmax.xlane.f32.xlu1 %v3538_v30 }
0x10da   :  { %2873 = vrot.lane.b32.xlu1 %v5929_v33, %s6310_s26 }
0x110d   :  { %v2531_v31 = vpop.xlane.xlu0 %2530 }
0x110e   :  { %v2532_v32 = vsub.f32 %v2528_v59, %v2531_v31 }
0x1110   :  { %v2533_v22 = vmul.f32 1.442695, %v2532_v32 }
0x1111   :  { %v2698_v34 = vpop.xlane.xlu1 %2697 }
0x1112   :  { %5068 = vpow2.f32 %v2533_v22  ;;  %v2699_v35 = vsub.f32 %v2695_v63, %v2698_v34 }
0x1114   :  { %v2700_v36 = vmul.f32 1.442695, %v2699_v35 }
0x1115   :  { %v2864_v44 = vpop.xlane.xlu0 %2863 }
0x1116   :  { %5070 = vpow2.f32 %v2700_v36  ;;  %v2865_v45 = vsub.f32 %v2861_v4, %v2864_v44  ;;  %v4394_v44 = vld [vmem:[%s6266_s9 + $0x50] sm:$0xff] }
0x1118   :  { %v2866_v48 = vmul.f32 1.442695, %v2865_v45 }
0x1119   :  { %v3044_v46 = vpop.xlane.xlu0 %3043 }
0x111a   :  { %v3045_v47 = vsub.f32 %v3041_v8, %v3044_v46  ;;  %5072 = vpow2.f32 %v2866_v48  ;;  %v4393_v46 = vld [vmem:[%s6266_s9 + $0x48] sm:$0xff] }
0x111c   :  { %v3046_v50 = vmul.f32 1.442695, %v3045_v47  ;;  %v4392_v47 = vld [vmem:[%s6266_s9 + $0x40] sm:$0xff] }
0x111d   :  { %v3207_v37 = vpop.xlane.xlu1 %3206 }
0x111e   :  { %v3208_v49 = vsub.f32 %v3204_v14, %v3207_v37  ;;  %5074 = vpow2.f32 %v3046_v50 }
0x111f   :  { %v5069_v38 = vpop.eup %5068 }
0x1120   :  { %v2535_v39 = vsel %vm498_vm7, %v5069_v38, 0.0  ;;  %v3209_v52 = vmul.f32 1.442695, %v3208_v49 }
0x1121   :  { %2536 = vadd.xlane.f32.xlu0 %v2535_v39  ;;  %v2542_v40 = vpop.permute.xlu1 %2541  ;;  %v3374_v51 = vpop.xlane.xlu0 %3373  ;;  %v4399_v39 = vld [vmem:[%s6266_s9 + $0x78] sm:$0xff] }
0x1122   :  { %4818 = vmatpush3.msra.mxu0 %v2542_v40  ;;  %v3375_v53 = vsub.f32 %v3371_v20, %v3374_v51  ;;  %5076 = vpow2.f32 %v3209_v52  ;;  %4882 = vmatprep.subr.mxu1 %v4399_v39  ;;  %v4398_v40 = vld [vmem:[%s6266_s9 + $0x70] sm:$0xff] }
0x1123   :  { %v5071_v42 = vpop.eup %5070  ;;  %4827 = vmatprep.subr.mxu0 %v5272_v1  ;;  %4883 = vmatpush3.msra.mxu1 %v4399_v39 }
0x1124   :  { %v2702_v43 = vsel %vm498_vm7, %v5071_v42, 0.0  ;;  %v3376_v24 = vmul.f32 1.442695, %v3375_v53  ;;  %4884 = vmatprep.subr.mxu1 %v4398_v40 }
0x1125   :  { %2703 = vadd.xlane.f32.xlu1 %v2702_v43  ;;  %4885 = vmatpush3.msra.mxu1 %v4398_v40  ;;  %v4396_v43 = vld [vmem:[%s6266_s9 + $0x60] sm:$0xff] }
0x1126   :  { %5078 = vpow2.f32 %v3376_v24 }
0x1127   :  { %v5073_v23 = vpop.eup %5072 }
0x112b   :  { %v5075_v56 = vpop.eup %5074 }
0x112c   :  { %v3048_v41 = vsel %vm498_vm7, %v5075_v56, 0.0 }
0x112f   :  { %v5077_v25 = vpop.eup %5076 }
0x1130   :  { %v3211_v59 = vsel %vm498_vm7, %v5077_v25, 0.0 }
0x1133   :  { %v5079_v60 = vpop.eup %5078 }
0x1134   :  { %v3378_v61 = vsel %vm498_vm7, %v5079_v60, 0.0 }
0x1136   :  { %3217 = vrot.lane.b32.xlu1 %v5998_v27, %s5278_s4 }
0x1137   :  { %2707 = vrot.lane.b32.xlu0 %v5929_v33, %s5274_s27  ;;  %v2868_v33 = vsel %vm498_vm7, %v5073_v23, 0.0 }
0x1152   :  { %v3540_v54 = vpop.xlane.xlu1 %3539 }
0x1153   :  { %v3541_v55 = vsub.f32 %v3537_v10, %v3540_v54 }
0x1155   :  { %v3542_v57 = vmul.f32 1.442695, %v3541_v55 }
0x1156   :  { %2869 = vadd.xlane.f32.xlu0 %v2868_v33  ;;  %v2874_v0 = vpop.permute.xlu1 %2873 }
0x1157   :  { %5080 = vpow2.f32 %v3542_v57 }
0x115a   :  { %3049 = vadd.xlane.f32.xlu1 %v3048_v41  ;;  %3212 = vadd.xlane.f32.xlu0 %v3211_v59 }
0x115e   :  { %3379 = vadd.xlane.f32.xlu1 %v3378_v61 }
0x1164   :  { %v5081_v62 = vpop.eup %5080 }
0x1165   :  { %v3544_v63 = vsel %vm498_vm7, %v5081_v62, 0.0 }
0x1166   :  { %3545 = vadd.xlane.f32.xlu0 %v3544_v63 }
0x116f   :  { %3549 = vrot.lane.b32.xlu1 %v5998_v27, %s6310_s26 }
0x117c   :  { %3383 = vrot.lane.b32.xlu0 %v5998_v27, %s5274_s27 }
0x11aa   :  { %v2537_v2 = vpop.xlane.xlu0 %2536 }
0x11ab   :  { %5082 = vrcp.f32 %v2537_v2 }
0x11ae   :  { %v2704_v3 = vpop.xlane.xlu1 %2703  ;;  %v2708_v6 = vpop.permute.xlu0 %2707 }
0x11af   :  { %5084 = vrcp.f32 %v2704_v3 }
0x11b2   :  { %v3218_v9 = vpop.permute.xlu1 %3217 }
0x11b8   :  { %v5083_v4 = vpop.eup %5082 }
0x11b9   :  { %v2539_v5 = vmul.f32 %v5083_v4, %v5069_v38 }
0x11bb   :  { %4820 = vmatmul.mubr.msk.f32.vlgmr.msra.gmra.mxu0 %vm498_vm7, %v2539_v5 }
0x11bc   :  { %v5085_v7 = vpop.eup %5084  ;;  %4828 = vmatpush3.msra.mxu0 %v2708_v6  ;;  %4829 = vmatprep.mubr.msk.f32.mxu0 %vm5273_vm5, %v5272_v1 }
0x11bd   :  { %4837 = vmatprep.subr.mxu0 %v5272_v1  ;;  %v2706_v8 = vmul.f32 %v5085_v7, %v5071_v42  ;;  %v4397_v42 = vld [vmem:[%s6266_s9 + $0x68] sm:$0xff] }
0x11be   :  { %4886 = vmatprep.subr.mxu1 %v4397_v42 }
0x11bf   :  { %4830 = vmatmul.mubr.msk.f32.vlgmr.msra.gmra.mxu0 %vm498_vm7, %v2706_v8  ;;  %4887 = vmatpush3.msra.mxu1 %v4397_v42  ;;  %v4406_v42 = vld [vmem:[%s6268_s11 + $0x1] ss:$0 sm:$0xff] }
0x11c0   :  { %4838 = vmatpush3.msra.mxu0 %v2874_v0  ;;  %4839 = vmatprep.mubr.msk.f32.mxu0 %vm5273_vm5, %v5272_v1 }
0x11c1   :  { %4847 = vmatprep.subr.mxu0 %v5272_v1  ;;  %4888 = vmatprep.subr.mxu1 %v4396_v43 }
0x11c2   :  { %4889 = vmatpush3.msra.mxu1 %v4396_v43 }
0x11df   :  { %v2870_v11 = vpop.xlane.xlu0 %2869 }
0x11e0   :  { %5086 = vrcp.f32 %v2870_v11 }
0x11e3   :  { %v3050_v12 = vpop.xlane.xlu1 %3049  ;;  %v3213_v14 = vpop.xlane.xlu0 %3212 }
0x11e4   :  { %5088 = vrcp.f32 %v3050_v12 }
0x11e5   :  { %5090 = vrcp.f32 %v3213_v14 }
0x11e7   :  { %v3380_v15 = vpop.xlane.xlu1 %3379 }
0x11e8   :  { %5092 = vrcp.f32 %v3380_v15 }
0x11eb   :  { %v3550_v22 = vpop.permute.xlu1 %3549 }
0x11ed   :  { %v5087_v16 = vpop.eup %5086 }
0x11ee   :  { %v2872_v19 = vmul.f32 %v5087_v16, %v5073_v23 }
0x11ef   :  { %v3546_v20 = vpop.xlane.xlu0 %3545 }
0x11f0   :  { %5094 = vrcp.f32 %v3546_v20  ;;  %4840 = vmatmul.mubr.msk.f32.vlgmr.msra.gmra.mxu0 %vm498_vm7, %v2872_v19 }
0x11f1   :  { %4848 = vmatpush3.msra.mxu0 %v5998_v27  ;;  %4849 = vmatprep.mubr.msk.f32.mxu0 %vm5273_vm5, %v5272_v1  ;;  %v5089_v26 = vpop.eup %5088  ;;  %v4395_v27 = vld [vmem:[%s6266_s9 + $0x58] sm:$0xff] }
0x11f2   :  { %4857 = vmatprep.subr.mxu0 %v5272_v1  ;;  %v3052_v28 = vmul.f32 %v5089_v26, %v5075_v56  ;;  %v5091_v29 = vpop.eup %5090  ;;  %4890 = vmatprep.subr.mxu1 %v4395_v27 }
0x11f3   :  { %v3215_v13 = vmul.f32 %v5091_v29, %v5077_v25  ;;  %v3384_v30 = vpop.permute.xlu0 %3383  ;;  %4891 = vmatpush3.msra.mxu1 %v4395_v27  ;;  %v4414_v29 = vld [vmem:[%s6270_s13 + $0x70] sm:$0xff]  ;;  %v4407_v27 = vld [vmem:[%s6269_s12 + $0x1] ss:$0 sm:$0xff] }
0x11f4   :  { %4850 = vmatmul.mubr.msk.f32.vlgmr.msra.gmra.mxu0 %vm498_vm7, %v3052_v28  ;;  %4892 = vmatprep.subr.mxu1 %v4394_v44 }
0x11f5   :  { %4858 = vmatpush3.msra.mxu0 %v3218_v9  ;;  %4859 = vmatprep.mubr.msk.f32.mxu0 %vm5273_vm5, %v5272_v1  ;;  %v5093_v10 = vpop.eup %5092 }
0x11f6   :  { %4867 = vmatprep.subr.mxu0 %v5272_v1  ;;  %v3382_v31 = vmul.f32 %v5093_v10, %v5079_v60  ;;  %4893 = vmatpush3.msra.mxu1 %v4394_v44  ;;  %v4412_v10 = vld [vmem:[%s6270_s13 + $0x60] sm:$0xff] }
0x11f7   :  { %4894 = vmatprep.subr.mxu1 %v4393_v46 }
0x11f8   :  { %4860 = vmatmul.mubr.msk.f32.vlgmr.msra.gmra.mxu0 %vm498_vm7, %v3215_v13  ;;  %4895 = vmatpush3.msra.mxu1 %v4393_v46  ;;  %v4413_v13 = vld [vmem:[%s6270_s13 + $0x68] sm:$0xff] }
0x11f9   :  { %4868 = vmatpush3.msra.mxu0 %v3384_v30  ;;  %4869 = vmatprep.mubr.msk.f32.mxu0 %vm5273_vm5, %v5272_v1  ;;  %v4411_v30 = vld [vmem:[%s6270_s13 + $0x58] sm:$0xff] }
0x11fa   :  { %4877 = vmatprep.subr.mxu0 %v5272_v1  ;;  %4896 = vmatprep.subr.mxu1 %v4392_v47 }
0x11fb   :  { %4897 = vmatpush3.msra.mxu1 %v4392_v47 }
0x11fc   :  { %4870 = vmatmul.mubr.msk.f32.vlgmr.msra.gmra.mxu0 %vm498_vm7, %v3382_v31  ;;  %v4410_v31 = vld [vmem:[%s6270_s13 + $0x50] sm:$0xff] }
0x11fd   :  { %v5095_v32 = vpop.eup %5094  ;;  %4878 = vmatpush3.msra.mxu0 %v3550_v22  ;;  %4879 = vmatprep.mubr.msk.f32.mxu0 %vm5273_vm5, %v5272_v1  ;;  %v4408_v22 = vld [vmem:[%s6270_s13 + $0x40] sm:$0xff] }
0x11fe   :  { %v3548_v34 = vmul.f32 %v5095_v32, %v5081_v62  ;;  %v4409_v32 = vld [vmem:[%s6270_s13 + $0x48] sm:$0xff] }
0x1200   :  { %4880 = vmatmul.mubr.msk.f32.vlgmr.msra.gmra.mxu0 %vm498_vm7, %v3548_v34 }
0x127b   :  { %v2613_v35 = vpop.f32.mrf.mxu0 }
0x127c   :  { %2950 = vrot.lane.b32.xlu0 %v2613_v35, %s6309_s2 }
0x127d   :  { %v4821_v36 = vpop.f32.mrf.mxu0 }
0x127f   :  { %v2779_v37 = vpop.f32.mrf.mxu0 }
0x1280   :  { %2954 = vrot.lane.b32.xlu1 %v2779_v37, %s5277_s8 }
0x1281   :  { %v4831_v38 = vpop.f32.mrf.mxu0 }
0x12b0   :  { %v2945_v45 = vpop.f32.mrf.mxu0 }
0x12b1   :  { %2958 = vrot.lane.b32.xlu1 %v2945_v45, %s6311_s30 }
0x12b2   :  { %v4841_v48 = vpop.f32.mrf.mxu0 }
0x12b4   :  { %v3122_v49 = vpop.f32.mrf.mxu0 }
0x12b6   :  { %v4851_v51 = vpop.f32.mrf.mxu0 }
0x12b7   :  { %v4435_v51 = vld [vmem:[%s6272_s15 + $0xf8] sm:$0xff] }
0x12b8   :  { %v3289_v50 = vpop.f32.mrf.mxu0  ;;  %4920 = vmatprep.subr.mxu1 %v4435_v51 }
0x12b9   :  { %3626 = vrot.lane.b32.xlu0 %v3289_v50, %s6309_s2  ;;  %v4434_v50 = vld [vmem:[%s6272_s15 + $0xf0] sm:$0xff] }
0x12ba   :  { %v4861_v52 = vpop.f32.mrf.mxu0 }
0x12bb   :  { %v4433_v52 = vld [vmem:[%s6272_s15 + $0xe8] sm:$0xff] }
0x12bc   :  { %v3455_v53 = vpop.f32.mrf.mxu0 }
0x12bd   :  { %3630 = vrot.lane.b32.xlu0 %v3455_v53, %s5277_s8  ;;  %v4432_v53 = vld [vmem:[%s6272_s15 + $0xe0] sm:$0xff] }
0x12be   :  { %v4871_v24 = vpop.f32.mrf.mxu0 }
0x12bf   :  { %v4431_v24 = vld [vmem:[%s6272_s15 + $0xd8] sm:$0xff] }
0x12c0   :  { %v3621_v23 = vpop.f32.mrf.mxu0 }
0x12c1   :  { %3634 = vrot.lane.b32.xlu1 %v3621_v23, %s6311_s30  ;;  %v4430_v23 = vld [vmem:[%s6272_s15 + $0xd0] sm:$0xff] }
0x12c2   :  { %v4881_v54 = vpop.f32.mrf.mxu0 }
0x12c3   :  { %v4429_v54 = vld [vmem:[%s6272_s15 + $0xc8] sm:$0xff] }
0x12ee   :  { %v2951_v55 = vpop.permute.xlu0 %2950 }
0x12ef   :  { %v2961_v57 = vsel %vm422_vm6, %v5980_v58, %v2951_v55  ;;  %v4401_v58 = vld [vmem:[%s6267_s10 + $0x1] ss:$0 sm:$0xff] }
0x12f0   :  { %v4428_v55 = vld [vmem:[%s6272_s15 + $0xc0] sm:$0xff] }
0x12f2   :  { %v2955_v56 = vpop.permute.xlu1 %2954 }
0x12f3   :  { %v2962_v33 = vsel %vm1095_vm8, %v2961_v57, %v2955_v56  ;;  %v4427_v56 = vld [vmem:[%s6272_s15 + $0xb8] sm:$0xff]  ;;  %v4426_v57 = vld [vmem:[%s6272_s15 + $0xb0] sm:$0xff] }
0x1323   :  { %v2959_v25 = vpop.permute.xlu1 %2958 }
0x1324   :  { %v2963_v41 = vsel %vm1097_vm9, %v2962_v33, %v2959_v25  ;;  %v4425_v33 = vld [vmem:[%s6272_s15 + $0xa8] sm:$0xff]  ;;  %v4424_v25 = vld [vmem:[%s6272_s15 + $0xa0] sm:$0xff] }
0x1325   :  { %4898 = vmatprep.mubr.msk.f32.mxu1 %vm264_vm4, %v2963_v41  ;;  %v4423_v41 = vld [vmem:[%s6272_s15 + $0x98] sm:$0xff] }
0x132b   :  { %v3627_v59 = vpop.permute.xlu0 %3626 }
0x132c   :  { %v3637_v61 = vsel %vm422_vm6, %v3122_v49, %v3627_v59  ;;  %v4422_v59 = vld [vmem:[%s6272_s15 + $0x90] sm:$0xff] }
0x132f   :  { %v3631_v60 = vpop.permute.xlu0 %3630 }
0x1330   :  { %v3638_v62 = vsel %vm1095_vm8, %v3637_v61, %v3631_v60  ;;  %v4421_v60 = vld [vmem:[%s6272_s15 + $0x88] sm:$0xff]  ;;  %v4420_v61 = vld [vmem:[%s6272_s15 + $0x80] sm:$0xff] }
0x1333   :  { %v3635_v63 = vpop.permute.xlu1 %3634 }
0x1334   :  { %v3639_v0 = vsel %vm1097_vm9, %v3638_v62, %v3635_v63  ;;  %v4417_v62 = vld [vmem:[%s6271_s14 + $0x1] ss:$0 sm:$0xff] }
0x1335   :  { %4899 = vmatmul.mubr.msk.f32.vlgmr.msra.gmra.mxu1 %vm264_vm4, %v3639_v0 }
0x1336   :  { %4921 = vmatpush3.msra.mxu1 %v4435_v51  ;;  %v4058_v51 = vld [vmem:[#allocation10 + $0x18] sm:$0xff] }
0x1337   :  { %4922 = vmatprep.subr.mxu1 %v4434_v50 }
0x1338   :  { %4923 = vmatpush3.msra.mxu1 %v4434_v50  ;;  %v4057_v50 = vld [vmem:[#allocation10 + $0x10] sm:$0xff] }
0x1339   :  { %4924 = vmatprep.subr.mxu1 %v4433_v52 }
0x133a   :  { %4925 = vmatpush3.msra.mxu1 %v4433_v52  ;;  %v4056_v52 = vld [vmem:[#allocation10 + $0x8] sm:$0xff] }
0x133b   :  { %4926 = vmatprep.subr.mxu1 %v4432_v53 }
0x133c   :  { %4927 = vmatpush3.msra.mxu1 %v4432_v53  ;;  %v4055_v53 = vld [vmem:[#allocation10] sm:$0xff] }
0x133d   :  { %4928 = vmatprep.subr.mxu1 %v4431_v24 }
0x133e   :  { %4929 = vmatpush3.msra.mxu1 %v4431_v24 }
0x133f   :  { %4930 = vmatprep.subr.mxu1 %v4430_v23 }
0x1340   :  { %4931 = vmatpush3.msra.mxu1 %v4430_v23 }
0x1341   :  { %4932 = vmatprep.subr.mxu1 %v4429_v54 }
0x1342   :  { %4933 = vmatpush3.msra.mxu1 %v4429_v54 }
0x1343   :  { %4934 = vmatprep.subr.mxu1 %v4428_v55 }
0x1344   :  { %4935 = vmatpush3.msra.mxu1 %v4428_v55 }
0x1345   :  { %4936 = vmatprep.subr.mxu1 %v4427_v56 }
0x1346   :  { %4937 = vmatpush3.msra.mxu1 %v4427_v56 }
0x1347   :  { %4938 = vmatprep.subr.mxu1 %v4426_v57 }
0x1348   :  { %4939 = vmatpush3.msra.mxu1 %v4426_v57 }
0x1349   :  { %4940 = vmatprep.subr.mxu1 %v4425_v33 }
0x134a   :  { %4941 = vmatpush3.msra.mxu1 %v4425_v33 }
0x134b   :  { %4942 = vmatprep.subr.mxu1 %v4424_v25 }
0x134c   :  { %4943 = vmatpush3.msra.mxu1 %v4424_v25  ;;  %v4440_v25 = vld [vmem:[%s6274_s17 + $0x1] ss:$0 sm:$0xff] }
0x134d   :  { %4944 = vmatprep.subr.mxu1 %v4423_v41 }
0x134e   :  { %4945 = vmatpush3.msra.mxu1 %v4423_v41 }
0x134f   :  { %4946 = vmatprep.subr.mxu1 %v4422_v59 }
0x1350   :  { %4947 = vmatpush3.msra.mxu1 %v4422_v59 }
0x1351   :  { %4948 = vmatprep.subr.mxu1 %v4421_v60 }
0x1352   :  { %4949 = vmatpush3.msra.mxu1 %v4421_v60  ;;  %v4441_v60 = vld [vmem:[%s6275_s18 + $0x1] ss:$0 sm:$0xff] }
0x1353   :  { %4950 = vmatprep.subr.mxu1 %v4420_v61 }
0x1354   :  { %4951 = vmatpush3.msra.mxu1 %v4420_v61 }
0x13f5   :  { %v4900_v2 = vpop.f32.mrf.mxu1 }
0x13f6   :  { %v3735_v3 = vadd.f32 %v4900_v2, %v4401_v58 }
0x13f7   :  { %v3729_v4 = vpop.f32.mrf.mxu1 }
0x13f8   :  { %v3739_v5 = vadd.f32 %v3735_v3, %v5903_v21  ;;  %v3730_v6 = vadd.f32 %v4401_v58, %v3729_v4 }
0x13fa   :  { %v3747_v7 = vsel %vm264_vm4, %v3739_v5, 0.0  ;;  %v3738_v8 = vadd.f32 %v3730_v6, %v5898_v17  ;;  %v4415_v17 = vld [vmem:[%s6270_s13 + $0x78] sm:$0xff] }
0x13fb   :  { %3748 = vadd.xlane.f32.xlu1 %v3747_v7  ;;  %4901 = vmatprep.subr.mxu0 %v4415_v17 }
0x13fc   :  { %v3744_v9 = vsel %vm264_vm4, %v3738_v8, 0.0  ;;  %4902 = vmatpush3.msra.mxu0 %v4415_v17 }
0x13fd   :  { %3745 = vadd.xlane.f32.xlu0 %v3744_v9  ;;  %4903 = vmatprep.subr.mxu0 %v4414_v29 }
0x13fe   :  { %4904 = vmatpush3.msra.mxu0 %v4414_v29  ;;  %v4437_v29 = vld [vmem:[%s6273_s16 + $0x1] ss:$0 sm:$0xff] }
0x13ff   :  { %4905 = vmatprep.subr.mxu0 %v4413_v13 }
0x1400   :  { %4906 = vmatpush3.msra.mxu0 %v4413_v13 }
0x1401   :  { %4907 = vmatprep.subr.mxu0 %v4412_v10 }
0x1402   :  { %4908 = vmatpush3.msra.mxu0 %v4412_v10 }
0x1403   :  { %4909 = vmatprep.subr.mxu0 %v4411_v30 }
0x1404   :  { %4910 = vmatpush3.msra.mxu0 %v4411_v30 }
0x1405   :  { %4911 = vmatprep.subr.mxu0 %v4410_v31 }
0x1406   :  { %4912 = vmatpush3.msra.mxu0 %v4410_v31 }
0x1407   :  { %4913 = vmatprep.subr.mxu0 %v4409_v32 }
0x1408   :  { %4914 = vmatpush3.msra.mxu0 %v4409_v32 }
0x1409   :  { %4915 = vmatprep.subr.mxu0 %v4408_v22 }
0x140a   :  { %4916 = vmatpush3.msra.mxu0 %v4408_v22 }
0x140b   :  { %4955 = vmatprep.subr.mxu0 %v5272_v1 }
0x1484   :  { %v3749_v11 = vpop.xlane.xlu1 %3748 }
0x1485   :  { %v3751_v12 = vmul.f32 0.015625, %v3749_v11 }
0x1486   :  { %v3746_v14 = vpop.xlane.xlu0 %3745 }
0x1487   :  { %v3750_v15 = vmul.f32 0.015625, %v3746_v14  ;;  %v3753_v16 = vsub.f32 %v3739_v5, %v3751_v12 }
0x1489   :  { %v3752_v19 = vsub.f32 %v3738_v8, %v3750_v15  ;;  %v3755_v28 = vmul.f32 %v3753_v16, %v3753_v16 }
0x148b   :  { %v3754_v20 = vmul.f32 %v3752_v19, %v3752_v19  ;;  %v3759_v21 = vsel %vm264_vm4, %v3755_v28, 0.0 }
0x148d   :  { %v3756_v26 = vsel %vm264_vm4, %v3754_v20, 0.0 }
0x148e   :  { %3757 = vadd.xlane.f32.xlu0 %v3756_v26 }
0x1492   :  { %3760 = vadd.xlane.f32.xlu0 %v3759_v21 }
0x1517   :  { %v3758_v34 = vpop.xlane.xlu0 %3757 }
0x1518   :  { %v3762_v35 = vmul.f32 0.015625, %v3758_v34 }
0x151a   :  { %v3764_v36 = vadd.f32 1e-12, %v3762_v35 }
0x151b   :  { %v3761_v37 = vpop.xlane.xlu0 %3760 }
0x151c   :  { %5096 = vrsqrt.f32 %v3764_v36  ;;  %v3763_v38 = vmul.f32 0.015625, %v3761_v37 }
0x151e   :  { %v3765_v39 = vadd.f32 1e-12, %v3763_v38 }
0x1520   :  { %5098 = vrsqrt.f32 %v3765_v39 }
0x1529   :  { %v5097_v40 = vpop.eup %5096 }
0x152a   :  { %v3768_v43 = vmul.f32 %v5097_v40, %v3752_v19 }
0x152c   :  { %v3776_v44 = vmul.f32 %v4406_v42, %v3768_v43 }
0x152d   :  { %v5099_v45 = vpop.eup %5098 }
0x152e   :  { %v3769_v46 = vmul.f32 %v5099_v45, %v3753_v16  ;;  %v6117_v47 = vadd.f32 %v4407_v27, %v3776_v44 }
0x1530   :  { %v3777_v48 = vmul.f32 %v4406_v42, %v3769_v46  ;;  %4917 = vmatprep.mubr.msk.f32.mxu0 %vm264_vm4, %v6117_v47  ;;  %v4062_v46 = vld [vmem:[#allocation10 + $0x38] sm:$0xff] }
0x1532   :  { %v6121_v49 = vadd.f32 %v4407_v27, %v3777_v48  ;;  %v4060_v48 = vld [vmem:[#allocation10 + $0x28] sm:$0xff] }
0x1534   :  { %4918 = vmatmul.mubr.msk.f32.vlgmr.msra.gmra.mxu0 %vm264_vm4, %v6121_v49 }
0x1535   :  { %4971 = vmatprep.mubr.msk.f32.mxu0 %vm5273_vm5, %v5272_v1  ;;  %4956 = vmatpush3.msra.mxu0 %v4062_v46 }
0x1536   :  { %4957 = vmatprep.subr.mxu0 %v5272_v1 }
0x15f4   :  { %v4919_v63 = vpop.f32.mrf.mxu0 }
0x15f5   :  { %v3881_v0 = vadd.f32 %v4919_v63, %v4417_v62 }
0x15f6   :  { %v3875_v58 = vpop.f32.mrf.mxu0 }
0x15f7   :  { %v3885_v2 = vmul.f32 %v3881_v0, %v3881_v0  ;;  %v3876_v3 = vadd.f32 %v4417_v62, %v3875_v58 }
0x15f9   :  { %v3887_v4 = vmul.f32 %v3885_v2, %v3881_v0  ;;  %v3884_v5 = vmul.f32 %v3876_v3, %v3876_v3 }
0x15fb   :  { %v3889_v6 = vmul.f32 0.044715, %v3887_v4  ;;  %v3886_v7 = vmul.f32 %v3884_v5, %v3876_v3  ;;  %v4151_v4 = vld [vmem:[%s6278_s21 + $0x38] sm:$0xff]  ;;  %v4150_v5 = vld [vmem:[%s6278_s21 + $0x30] sm:$0xff] }
0x15fd   :  { %v3891_v8 = vadd.f32 %v3889_v6, %v3881_v0  ;;  %v3888_v9 = vmul.f32 0.044715, %v3886_v7  ;;  %v4149_v6 = vld [vmem:[%s6278_s21 + $0x28] sm:$0xff]  ;;  %v4148_v7 = vld [vmem:[%s6278_s21 + $0x20] sm:$0xff] }
0x15ff   :  { %v3893_v11 = vmul.f32 0.7978846, %v3891_v8  ;;  %v3890_v12 = vadd.f32 %v3888_v9, %v3876_v3  ;;  %v4147_v8 = vld [vmem:[%s6278_s21 + $0x18] sm:$0xff]  ;;  %v4146_v9 = vld [vmem:[%s6278_s21 + $0x10] sm:$0xff] }
0x1601   :  { %5100 = vtanh.f32 %v3893_v11  ;;  %v3892_v14 = vmul.f32 0.7978846, %v3890_v12  ;;  %v4145_v11 = vld [vmem:[%s6278_s21 + $0x8] sm:$0xff]  ;;  %v4144_v12 = vld [vmem:[%s6278_s21] sm:$0xff] }
0x1603   :  { %5102 = vtanh.f32 %v3892_v14  ;;  %v4232_v14 = vld [vmem:[%s6312_s3] sm:$0x3] }
0x160e   :  { %v5101_v15 = vpop.eup %5100 }
0x160f   :  { %v3897_v16 = vadd.f32 1.0, %v5101_v15  ;;  %v4442_v15 = vld [vmem:[%s6277_s20] ss:$0 sm:$0xff]  ;;  %s5281_s20 = smov [#allocation12]  }
0x1610   :  { %v5103_v19 = vpop.eup %5102 }
0x1611   :  { %v3896_v20 = vadd.f32 1.0, %v5103_v19  ;;  %v3899_v26 = vmul.f32 0.5, %v3897_v16 }
0x1613   :  { %v3898_v28 = vmul.f32 0.5, %v3896_v20  ;;  %v3901_v17 = vmul.f32 %v3899_v26, %v3881_v0 }
0x1615   :  { %v3900_v21 = vmul.f32 %v3898_v28, %v3876_v3  ;;  %v4444_v28 = vld [vmem:[%s6279_s22] ss:$0 sm:$0xff]  ;;  %s4290_s22 = sshll.u32 %s5281_s20, 4  ;;  %s4291_s22 = int_to_ptr.vmem [resolvable:$true] %s4290_s22 }
0x1616   :  { %s5214_s16 = scalar_lea.vmem %s4291_s22, 32  ;;  %p5219_p12 = scmp.lt.s32.totalorder %s4291_s22, %s4291_s22 }
0x1617   :  { %4952 = vmatprep.mubr.f32.mxu1 %v3900_v21  ;;  %p5215_p11 = scmp.ne.s32.totalorder %s4291_s22, %s5214_s16  ;;  %p5220_p13 = scmp.lt.s32.totalorder %s5214_s16, %s5214_s16 }
0x1618   :  { %4953 = vmatmul.mubr.f32.vlgmr.msra.gmra.mxu1 %v3901_v17 }
0x1619   :  { %p5221_p0 = por %p5220_p13, %p5219_p12 }
0x161b   :  { %p5222_p1 = pnand %p5221_p0, %p5215_p11 }
0x16d8   :  { %v4954_v13 = vpop.f32.mrf.mxu1 }
0x16d9   :  { %v3999_v10 = vadd.f32 %v4954_v13, %v4437_v29 }
0x16da   :  { %v3993_v30 = vpop.f32.mrf.mxu1 }
0x16db   :  { %v4003_v31 = vadd.f32 %v3999_v10, %v6121_v49  ;;  %v3994_v32 = vadd.f32 %v4437_v29, %v3993_v30  ;;  %v4059_v49 = vld [vmem:[#allocation10 + $0x20] sm:$0xff] }
0x16dd   :  { %v4011_v22 = vsel %vm264_vm4, %v4003_v31, 0.0  ;;  %v4002_v34 = vadd.f32 %v3994_v32, %v6117_v47  ;;  %v4061_v47 = vld [vmem:[#allocation10 + $0x30] sm:$0xff] }
0x16de   :  { %4012 = vadd.xlane.f32.xlu1 %v4011_v22  ;;  %4958 = vmatpush3.msra.mxu0 %v4061_v47 }
0x16df   :  { %v4008_v35 = vsel %vm264_vm4, %v4002_v34, 0.0  ;;  %4959 = vmatprep.subr.mxu0 %v5272_v1 }
0x16e0   :  { %4009 = vadd.xlane.f32.xlu0 %v4008_v35  ;;  %4960 = vmatpush3.msra.mxu0 %v4060_v48 }
0x16e1   :  { %4961 = vmatprep.subr.mxu0 %v5272_v1 }
0x16e2   :  { %4962 = vmatpush3.msra.mxu0 %v4059_v49 }
0x16e3   :  { %4963 = vmatprep.subr.mxu0 %v5272_v1 }
0x16e4   :  { %4964 = vmatpush3.msra.mxu0 %v4058_v51 }
0x16e5   :  { %4965 = vmatprep.subr.mxu0 %v5272_v1 }
0x16e6   :  { %4966 = vmatpush3.msra.mxu0 %v4057_v50 }
0x16e7   :  { %4967 = vmatprep.subr.mxu0 %v5272_v1 }
0x16e8   :  { %4968 = vmatpush3.msra.mxu0 %v4056_v52 }
0x16e9   :  { %4969 = vmatprep.subr.mxu0 %v5272_v1 }
0x16ea   :  { %4970 = vmatpush3.msra.mxu0 %v4055_v53 }
0x16eb   :  { %4974 = vmatprep.subr.mxu0 %v5272_v1 }
0x1767   :  { %v4013_v36 = vpop.xlane.xlu1 %4012 }
0x1768   :  { %v4015_v37 = vmul.f32 0.015625, %v4013_v36 }
0x1769   :  { %v4010_v38 = vpop.xlane.xlu0 %4009 }
0x176a   :  { %v4017_v39 = vsub.f32 %v4003_v31, %v4015_v37  ;;  %v4014_v40 = vmul.f32 0.015625, %v4010_v38 }
0x176c   :  { %v4016_v42 = vsub.f32 %v4002_v34, %v4014_v40  ;;  %v4019_v43 = vmul.f32 %v4017_v39, %v4017_v39 }
0x176e   :  { %v4023_v27 = vsel %vm264_vm4, %v4019_v43, 0.0  ;;  %v4018_v44 = vmul.f32 %v4016_v42, %v4016_v42 }
0x176f   :  { %4024 = vadd.xlane.f32.xlu1 %v4023_v27 }
0x1770   :  { %v4020_v45 = vsel %vm264_vm4, %v4018_v44, 0.0 }
0x1771   :  { %4021 = vadd.xlane.f32.xlu0 %v4020_v45 }
0x1780   :  { %4234 = vperm.xlu1 %5015, %v4232_v14  }
0x17f8   :  { %v4025_v24 = vpop.xlane.xlu1 %4024 }
0x17f9   :  { %v4027_v23 = vmul.f32 0.015625, %v4025_v24 }
0x17fa   :  { %v4022_v54 = vpop.xlane.xlu0 %4021 }
0x17fb   :  { %v4029_v55 = vadd.f32 1e-12, %v4027_v23  ;;  %v4026_v56 = vmul.f32 0.015625, %v4022_v54 }
0x17fc   :  { %v4235_v32 = vpop.permute.xlu1 %4234 }
0x17fd   :  { %5104 = vrsqrt.f32 %v4029_v55  ;;  %v4028_v57 = vadd.f32 1e-12, %v4026_v56  ;;  %vm4236_vm12 = vcmp.eq.s32.totalorder %v5470_v18, %v4235_v32 }
0x17fe   :  { %v4446_v22 = vsel %vm4236_vm12, 1.0, %v5272_v1 }
0x17ff   :  { %5106 = vrsqrt.f32 %v4028_v57 }
0x180a   :  { %v5105_v33 = vpop.eup %5104 }
0x180b   :  { %v4033_v41 = vmul.f32 %v5105_v33, %v4017_v39 }
0x180c   :  { %v5107_v59 = vpop.eup %5106 }
0x180d   :  { %v4032_v61 = vmul.f32 %v5107_v59, %v4016_v42  ;;  %v4041_v62 = vmul.f32 %v4440_v25, %v4033_v41 }
0x180f   :  { %v4040_v63 = vmul.f32 %v4440_v25, %v4032_v61  ;;  %v4049_v0 = vadd.f32 %v4441_v60, %v4041_v62 }
0x1811   :  { %v4048_v58 = vadd.f32 %v4441_v60, %v4040_v63  ;;  %v4051_v2 = vrot.slane %v4049_v0, 7 }
0x1813   :  { %v4054_v3 = vsel %vm4053_vm10, %v4048_v58, %v4051_v2 }
0x1814   :  { %4972 = vmatmul.mubr.msk.f32.vlgmr.msra.gmra.mxu0 %vm264_vm4, %v4054_v3 }
0x1815   :  { %4990 = vmatprep.mubr.msk.f32.mxu0 %vm5273_vm5, %v5272_v1  ;;  %4975 = vmatpush3.msra.mxu0 %v4151_v4 }
0x1816   :  { %4976 = vmatprep.subr.mxu0 %v5272_v1 }
0x1817   :  { %4977 = vmatpush3.msra.mxu0 %v4150_v5 }
0x1818   :  { %4978 = vmatprep.subr.mxu0 %v5272_v1 }
0x1819   :  { %4979 = vmatpush3.msra.mxu0 %v4149_v6 }
0x181a   :  { %4980 = vmatprep.subr.mxu0 %v5272_v1 }
0x181b   :  { %4981 = vmatpush3.msra.mxu0 %v4148_v7 }
0x181c   :  { %4982 = vmatprep.subr.mxu0 %v5272_v1 }
0x181d   :  { %4983 = vmatpush3.msra.mxu0 %v4147_v8 }
0x181e   :  { %4984 = vmatprep.subr.mxu0 %v5272_v1 }
0x181f   :  { %4985 = vmatpush3.msra.mxu0 %v4146_v9 }
0x1820   :  { %4986 = vmatprep.subr.mxu0 %v5272_v1 }
0x1821   :  { %4987 = vmatpush3.msra.mxu0 %v4145_v11 }
0x1822   :  { %4988 = vmatprep.subr.mxu0 %v5272_v1 }
0x1823   :  { %4989 = vmatpush3.msra.mxu0 %v4144_v12 }
0x18d4   :  { %v4139_v16 = vpop.f32.mrf.mxu0 }
0x18d5   :  { %v4140_v19 = vadd.f32 %v4442_v15, %v4139_v16 }
0x18d6   :  { %v4973_v20 = vpop.f32.mrf.mxu0 }
0x18d7   :  { %5108 = vtanh.f32 %v4140_v19 }
0x18e4   :  { %v5109_v26 = vpop.eup %5108 }
0x18e5   :  { %4991 = vmatmul.mubr.msk.f32.vlgmr.msra.gmra.mxu0 %vm264_vm4, %v5109_v26 }
0x19a5   :  { %v4228_v21 = vpop.f32.mrf.mxu0 }
0x19a6   :  { %v4229_v17 = vadd.f32 %v4444_v28, %v4228_v21 }
0x19a7   :  { %v4992_v29 = vpop.f32.mrf.mxu0 }
0x19a8   :  { %v4240_v13 = vsel %vm4239_vm11, %v4229_v17, -inf  ;;  %4273 = vst.msk [vmem:[#allocation12] sm:$0x3] %vm4239_vm11, %v4229_v17  ;;  %v4252_v36 = vmul.f32 %v4446_v22, %v4229_v17 }
0x19a9   :  { %4241 = vmax.xlane.f32.xlu0 %v4240_v13 }
0x19aa   :  { %v4253_v37 = vsel %vm4239_vm11, %v4252_v36, 0.0 }
0x1a32   :  { %v4242_v10 = vpop.xlane.xlu0 %4241 }
0x1a33   :  { %v4243_v30 = vsub.f32 %v4229_v17, %v4242_v10 }
0x1a35   :  { %v4244_v31 = vmul.f32 1.442695, %v4243_v30 }
0x1a37   :  { %5110 = vpow2.f32 %v4244_v31 }
0x1a44   :  { %v5111_v34 = vpop.eup %5110 }
0x1a45   :  { %v4246_v35 = vsel %vm4239_vm11, %v5111_v34, 0.0 }
0x1a46   :  { %4247 = vadd.xlane.f32.xlu0 %v4246_v35 }
0x1a4a   :  { %4254 = vadd.xlane.f32.xlu0 %v4253_v37 }
0x1acf   :  { %v4248_v38 = vpop.xlane.xlu0 %4247 }
0x1ad0   :  { %5112 = vlog2.f32 %v4248_v38 }
0x1ad3   :  { %v4255_v43 = vpop.xlane.xlu0 %4254 }
0x1add   :  { %v5113_v39 = vpop.eup %5112 }
0x1ade   :  { %v4250_v40 = vmul.f32 0.6931472, %v5113_v39 }
0x1ae0   :  { %v4251_v42 = vadd.f32 %v4250_v40, %v4242_v10 }
0x1ae2   :  { %v4256_v27 = vsub.f32 %v4251_v42, %v4255_v43 }
0x1ae4   :  { %v4258_v44 = vsel %vm4257_vm13, %v4256_v27, 0.0 }
0x1ae5   :  { %4259 = vadd.xlane.f32.xlu0 %v4258_v44 }
0x1ae6   :  { %5225 = shalt.err (!%p5222_p1)
}
0x1ae7   :  { %4293 = dma.vmem_to_hbm [thread:$0]  %s4291_s22, 32, %s6281_s24, [#allocation13]   ;;  %vm4271_vm14 = vcmask 0  }
0x1ae8   :  { %s5282_s4 = smov [#allocation11]  }
0x1ae9   :  { %s4280_s17 = sshll.u32 %s5282_s4, 4  ;;  %s4281_s17 = int_to_ptr.vmem [resolvable:$true] %s4280_s17 }
0x1aea   :  { %s5234_s9 = scalar_lea.vmem %s4281_s17, 16  ;;  %s5238_s18 = scalar_lea.vmem %s4281_s17, 32 }
0x1aeb   :  { %p5235_p2 = scmp.ne.s32.totalorder %s4281_s17, %s5234_s9  ;;  %p5239_p3 = scmp.lt.s32.totalorder %s4281_s17, %s4281_s17 }
0x1aec   :  { %p5240_p4 = scmp.lt.s32.totalorder %s5238_s18, %s5234_s9 }
0x1aee   :  { %p5241_p5 = por %p5240_p4, %p5239_p3 }
0x1af0   :  { %p5242_p6 = pnand %p5241_p5, %p5235_p2 }
0x1b6e   :  { %v4260_v1 = vpop.xlane.xlu0 %4259 }
0x1b6f   :  { %v4261_v18 = vrot.slane %v4260_v1, 4 }
0x1b71   :  { %v4262_v45 = vadd.f32 %v4261_v18, %v4260_v1 }
0x1b73   :  { %v4263_v46 = vrot.slane %v4262_v45, 2 }
0x1b75   :  { %v4264_v47 = vadd.f32 %v4263_v46, %v4262_v45 }
0x1b77   :  { %v4265_v48 = vrot.slane %v4264_v47, 1 }
0x1b79   :  { %v4266_v49 = vadd.f32 %v4265_v48, %v4264_v47 }
0x1b7b   :  { %4993 = vpush %v4266_v49 }
0x1bac   :  { %s4994_s25 = spop %4993 }
0x1bad   :  { %v4268_v51 = vstv %s4994_s25 }
0x1bae   :  { %v4270_v50 = vmul.f32 0.5, %v4268_v51 }
0x1bb0   :  { %4272 = vst.msk [vmem:[#allocation11] sm:$0x1] %vm4271_vm14, %v4270_v50 }
0x1bb1   :  { %5245 = shalt.err (!%p5242_p6)
}
0x1bb2   :  { %4283 = dma.vmem_to_hbm [thread:$0]  %s4281_s17, 16, %s6280_s23, [#allocation4]  }
0x1bb3   :  { %5260 = dma.done.wait [#allocation4], 16  }
0x1bb4   :  { %5261 = vsyncadd [#allocation4], 4294967280 }
0x1bb5   :  { %5262 = dma.done.wait [#allocation13], 32  }
0x1bb6   :  { %5263 = vsyncadd [#allocation13], 4294967264 }
0x1bb7   :  { %4300 = vsyncpa [#allocation3], 1 }
0x1bb8   :  { %4301 = vsyncpa [#allocation6], 1 }
0x1bb9   :  { %4302 = vsyncpa [#allocation9], 1 }
0x1bba   :  { %4303 = vsyncpa [#allocation4], 1 }
0x1bbb   :  { %4304 = vsyncpa [#allocation13], 1 }

</bundles_post_ra>
